<compile_context>
chip_gen: v5e
topology: v5e:2x2
jax: 0.10.0
libtpu: 0.0.40
codegen_flags: <defaults>
</compile_context>

<pallas_src>
import functools
import math

import jax
import jax.numpy as jnp
from jax.experimental import pallas as pl
from jax.experimental.pallas import tpu as pltpu

EPS = 1e-5      # nn.BatchNorm2d default eps
LANE = 128      # TPU lane width; internal channel dim is zero-padded to this


# ---------------------------------------------------------------------------
# Pallas kernels
# ---------------------------------------------------------------------------
def _conv3x3_stats_kernel(xp_ref, w_ref, y_ref, stats_ref):
    """3x3 / stride-1 / pad-1 conv for ONE image + per-image BN statistics.

    xp_ref   : (1, H+2, W+2, Cp) bf16  spatially pre-padded input image
    w_ref    : (9*Cp, Cp)        bf16  weight rows grouped by tap (di*3 + dj)
    y_ref    : (H*W, Cp)         f32   flattened conv output rows for this image
    stats_ref: (1, 2, Cp)        f32   [sum(y); sum(y*y)] over this image's rows
    """
    _, hp, wp, cin = xp_ref.shape
    h, w = hp - 2, wp - 2
    cout = y_ref.shape[-1]

    acc = jnp.zeros((h * w, cout), jnp.float32)
    for tap in range(9):                          # unrolled: 9 shifted bf16 MXU matmuls
        di, dj = tap // 3, tap % 3
        xs = xp_ref[0, di:di + h, dj:dj + w, :].reshape(h * w, cin)
        wk = w_ref[tap * cin:(tap + 1) * cin, :]
        acc = acc + jnp.dot(xs, wk, preferred_element_type=jnp.float32)

    y_ref[...] = acc
    s = jnp.sum(acc, axis=0, keepdims=True)
    ss = jnp.sum(acc * acc, axis=0, keepdims=True)
    stats_ref[0] = jnp.concatenate([s, ss], axis=0)


def _bn_act_kernel(y_ref, stats_ref, gamma_ref, beta_ref, *rest,
                   count, relu, has_residual):
    """Training-mode BatchNorm (batch stats, biased var) + optional residual + ReLU.

    All epilogue math is done in f32 (safe on v5e); only the final store casts.
    """
    if has_residual:
        res_ref, o_ref = rest
    else:
        (o_ref,) = rest

    tot = jnp.sum(stats_ref[...], axis=0)             # (2, Cp): global channel sums
    inv_n = 1.0 / count
    mean = tot[0:1, :] * inv_n                        # (1, Cp)
    var = jnp.maximum(tot[1:2, :] * inv_n - mean * mean, 0.0)
    scale = gamma_ref[...] * jax.lax.rsqrt(var + EPS)
    shift = beta_ref[...] - mean * scale

    y = y_ref[...] * scale + shift
    if has_residual:
        y = y + res_ref[...]
    if relu:
        y = jnp.maximum(y, 0.0)
    o_ref[...] = y.astype(o_ref.dtype)


# ---------------------------------------------------------------------------
# Wrappers (pallas_call plumbing)
# ---------------------------------------------------------------------------
def conv3x3_stats(x_nhwc, w_mat):
    """x_nhwc: (N, H, W, Cp) float; w_mat: (9*Cp, Cp) bf16.
    Returns y (N*H*W, Cp) f32 and per-image stats (N, 2, Cp) f32."""
    n, h, w, cp = x_nhwc.shape
    assert w_mat.shape == (9 * cp, cp)
    assert (h * w) % 8 == 0
    xp = jnp.pad(x_nhwc, ((0, 0), (1, 1), (1, 1), (0, 0))).astype(jnp.bfloat16)
    hp, wp = h + 2, w + 2
    return pl.pallas_call(
        _conv3x3_stats_kernel,
        grid=(n,),
        in_specs=[
            pl.BlockSpec((1, hp, wp, cp), lambda i: (i, 0, 0, 0)),
            pl.BlockSpec((9 * cp, cp), lambda i: (0, 0)),      # VMEM-resident weights
        ],
        out_specs=[
            pl.BlockSpec((h * w, cp), lambda i: (i, 0)),
            pl.BlockSpec((1, 2, cp), lambda i: (i, 0, 0)),
        ],
        out_shape=[
            jax.ShapeDtypeStruct((n * h * w, cp), jnp.float32),
            jax.ShapeDtypeStruct((n, 2, cp), jnp.float32),
        ],
        compiler_params=pltpu.CompilerParams(dimension_semantics=("parallel",)),
    )(xp, w_mat)


def _pick_row_tile(m):
    # Largest aligned row tile that still leaves >=2 grid steps (v7x megacore).
    for t in (512, 256, 128, 64, 32, 16, 8):
        if m % t == 0 and m // t >= 2:
            return t
    return m


def batchnorm_act(y, stats, gamma, beta, *, count, relu,
                  residual=None, out_dtype=jnp.float32):
    m, cp = y.shape
    tm = _pick_row_tile(m)
    has_res = residual is not None
    kern = functools.partial(_bn_act_kernel, count=count, relu=relu,
                             has_residual=has_res)
    in_specs = [
        pl.BlockSpec((tm, cp), lambda i: (i, 0)),
        pl.BlockSpec(stats.shape, lambda i: (0, 0, 0)),        # tiny, resident
        pl.BlockSpec((1, cp), lambda i: (0, 0)),
        pl.BlockSpec((1, cp), lambda i: (0, 0)),
    ]
    args = [y, stats, gamma.reshape(1, cp), beta.reshape(1, cp)]
    if has_res:
        in_specs.append(pl.BlockSpec((tm, cp), lambda i: (i, 0)))
        args.append(residual)
    return pl.pallas_call(
        kern,
        grid=(m // tm,),
        in_specs=in_specs,
        out_specs=pl.BlockSpec((tm, cp), lambda i: (i, 0)),
        out_shape=jax.ShapeDtypeStruct((m, cp), out_dtype),
        compiler_params=pltpu.CompilerParams(dimension_semantics=("parallel",)),
    )(*args)


# ---------------------------------------------------------------------------
# Plain-JAX glue: parameter packing + forward pass
# ---------------------------------------------------------------------------
def _prep_conv_weight(w, cp):
    """(3, 3, Cin, Cout) -> zero-padded (9*Cp, Cp) bf16 matmul operand."""
    kh, kw, cin, cout = w.shape
    wpad = jnp.pad(w, ((0, 0), (0, 0), (0, cp - cin), (0, cp - cout)))
    return wpad.reshape(kh * kw * cp, cp).astype(jnp.bfloat16)


def _pad_vec(v, cp):
    return jnp.pad(v, (0, cp - v.shape[0])).reshape(1, cp).astype(jnp.float32)


def basic_block_forward(x_nchw, params):
    """BasicBlock.forward with stride=1, downsample=None (identity shortcut)."""
    n, c, h, w = x_nchw.shape
    cp = max(LANE, ((c + LANE - 1) // LANE) * LANE)
    count = n * h * w                                 # BN reduces over N*H*W pixels

    # NCHW -> NHWC, channel-pad once to lane-dense width (padded lanes stay zero).
    x = jnp.transpose(x_nchw, (0, 2, 3, 1)).astype(jnp.float32)
    x = jnp.pad(x, ((0, 0), (0, 0), (0, 0), (0, cp - c)))
    resid = x.reshape(n * h * w, cp)                  # identity shortcut, f32

    w1 = _prep_conv_weight(params["w1"], cp)
    w2 = _prep_conv_weight(params["w2"], cp)
    g1, b1 = _pad_vec(params["g1"], cp), _pad_vec(params["b1"], cp)
    g2, b2 = _pad_vec(params["g2"], cp), _pad_vec(params["b2"], cp)

    # conv1 -> bn1 -> relu   (bn1 output stored bf16: it directly feeds conv2's MXU)
    y1, st1 = conv3x3_stats(x, w1)
    h1 = batchnorm_act(y1, st1, g1, b1, count=count, relu=True,
                       out_dtype=jnp.bfloat16)

    # conv2 -> bn2 -> (+residual) -> relu   (residual add + final ReLU fused)
    y2, st2 = conv3x3_stats(h1.reshape(n, h, w, cp), w2)
    out = batchnorm_act(y2, st2, g2, b2, count=count, relu=True,
                        residual=resid, out_dtype=jnp.float32)

    out = out[:, :c].reshape(n, h, w, c)
    return jnp.transpose(out, (0, 3, 1, 2))           # NHWC -> NCHW


# ---------------------------------------------------------------------------
# Pure-JAX reference (XLA conv) for a loose numerical check, and param init
# ---------------------------------------------------------------------------
def _reference_forward(x_nchw, params):
    x = jnp.transpose(x_nchw, (0, 2, 3, 1)).astype(jnp.float32)

    def conv(v, wt):
        return jax.lax.conv_general_dilated(
            v, wt, window_strides=(1, 1), padding="SAME",
            dimension_numbers=("NHWC", "HWIO", "NHWC"))

    def bn(v, g, b):
        m = jnp.mean(v, axis=(0, 1, 2), keepdims=True)
        var = jnp.mean(jnp.square(v - m), axis=(0, 1, 2), keepdims=True)
        return (v - m) * jax.lax.rsqrt(var + EPS) * g + b

    h1 = jax.nn.relu(bn(conv(x, params["w1"]), params["g1"], params["b1"]))
    h2 = bn(conv(h1, params["w2"]), params["g2"], params["b2"]) + x
    return jnp.transpose(jax.nn.relu(h2), (0, 3, 1, 2))


def init_params(key, planes):
    k1, k2 = jax.random.split(key)
    bound = 1.0 / math.sqrt(3 * 3 * planes)   # PyTorch Conv2d default init range
    return dict(
        w1=jax.random.uniform(k1, (3, 3, planes, planes), jnp.float32, -bound, bound),
        g1=jnp.ones((planes,), jnp.float32), b1=jnp.zeros((planes,), jnp.float32),
        w2=jax.random.uniform(k2, (3, 3, planes, planes), jnp.float32, -bound, bound),
        g2=jnp.ones((planes,), jnp.float32), b2=jnp.zeros((planes,), jnp.float32),
    )


if __name__ == "__main__":
    key = jax.random.PRNGKey(0)
    kx, kp = jax.random.split(key)
    N, C, H, W = 2, 64, 16, 16                 # inplanes == planes (identity shortcut)
    x = jax.random.normal(kx, (N, C, H, W), jnp.float32)
    params = init_params(kp, planes=C)

    fwd = jax.jit(basic_block_forward)
    out = fwd(x, params)
    jax.block_until_ready(out)

    assert out.shape == (N, C, H, W), out.shape
    assert bool(jnp.all(jnp.isfinite(out)))
    ref = _reference_forward(x, params)
    err = float(jnp.max(jnp.abs(out - ref)))
    assert err < 0.25, f"max abs err vs reference = {err}"   # bf16-MXU tolerance
    print("KERNEL_OK")
</pallas_src>

<mosaic_0001>
module attributes {stable_mosaic.version = 11 : i64} {
  func.func @_conv3x3_stats_kernel(%arg0: i32, %arg1: memref<1x18x18x128xbf16, #tpu.memory_space<vmem>>, %arg2: memref<1152x128xbf16, #tpu.memory_space<vmem>>, %arg3: memref<256x128xf32, #tpu.memory_space<vmem>>, %arg4: memref<1x2x128xf32, #tpu.memory_space<vmem>>) attributes {dimension_semantics = [#tpu.dimension_semantics<parallel>], iteration_bounds = array<i64: 2>, scalar_prefetch = 0 : i64, scratch_operands = 0 : i64, tpu.core_type = #tpu.core_type<tc>, window_params = [{transform_indices = @transform_0, window_bounds = array<i64: 1, 18, 18, 128>}, {pipeline_mode = #tpu.pipeline_mode<synchronous>, transform_indices = @transform_1, window_bounds = array<i64: 1152, 128>}, {transform_indices = @transform_2, window_bounds = array<i64: 256, 128>}, {transform_indices = @transform_3, window_bounds = array<i64: 1, 2, 128>}]} {
    %cst = arith.constant 0.000000e+00 : f32
    %0 = vector.broadcast %cst : f32 to vector<256x128xf32>
    %c0 = arith.constant 0 : index
    %c0_0 = arith.constant 0 : index
    %c0_1 = arith.constant 0 : index
    %c0_2 = arith.constant 0 : index
    %1 = vector.load %arg1[%c0, %c0_0, %c0_1, %c0_2] : memref<1x18x18x128xbf16, #tpu.memory_space<vmem>>, vector<1x16x16x128xbf16>
    %2 = vector.shape_cast %1 : vector<1x16x16x128xbf16> to vector<16x16x128xbf16>
    %3 = vector.shape_cast %2 : vector<16x16x128xbf16> to vector<256x128xbf16>
    %c0_3 = arith.constant 0 : index
    %c0_4 = arith.constant 0 : index
    %4 = vector.load %arg2[%c0_3, %c0_4] : memref<1152x128xbf16, #tpu.memory_space<vmem>>, vector<128x128xbf16>
    %cst_5 = arith.constant dense<0.000000e+00> : vector<256x128xf32>
    %5 = tpu.matmul %3, %4, %cst_5 {dimension_numbers = #tpu.dot_dimension_numbers<[1], [0], [0], [1], [0, 0, 1, 1], [], []>} : vector<256x128xbf16>, vector<128x128xbf16>, vector<256x128xf32> -> vector<256x128xf32>
    %6 = arith.addf %0, %5 : vector<256x128xf32>
    %c0_6 = arith.constant 0 : index
    %c0_7 = arith.constant 0 : index
    %c1 = arith.constant 1 : index
    %c0_8 = arith.constant 0 : index
    %7 = vector.load %arg1[%c0_6, %c0_7, %c1, %c0_8] : memref<1x18x18x128xbf16, #tpu.memory_space<vmem>>, vector<1x16x16x128xbf16>
    %8 = vector.shape_cast %7 : vector<1x16x16x128xbf16> to vector<16x16x128xbf16>
    %9 = vector.shape_cast %8 : vector<16x16x128xbf16> to vector<256x128xbf16>
    %c128 = arith.constant 128 : index
    %c0_9 = arith.constant 0 : index
    %10 = vector.load %arg2[%c128, %c0_9] : memref<1152x128xbf16, #tpu.memory_space<vmem>>, vector<128x128xbf16>
    %cst_10 = arith.constant dense<0.000000e+00> : vector<256x128xf32>
    %11 = tpu.matmul %9, %10, %cst_10 {dimension_numbers = #tpu.dot_dimension_numbers<[1], [0], [0], [1], [0, 0, 1, 1], [], []>} : vector<256x128xbf16>, vector<128x128xbf16>, vector<256x128xf32> -> vector<256x128xf32>
    %12 = arith.addf %6, %11 : vector<256x128xf32>
    %c0_11 = arith.constant 0 : index
    %c0_12 = arith.constant 0 : index
    %c2 = arith.constant 2 : index
    %c0_13 = arith.constant 0 : index
    %13 = vector.load %arg1[%c0_11, %c0_12, %c2, %c0_13] : memref<1x18x18x128xbf16, #tpu.memory_space<vmem>>, vector<1x16x16x128xbf16>
    %14 = vector.shape_cast %13 : vector<1x16x16x128xbf16> to vector<16x16x128xbf16>
    %15 = vector.shape_cast %14 : vector<16x16x128xbf16> to vector<256x128xbf16>
    %c256 = arith.constant 256 : index
    %c0_14 = arith.constant 0 : index
    %16 = vector.load %arg2[%c256, %c0_14] : memref<1152x128xbf16, #tpu.memory_space<vmem>>, vector<128x128xbf16>
    %cst_15 = arith.constant dense<0.000000e+00> : vector<256x128xf32>
    %17 = tpu.matmul %15, %16, %cst_15 {dimension_numbers = #tpu.dot_dimension_numbers<[1], [0], [0], [1], [0, 0, 1, 1], [], []>} : vector<256x128xbf16>, vector<128x128xbf16>, vector<256x128xf32> -> vector<256x128xf32>
    %18 = arith.addf %12, %17 : vector<256x128xf32>
    %c0_16 = arith.constant 0 : index
    %c1_17 = arith.constant 1 : index
    %c0_18 = arith.constant 0 : index
    %c0_19 = arith.constant 0 : index
    %19 = vector.load %arg1[%c0_16, %c1_17, %c0_18, %c0_19] : memref<1x18x18x128xbf16, #tpu.memory_space<vmem>>, vector<1x16x16x128xbf16>
    %20 = vector.shape_cast %19 : vector<1x16x16x128xbf16> to vector<16x16x128xbf16>
    %21 = vector.shape_cast %20 : vector<16x16x128xbf16> to vector<256x128xbf16>
    %c384 = arith.constant 384 : index
    %c0_20 = arith.constant 0 : index
    %22 = vector.load %arg2[%c384, %c0_20] : memref<1152x128xbf16, #tpu.memory_space<vmem>>, vector<128x128xbf16>
    %cst_21 = arith.constant dense<0.000000e+00> : vector<256x128xf32>
    %23 = tpu.matmul %21, %22, %cst_21 {dimension_numbers = #tpu.dot_dimension_numbers<[1], [0], [0], [1], [0, 0, 1, 1], [], []>} : vector<256x128xbf16>, vector<128x128xbf16>, vector<256x128xf32> -> vector<256x128xf32>
    %24 = arith.addf %18, %23 : vector<256x128xf32>
    %c0_22 = arith.constant 0 : index
    %c1_23 = arith.constant 1 : index
    %c1_24 = arith.constant 1 : index
    %c0_25 = arith.constant 0 : index
    %25 = vector.load %arg1[%c0_22, %c1_23, %c1_24, %c0_25] : memref<1x18x18x128xbf16, #tpu.memory_space<vmem>>, vector<1x16x16x128xbf16>
    %26 = vector.shape_cast %25 : vector<1x16x16x128xbf16> to vector<16x16x128xbf16>
    %27 = vector.shape_cast %26 : vector<16x16x128xbf16> to vector<256x128xbf16>
    %c512 = arith.constant 512 : index
    %c0_26 = arith.constant 0 : index
    %28 = vector.load %arg2[%c512, %c0_26] : memref<1152x128xbf16, #tpu.memory_space<vmem>>, vector<128x128xbf16>
    %cst_27 = arith.constant dense<0.000000e+00> : vector<256x128xf32>
    %29 = tpu.matmul %27, %28, %cst_27 {dimension_numbers = #tpu.dot_dimension_numbers<[1], [0], [0], [1], [0, 0, 1, 1], [], []>} : vector<256x128xbf16>, vector<128x128xbf16>, vector<256x128xf32> -> vector<256x128xf32>
    %30 = arith.addf %24, %29 : vector<256x128xf32>
    %c0_28 = arith.constant 0 : index
    %c1_29 = arith.constant 1 : index
    %c2_30 = arith.constant 2 : index
    %c0_31 = arith.constant 0 : index
    %31 = vector.load %arg1[%c0_28, %c1_29, %c2_30, %c0_31] : memref<1x18x18x128xbf16, #tpu.memory_space<vmem>>, vector<1x16x16x128xbf16>
    %32 = vector.shape_cast %31 : vector<1x16x16x128xbf16> to vector<16x16x128xbf16>
    %33 = vector.shape_cast %32 : vector<16x16x128xbf16> to vector<256x128xbf16>
    %c640 = arith.constant 640 : index
    %c0_32 = arith.constant 0 : index
    %34 = vector.load %arg2[%c640, %c0_32] : memref<1152x128xbf16, #tpu.memory_space<vmem>>, vector<128x128xbf16>
    %cst_33 = arith.constant dense<0.000000e+00> : vector<256x128xf32>
    %35 = tpu.matmul %33, %34, %cst_33 {dimension_numbers = #tpu.dot_dimension_numbers<[1], [0], [0], [1], [0, 0, 1, 1], [], []>} : vector<256x128xbf16>, vector<128x128xbf16>, vector<256x128xf32> -> vector<256x128xf32>
    %36 = arith.addf %30, %35 : vector<256x128xf32>
    %c0_34 = arith.constant 0 : index
    %c2_35 = arith.constant 2 : index
    %c0_36 = arith.constant 0 : index
    %c0_37 = arith.constant 0 : index
    %37 = vector.load %arg1[%c0_34, %c2_35, %c0_36, %c0_37] : memref<1x18x18x128xbf16, #tpu.memory_space<vmem>>, vector<1x16x16x128xbf16>
    %38 = vector.shape_cast %37 : vector<1x16x16x128xbf16> to vector<16x16x128xbf16>
    %39 = vector.shape_cast %38 : vector<16x16x128xbf16> to vector<256x128xbf16>
    %c768 = arith.constant 768 : index
    %c0_38 = arith.constant 0 : index
    %40 = vector.load %arg2[%c768, %c0_38] : memref<1152x128xbf16, #tpu.memory_space<vmem>>, vector<128x128xbf16>
    %cst_39 = arith.constant dense<0.000000e+00> : vector<256x128xf32>
    %41 = tpu.matmul %39, %40, %cst_39 {dimension_numbers = #tpu.dot_dimension_numbers<[1], [0], [0], [1], [0, 0, 1, 1], [], []>} : vector<256x128xbf16>, vector<128x128xbf16>, vector<256x128xf32> -> vector<256x128xf32>
    %42 = arith.addf %36, %41 : vector<256x128xf32>
    %c0_40 = arith.constant 0 : index
    %c2_41 = arith.constant 2 : index
    %c1_42 = arith.constant 1 : index
    %c0_43 = arith.constant 0 : index
    %43 = vector.load %arg1[%c0_40, %c2_41, %c1_42, %c0_43] : memref<1x18x18x128xbf16, #tpu.memory_space<vmem>>, vector<1x16x16x128xbf16>
    %44 = vector.shape_cast %43 : vector<1x16x16x128xbf16> to vector<16x16x128xbf16>
    %45 = vector.shape_cast %44 : vector<16x16x128xbf16> to vector<256x128xbf16>
    %c896 = arith.constant 896 : index
    %c0_44 = arith.constant 0 : index
    %46 = vector.load %arg2[%c896, %c0_44] : memref<1152x128xbf16, #tpu.memory_space<vmem>>, vector<128x128xbf16>
    %cst_45 = arith.constant dense<0.000000e+00> : vector<256x128xf32>
    %47 = tpu.matmul %45, %46, %cst_45 {dimension_numbers = #tpu.dot_dimension_numbers<[1], [0], [0], [1], [0, 0, 1, 1], [], []>} : vector<256x128xbf16>, vector<128x128xbf16>, vector<256x128xf32> -> vector<256x128xf32>
    %48 = arith.addf %42, %47 : vector<256x128xf32>
    %c0_46 = arith.constant 0 : index
    %c2_47 = arith.constant 2 : index
    %c2_48 = arith.constant 2 : index
    %c0_49 = arith.constant 0 : index
    %49 = vector.load %arg1[%c0_46, %c2_47, %c2_48, %c0_49] : memref<1x18x18x128xbf16, #tpu.memory_space<vmem>>, vector<1x16x16x128xbf16>
    %50 = vector.shape_cast %49 : vector<1x16x16x128xbf16> to vector<16x16x128xbf16>
    %51 = vector.shape_cast %50 : vector<16x16x128xbf16> to vector<256x128xbf16>
    %c1024 = arith.constant 1024 : index
    %c0_50 = arith.constant 0 : index
    %52 = vector.load %arg2[%c1024, %c0_50] : memref<1152x128xbf16, #tpu.memory_space<vmem>>, vector<128x128xbf16>
    %cst_51 = arith.constant dense<0.000000e+00> : vector<256x128xf32>
    %53 = tpu.matmul %51, %52, %cst_51 {dimension_numbers = #tpu.dot_dimension_numbers<[1], [0], [0], [1], [0, 0, 1, 1], [], []>} : vector<256x128xbf16>, vector<128x128xbf16>, vector<256x128xf32> -> vector<256x128xf32>
    %54 = arith.addf %48, %53 : vector<256x128xf32>
    %c0_52 = arith.constant 0 : index
    %c0_53 = arith.constant 0 : index
    %55 = vector.load %arg3[%c0_52, %c0_53] : memref<256x128xf32, #tpu.memory_space<vmem>>, vector<256x128xf32>
    tpu.vector_store %arg3[%c0_52, %c0_53], %54 {strides = array<i32>} : memref<256x128xf32, #tpu.memory_space<vmem>>, vector<256x128xf32>,
    %cst_54 = arith.constant dense<0.000000e+00> : vector<128xf32>
    %56 = vector.multi_reduction <add>, %54, %cst_54 [0] : vector<256x128xf32> to vector<128xf32>
    %57 = vector.shape_cast %56 : vector<128xf32> to vector<1x128xf32>
    %58 = arith.mulf %54, %54 : vector<256x128xf32>
    %cst_55 = arith.constant dense<0.000000e+00> : vector<128xf32>
    %59 = vector.multi_reduction <add>, %58, %cst_55 [0] : vector<256x128xf32> to vector<128xf32>
    %60 = vector.shape_cast %59 : vector<128xf32> to vector<1x128xf32>
    %61 = tpu.concatenate %57, %60 in 0 : vector<1x128xf32>, vector<1x128xf32> -> vector<2x128xf32>
    %c0_56 = arith.constant 0 : index
    %c0_57 = arith.constant 0 : index
    %c0_58 = arith.constant 0 : index
    %62 = vector.load %arg4[%c0_56, %c0_57, %c0_58] : memref<1x2x128xf32, #tpu.memory_space<vmem>>, vector<1x2x128xf32>
    %63 = vector.shape_cast %62 : vector<1x2x128xf32> to vector<2x128xf32>
    %64 = vector.shape_cast %61 : vector<2x128xf32> to vector<1x2x128xf32>
    tpu.vector_store %arg4[%c0_56, %c0_57, %c0_58], %64 {strides = array<i32>} : memref<1x2x128xf32, #tpu.memory_space<vmem>>, vector<1x2x128xf32>,
    return
  }
  func.func @transform_0(%arg0: i32) -> (i32, i32, i32, i32) {
    %c0_i32 = arith.constant 0 : i32
    %c0_i32_0 = arith.constant 0 : i32
    %c0_i32_1 = arith.constant 0 : i32
    %c0_i32_2 = arith.constant 0 : i32
    return %arg0, %c0_i32, %c0_i32_0, %c0_i32_1 : i32, i32, i32, i32
  }
  func.func @transform_1(%arg0: i32) -> (i32, i32) {
    %c0_i32 = arith.constant 0 : i32
    %c0_i32_0 = arith.constant 0 : i32
    %c0_i32_1 = arith.constant 0 : i32
    return %c0_i32, %c0_i32_0 : i32, i32
  }
  func.func @transform_2(%arg0: i32) -> (i32, i32) {
    %c0_i32 = arith.constant 0 : i32
    %c0_i32_0 = arith.constant 0 : i32
    return %arg0, %c0_i32 : i32, i32
  }
  func.func @transform_3(%arg0: i32) -> (i32, i32, i32) {
    %c0_i32 = arith.constant 0 : i32
    %c0_i32_0 = arith.constant 0 : i32
    %c0_i32_1 = arith.constant 0 : i32
    return %arg0, %c0_i32, %c0_i32_0 : i32, i32, i32
  }
}

module attributes {stable_mosaic.version = 11 : i64} {
  func.func @_bn_act_kernel(%arg0: i32, %arg1: memref<256x128xf32, #tpu.memory_space<vmem>>, %arg2: memref<2x2x128xf32, #tpu.memory_space<vmem>>, %arg3: memref<1x128xf32, #tpu.memory_space<vmem>>, %arg4: memref<1x128xf32, #tpu.memory_space<vmem>>, %arg5: memref<256x128xbf16, #tpu.memory_space<vmem>>) attributes {dimension_semantics = [#tpu.dimension_semantics<parallel>], iteration_bounds = array<i64: 2>, scalar_prefetch = 0 : i64, scratch_operands = 0 : i64, tpu.core_type = #tpu.core_type<tc>, window_params = [{transform_indices = @transform_0, window_bounds = array<i64: 256, 128>}, {pipeline_mode = #tpu.pipeline_mode<synchronous>, transform_indices = @transform_1, window_bounds = array<i64: 2, 2, 128>}, {pipeline_mode = #tpu.pipeline_mode<synchronous>, transform_indices = @transform_2, window_bounds = array<i64: 1, 128>}, {pipeline_mode = #tpu.pipeline_mode<synchronous>, transform_indices = @transform_3, window_bounds = array<i64: 1, 128>}, {transform_indices = @transform_4, window_bounds = array<i64: 256, 128>}]} {
    %c0 = arith.constant 0 : index
    %c0_0 = arith.constant 0 : index
    %c0_1 = arith.constant 0 : index
    %0 = vector.load %arg2[%c0, %c0_0, %c0_1] : memref<2x2x128xf32, #tpu.memory_space<vmem>>, vector<2x2x128xf32>
    %cst = arith.constant dense<0.000000e+00> : vector<2x128xf32>
    %1 = vector.multi_reduction <add>, %0, %cst [0] : vector<2x2x128xf32> to vector<2x128xf32>
    %2 = vector.extract_strided_slice %1 {offsets = [0, 0], sizes = [1, 128], strides = [1, 1]} : vector<2x128xf32> to vector<1x128xf32>
    %cst_2 = arith.constant 0.001953125 : f32
    %3 = vector.broadcast %cst_2 : f32 to vector<1x128xf32>
    %4 = arith.mulf %2, %3 : vector<1x128xf32>
    %5 = vector.extract_strided_slice %1 {offsets = [1, 0], sizes = [1, 128], strides = [1, 1]} : vector<2x128xf32> to vector<1x128xf32>
    %cst_3 = arith.constant 0.001953125 : f32
    %6 = vector.broadcast %cst_3 : f32 to vector<1x128xf32>
    %7 = arith.mulf %5, %6 : vector<1x128xf32>
    %8 = arith.mulf %4, %4 : vector<1x128xf32>
    %9 = arith.subf %7, %8 : vector<1x128xf32>
    %cst_4 = arith.constant 0.000000e+00 : f32
    %10 = vector.broadcast %cst_4 : f32 to vector<1x128xf32>
    %11 = arith.maximumf %9, %10 : vector<1x128xf32>
    %c0_5 = arith.constant 0 : index
    %c0_6 = arith.constant 0 : index
    %12 = vector.load %arg3[%c0_5, %c0_6] : memref<1x128xf32, #tpu.memory_space<vmem>>, vector<1x128xf32>
    %cst_7 = arith.constant 9.99999974E-6 : f32
    %13 = vector.broadcast %cst_7 : f32 to vector<1x128xf32>
    %14 = arith.addf %11, %13 : vector<1x128xf32>
    %15 = math.rsqrt %14 : vector<1x128xf32>
    %16 = arith.mulf %12, %15 : vector<1x128xf32>
    %c0_8 = arith.constant 0 : index
    %c0_9 = arith.constant 0 : index
    %17 = vector.load %arg4[%c0_8, %c0_9] : memref<1x128xf32, #tpu.memory_space<vmem>>, vector<1x128xf32>
    %18 = arith.mulf %4, %16 : vector<1x128xf32>
    %19 = arith.subf %17, %18 : vector<1x128xf32>
    %c0_10 = arith.constant 0 : index
    %c0_11 = arith.constant 0 : index
    %20 = vector.load %arg1[%c0_10, %c0_11] : memref<256x128xf32, #tpu.memory_space<vmem>>, vector<256x128xf32>
    %21 = vector.broadcast %16 : vector<1x128xf32> to vector<256x128xf32>
    %22 = arith.mulf %20, %21 : vector<256x128xf32>
    %23 = vector.broadcast %19 : vector<1x128xf32> to vector<256x128xf32>
    %24 = arith.addf %22, %23 : vector<256x128xf32>
    %cst_12 = arith.constant 0.000000e+00 : f32
    %25 = vector.broadcast %cst_12 : f32 to vector<256x128xf32>
    %26 = arith.maximumf %24, %25 : vector<256x128xf32>
    %27 = arith.truncf %26 : vector<256x128xf32> to vector<256x128xbf16>
    %c0_13 = arith.constant 0 : index
    %c0_14 = arith.constant 0 : index
    %28 = vector.load %arg5[%c0_13, %c0_14] : memref<256x128xbf16, #tpu.memory_space<vmem>>, vector<256x128xbf16>
    tpu.vector_store %arg5[%c0_13, %c0_14], %27 {strides = array<i32>} : memref<256x128xbf16, #tpu.memory_space<vmem>>, vector<256x128xbf16>,
    return
  }
  func.func @transform_0(%arg0: i32) -> (i32, i32) {
    %c0_i32 = arith.constant 0 : i32
    %c0_i32_0 = arith.constant 0 : i32
    return %arg0, %c0_i32 : i32, i32
  }
  func.func @transform_1(%arg0: i32) -> (i32, i32, i32) {
    %c0_i32 = arith.constant 0 : i32
    %c0_i32_0 = arith.constant 0 : i32
    %c0_i32_1 = arith.constant 0 : i32
    %c0_i32_2 = arith.constant 0 : i32
    return %c0_i32, %c0_i32_0, %c0_i32_1 : i32, i32, i32
  }
  func.func @transform_2(%arg0: i32) -> (i32, i32) {
    %c0_i32 = arith.constant 0 : i32
    %c0_i32_0 = arith.constant 0 : i32
    %c0_i32_1 = arith.constant 0 : i32
    return %c0_i32, %c0_i32_0 : i32, i32
  }
  func.func @transform_3(%arg0: i32) -> (i32, i32) {
    %c0_i32 = arith.constant 0 : i32
    %c0_i32_0 = arith.constant 0 : i32
    %c0_i32_1 = arith.constant 0 : i32
    return %c0_i32, %c0_i32_0 : i32, i32
  }
  func.func @transform_4(%arg0: i32) -> (i32, i32) {
    %c0_i32 = arith.constant 0 : i32
    %c0_i32_0 = arith.constant 0 : i32
    return %arg0, %c0_i32 : i32, i32
  }
}

module attributes {stable_mosaic.version = 11 : i64} {
  func.func @_bn_act_kernel(%arg0: i32, %arg1: memref<256x128xf32, #tpu.memory_space<vmem>>, %arg2: memref<2x2x128xf32, #tpu.memory_space<vmem>>, %arg3: memref<1x128xf32, #tpu.memory_space<vmem>>, %arg4: memref<1x128xf32, #tpu.memory_space<vmem>>, %arg5: memref<256x128xf32, #tpu.memory_space<vmem>>, %arg6: memref<256x128xf32, #tpu.memory_space<vmem>>) attributes {dimension_semantics = [#tpu.dimension_semantics<parallel>], iteration_bounds = array<i64: 2>, scalar_prefetch = 0 : i64, scratch_operands = 0 : i64, tpu.core_type = #tpu.core_type<tc>, window_params = [{transform_indices = @transform_0, window_bounds = array<i64: 256, 128>}, {pipeline_mode = #tpu.pipeline_mode<synchronous>, transform_indices = @transform_1, window_bounds = array<i64: 2, 2, 128>}, {pipeline_mode = #tpu.pipeline_mode<synchronous>, transform_indices = @transform_2, window_bounds = array<i64: 1, 128>}, {pipeline_mode = #tpu.pipeline_mode<synchronous>, transform_indices = @transform_3, window_bounds = array<i64: 1, 128>}, {transform_indices = @transform_4, window_bounds = array<i64: 256, 128>}, {transform_indices = @transform_5, window_bounds = array<i64: 256, 128>}]} {
    %c0 = arith.constant 0 : index
    %c0_0 = arith.constant 0 : index
    %c0_1 = arith.constant 0 : index
    %0 = vector.load %arg2[%c0, %c0_0, %c0_1] : memref<2x2x128xf32, #tpu.memory_space<vmem>>, vector<2x2x128xf32>
    %cst = arith.constant dense<0.000000e+00> : vector<2x128xf32>
    %1 = vector.multi_reduction <add>, %0, %cst [0] : vector<2x2x128xf32> to vector<2x128xf32>
    %2 = vector.extract_strided_slice %1 {offsets = [0, 0], sizes = [1, 128], strides = [1, 1]} : vector<2x128xf32> to vector<1x128xf32>
    %cst_2 = arith.constant 0.001953125 : f32
    %3 = vector.broadcast %cst_2 : f32 to vector<1x128xf32>
    %4 = arith.mulf %2, %3 : vector<1x128xf32>
    %5 = vector.extract_strided_slice %1 {offsets = [1, 0], sizes = [1, 128], strides = [1, 1]} : vector<2x128xf32> to vector<1x128xf32>
    %cst_3 = arith.constant 0.001953125 : f32
    %6 = vector.broadcast %cst_3 : f32 to vector<1x128xf32>
    %7 = arith.mulf %5, %6 : vector<1x128xf32>
    %8 = arith.mulf %4, %4 : vector<1x128xf32>
    %9 = arith.subf %7, %8 : vector<1x128xf32>
    %cst_4 = arith.constant 0.000000e+00 : f32
    %10 = vector.broadcast %cst_4 : f32 to vector<1x128xf32>
    %11 = arith.maximumf %9, %10 : vector<1x128xf32>
    %c0_5 = arith.constant 0 : index
    %c0_6 = arith.constant 0 : index
    %12 = vector.load %arg3[%c0_5, %c0_6] : memref<1x128xf32, #tpu.memory_space<vmem>>, vector<1x128xf32>
    %cst_7 = arith.constant 9.99999974E-6 : f32
    %13 = vector.broadcast %cst_7 : f32 to vector<1x128xf32>
    %14 = arith.addf %11, %13 : vector<1x128xf32>
    %15 = math.rsqrt %14 : vector<1x128xf32>
    %16 = arith.mulf %12, %15 : vector<1x128xf32>
    %c0_8 = arith.constant 0 : index
    %c0_9 = arith.constant 0 : index
    %17 = vector.load %arg4[%c0_8, %c0_9] : memref<1x128xf32, #tpu.memory_space<vmem>>, vector<1x128xf32>
    %18 = arith.mulf %4, %16 : vector<1x128xf32>
    %19 = arith.subf %17, %18 : vector<1x128xf32>
    %c0_10 = arith.constant 0 : index
    %c0_11 = arith.constant 0 : index
    %20 = vector.load %arg1[%c0_10, %c0_11] : memref<256x128xf32, #tpu.memory_space<vmem>>, vector<256x128xf32>
    %21 = vector.broadcast %16 : vector<1x128xf32> to vector<256x128xf32>
    %22 = arith.mulf %20, %21 : vector<256x128xf32>
    %23 = vector.broadcast %19 : vector<1x128xf32> to vector<256x128xf32>
    %24 = arith.addf %22, %23 : vector<256x128xf32>
    %c0_12 = arith.constant 0 : index
    %c0_13 = arith.constant 0 : index
    %25 = vector.load %arg5[%c0_12, %c0_13] : memref<256x128xf32, #tpu.memory_space<vmem>>, vector<256x128xf32>
    %26 = arith.addf %24, %25 : vector<256x128xf32>
    %cst_14 = arith.constant 0.000000e+00 : f32
    %27 = vector.broadcast %cst_14 : f32 to vector<256x128xf32>
    %28 = arith.maximumf %26, %27 : vector<256x128xf32>
    %c0_15 = arith.constant 0 : index
    %c0_16 = arith.constant 0 : index
    %29 = vector.load %arg6[%c0_15, %c0_16] : memref<256x128xf32, #tpu.memory_space<vmem>>, vector<256x128xf32>
    tpu.vector_store %arg6[%c0_15, %c0_16], %28 {strides = array<i32>} : memref<256x128xf32, #tpu.memory_space<vmem>>, vector<256x128xf32>,
    return
  }
  func.func @transform_0(%arg0: i32) -> (i32, i32) {
    %c0_i32 = arith.constant 0 : i32
    %c0_i32_0 = arith.constant 0 : i32
    return %arg0, %c0_i32 : i32, i32
  }
  func.func @transform_1(%arg0: i32) -> (i32, i32, i32) {
    %c0_i32 = arith.constant 0 : i32
    %c0_i32_0 = arith.constant 0 : i32
    %c0_i32_1 = arith.constant 0 : i32
    %c0_i32_2 = arith.constant 0 : i32
    return %c0_i32, %c0_i32_0, %c0_i32_1 : i32, i32, i32
  }
  func.func @transform_2(%arg0: i32) -> (i32, i32) {
    %c0_i32 = arith.constant 0 : i32
    %c0_i32_0 = arith.constant 0 : i32
    %c0_i32_1 = arith.constant 0 : i32
    return %c0_i32, %c0_i32_0 : i32, i32
  }
  func.func @transform_3(%arg0: i32) -> (i32, i32) {
    %c0_i32 = arith.constant 0 : i32
    %c0_i32_0 = arith.constant 0 : i32
    %c0_i32_1 = arith.constant 0 : i32
    return %c0_i32, %c0_i32_0 : i32, i32
  }
  func.func @transform_4(%arg0: i32) -> (i32, i32) {
    %c0_i32 = arith.constant 0 : i32
    %c0_i32_0 = arith.constant 0 : i32
    return %arg0, %c0_i32 : i32, i32
  }
  func.func @transform_5(%arg0: i32) -> (i32, i32) {
    %c0_i32 = arith.constant 0 : i32
    %c0_i32_0 = arith.constant 0 : i32
    return %arg0, %c0_i32 : i32, i32
  }
}

</mosaic_0001>

<bundles_post_ra>
// kernel: basic_block_forward.5
= control target key start
LH: loop header
LB: loop body
LE: loop exit
PB: predicated region body
PF: predicated region fallthrough
CT: control target
= control target key end

     0   :  { %s638_s15 = smov 0   ;;  %s791_s0 = inlined_call_operand.vmem [shape: f32[512,128], index: 0, kind: input, shape index: {}]   ;;  %s792_s1 = inlined_call_operand.vmem [shape: f32[2,2,128], index: 1, kind: input, shape index: {}]   ;;  %s793_s2 = inlined_call_operand.vmem [shape: f32[1,128], index: 2, kind: input, shape index: {}]   ;;  %s794_s3 = inlined_call_operand.vmem [shape: f32[1,128], index: 3, kind: input, shape index: {}]   ;;  %s795_s4 = inlined_call_operand.vmem [shape: bf16[512,128], index: 4, kind: output, shape index: {}]  }
   0x1 LB: > { %s489_s16 = sadd.s32 4294967295, %s611_s15   ;;  %p493_p0 = scmp.ge.s32.totalorder %s611_s15, 1  ;;  %s611_s15 = sphi %s638_s15, %s14_s15  }
   0x2   : > { %p163_p1 = scmp.lt.s32.totalorder %s611_s15, 3 }
   0x4   : > { %p164_p2 = pnand %p493_p0, %p163_p1 }
   0x5   : > { %s494_s21 = sshll.u32 (!%p164_p2), %s489_s16, 5 }
   0x6   : > { %167 = sbr.rel (%p164_p2) target bundleno = 91 (0x5b), region = 36  ;;  %p190_p3 = scmp.lt.s32.totalorder (!%p164_p2), %s494_s21, 63 }
   0xb   : > { %v201_v0 = vld [vmem:[%s792_s1] sm:$0x3]  ;;  %v202_v1 = vld [vmem:[%s792_s1 + $0x2] sm:$0x3]  ;;  %vm203_vm0 = vcmask 1041408   ;;  %s797_s21 = smov (!%p190_p3, %s494_s21), 63 }
   0xc   : > { %v204_v2 = vsel %vm203_vm0, %v201_v0, 0.0  ;;  %v205_v3 = vsel %vm203_vm0, %v202_v1, 0.0  ;;  %s495_s22 = sshll.u32 %s797_s21, 3  ;;  %v214_v18 = vld [vmem:[%s793_s2] sm:$0x1]  ;;  %s497_s30 = sshll.u32 %s797_s21, 2 }
   0xd   : > { %v206_v4 = vadd.f32 %v205_v3, %v204_v2  ;;  %s661_s27 = scalar_lea.vmem %s791_s0, %s495_s22  ;;  %v232_v21 = vld [vmem:[%s794_s3] sm:$0x1]  ;;  %s710_s7 = scalar_lea.vmem %s795_s4, %s497_s30 }
   0xe   : > { %v235_v22 = vld [vmem:[%s661_s27] sm:$0xff]  ;;  %v236_v23 = vld [vmem:[%s661_s27 + $0x8] sm:$0xff]  ;;  %v237_v24 = vld [vmem:[%s661_s27 + $0x10] sm:$0xff] }
   0xf   : > { %v207_v5 = vmul.f32 0.001953125, %v206_v4  ;;  %v238_v25 = vld [vmem:[%s661_s27 + $0x18] sm:$0xff]  ;;  %v239_v26 = vld [vmem:[%s661_s27 + $0x20] sm:$0xff]  ;;  %v240_v29 = vld [vmem:[%s661_s27 + $0x28] sm:$0xff] }
  0x10   : > { %v241_v30 = vld [vmem:[%s661_s27 + $0x30] sm:$0xff]  ;;  %v242_v31 = vld [vmem:[%s661_s27 + $0x38] sm:$0xff]  ;;  %v243_v32 = vld [vmem:[%s661_s27 + $0x40] sm:$0xff] }
  0x11   : > { %v208_v6 = vmul.f32 %v207_v5, %v207_v5  ;;  %v244_v33 = vld [vmem:[%s661_s27 + $0x48] sm:$0xff]  ;;  %v245_v34 = vld [vmem:[%s661_s27 + $0x50] sm:$0xff]  ;;  %v246_v39 = vld [vmem:[%s661_s27 + $0x58] sm:$0xff] }
  0x12   : > { %v247_v40 = vld [vmem:[%s661_s27 + $0x60] sm:$0xff]  ;;  %v248_v41 = vld [vmem:[%s661_s27 + $0x68] sm:$0xff] }
  0x13   : > { %v210_v7 = vrot.slane %v208_v6, 7 }
  0x15   : > { %v212_v8 = vsub.f32 %v207_v5, %v210_v7 }
  0x17   : > { %v213_v9 = vmax.f32 %v212_v8, 0.0 }
  0x19   : > { %v215_v10 = vadd.f32 1e-05, %v213_v9 }
  0x1b   : > { %603 = vrsqrt.f32 %v215_v10  ;;  %vm222_vm1 = vweird.f32 %v215_v10 }
  0x21   : > { %v604_v11 = vpop.eup %603 }
  0x22   : > { %v217_v12 = vmul.f32 %v604_v11, %v215_v10  ;;  %vm223_vm2 = vweird.f32 %v604_v11  ;;  %v249_v10 = vld [vmem:[%s661_s27 + $0x70] sm:$0xff] }
  0x23   : > { %vm224_vm3 = vmor %vm222_vm1, %vm223_vm2 }
  0x24   : > { %v218_v13 = vmul.f32 %v604_v11, %v217_v12 }
  0x26   : > { %v219_v14 = vmul.f32 0.5, %v218_v13 }
  0x28   : > { %v220_v15 = vsub.f32 1.5, %v219_v14 }
  0x2a   : > { %v221_v16 = vmul.f32 %v604_v11, %v220_v15 }
  0x2c   : > { %v225_v17 = vsel %vm224_vm3, %v604_v11, %v221_v16  ;;  %v250_v11 = vld [vmem:[%s661_s27 + $0x78] sm:$0xff]  ;;  %v251_v16 = vld [vmem:[%s661_s27 + $0x80] sm:$0xff] }
  0x2d   : > { %227 = vst [vmem:[#allocation1] sm:$0xff] %v225_v17 }
  0x34   : > { %v229_v19 = vld [vmem:[#allocation1 + $0x1] ss:$9 sm:$0xff] }
  0x35   : > { %v231_v20 = vmul.f32 %v229_v19, %v214_v18 }
  0x37   : > { %v233_v27 = vmul.f32 %v231_v20, %v207_v5  ;;  %v671_v28 = vperm.slane %v231_v20, 0 }
  0x39   : > { %v234_v35 = vsub.f32 %v232_v21, %v233_v27  ;;  %v270_v36 = vmul.f32 %v671_v28, %v235_v22  ;;  %v271_v37 = vmul.f32 %v671_v28, %v236_v23  ;;  %v272_v38 = vmul.f32 %v671_v28, %v237_v24  ;;  %v252_v21 = vld [vmem:[%s661_s27 + $0x88] sm:$0xff]  ;;  %v254_v27 = vld [vmem:[%s661_s27 + $0x98] sm:$0xff] }
  0x3a   : > { %v273_v42 = vmul.f32 %v671_v28, %v238_v25  ;;  %v274_v43 = vmul.f32 %v671_v28, %v239_v26  ;;  %v275_v44 = vmul.f32 %v671_v28, %v240_v29  ;;  %v276_v45 = vmul.f32 %v671_v28, %v241_v30  ;;  %v253_v26 = vld [vmem:[%s661_s27 + $0x90] sm:$0xff] }
  0x3b   : > { %v689_v46 = vperm.slane %v234_v35, 0  ;;  %v277_v47 = vmul.f32 %v671_v28, %v242_v31  ;;  %v278_v48 = vmul.f32 %v671_v28, %v243_v32  ;;  %v279_v49 = vmul.f32 %v671_v28, %v244_v33  ;;  %v255_v33 = vld [vmem:[%s661_s27 + $0xa0] sm:$0xff] }
  0x3c   : > { %v280_v50 = vmul.f32 %v671_v28, %v245_v34  ;;  %v281_v51 = vmul.f32 %v671_v28, %v246_v39  ;;  %v282_v52 = vmul.f32 %v671_v28, %v247_v40  ;;  %v283_v53 = vmul.f32 %v671_v28, %v248_v41 }
  0x3d   : > { %v305_v54 = vadd.f32 %v689_v46, %v270_v36  ;;  %v306_v55 = vadd.f32 %v689_v46, %v271_v37  ;;  %v307_v56 = vadd.f32 %v689_v46, %v272_v38  ;;  %v308_v57 = vadd.f32 %v689_v46, %v273_v42  ;;  %v256_v38 = vld [vmem:[%s661_s27 + $0xa8] sm:$0xff] }
  0x3e   : > { %v309_v58 = vadd.f32 %v689_v46, %v274_v43  ;;  %v310_v59 = vadd.f32 %v689_v46, %v275_v44  ;;  %v311_v60 = vadd.f32 %v689_v46, %v276_v45  ;;  %v312_v61 = vadd.f32 %v689_v46, %v277_v47  ;;  %v257_v43 = vld [vmem:[%s661_s27 + $0xb0] sm:$0xff] }
  0x3f   : > { %v337_v62 = vmax.f32 %v305_v54, 0.0  ;;  %v338_v63 = vmax.f32 %v306_v55, 0.0  ;;  %v339_v0 = vmax.f32 %v307_v56, 0.0  ;;  %v340_v1 = vmax.f32 %v308_v57, 0.0  ;;  %v259_v54 = vld [vmem:[%s661_s27 + $0xc0] sm:$0xff] }
  0x40   : > { %v341_v2 = vmax.f32 %v309_v58, 0.0  ;;  %v342_v3 = vmax.f32 %v310_v59, 0.0  ;;  %v343_v4 = vmax.f32 %v311_v60, 0.0  ;;  %v344_v5 = vmax.f32 %v312_v61, 0.0  ;;  %v260_v59 = vld [vmem:[%s661_s27 + $0xc8] sm:$0xff] }
  0x41   : > { %v503_v6 = vpack.c.bf16 %v338_v63, %v337_v62  ;;  %v508_v7 = vpack.c.bf16 %v340_v1, %v339_v0  ;;  %v313_v8 = vadd.f32 %v689_v46, %v278_v48  ;;  %v314_v9 = vadd.f32 %v689_v46, %v279_v49  ;;  %v258_v49 = vld [vmem:[%s661_s27 + $0xb8] sm:$0xff]  ;;  %v261_v0 = vld [vmem:[%s661_s27 + $0xd0] sm:$0xff] }
  0x42   : > { %v513_v12 = vpack.c.bf16 %v342_v3, %v341_v2  ;;  %v518_v13 = vpack.c.bf16 %v344_v5, %v343_v4  ;;  %v315_v14 = vadd.f32 %v689_v46, %v280_v50  ;;  %v316_v15 = vadd.f32 %v689_v46, %v281_v51  ;;  %v262_v1 = vld [vmem:[%s661_s27 + $0xd8] sm:$0xff] }
  0x43   : > { %504 = vst [vmem:[%s710_s7] sm:$0xff] %v503_v6   ;;  %v345_v17 = vmax.f32 %v313_v8, 0.0  ;;  %v346_v18 = vmax.f32 %v314_v9, 0.0  ;;  %v317_v19 = vadd.f32 %v689_v46, %v282_v52  ;;  %v318_v20 = vadd.f32 %v689_v46, %v283_v53  ;;  %v263_v6 = vld [vmem:[%s661_s27 + $0xe0] sm:$0xff] }
  0x44   : > { %580 = vst [vmem:[%s710_s7 + $0x8] sm:$0xff] %v508_v7   ;;  %v347_v22 = vmax.f32 %v315_v14, 0.0  ;;  %v348_v23 = vmax.f32 %v316_v15, 0.0  ;;  %v284_v24 = vmul.f32 %v671_v28, %v249_v10  ;;  %v285_v25 = vmul.f32 %v671_v28, %v250_v11  ;;  %v264_v11 = vld [vmem:[%s661_s27 + $0xe8] sm:$0xff] }
  0x45   : > { %581 = vst [vmem:[%s710_s7 + $0x10] sm:$0xff] %v513_v12   ;;  %v523_v29 = vpack.c.bf16 %v346_v18, %v345_v17  ;;  %v349_v30 = vmax.f32 %v317_v19, 0.0  ;;  %v350_v31 = vmax.f32 %v318_v20, 0.0  ;;  %v286_v32 = vmul.f32 %v671_v28, %v251_v16  ;;  %v265_v16 = vld [vmem:[%s661_s27 + $0xf0] sm:$0xff] }
  0x46   : > { %582 = vst [vmem:[%s710_s7 + $0x18] sm:$0xff] %v518_v13   ;;  %v528_v34 = vpack.c.bf16 %v348_v23, %v347_v22  ;;  %v319_v35 = vadd.f32 %v689_v46, %v284_v24  ;;  %v320_v36 = vadd.f32 %v689_v46, %v285_v25  ;;  %v287_v37 = vmul.f32 %v671_v28, %v252_v21  ;;  %v266_v21 = vld [vmem:[%s661_s27 + $0xf8] sm:$0xff] }
  0x47   : > { %583 = vst [vmem:[%s710_s7 + $0x20] sm:$0xff] %v523_v29   ;;  %v533_v39 = vpack.c.bf16 %v350_v31, %v349_v30  ;;  %v321_v40 = vadd.f32 %v689_v46, %v286_v32  ;;  %v288_v41 = vmul.f32 %v671_v28, %v253_v26  ;;  %v289_v42 = vmul.f32 %v671_v28, %v254_v27 }
  0x48   : > { %584 = vst [vmem:[%s710_s7 + $0x28] sm:$0xff] %v528_v34   ;;  %v351_v44 = vmax.f32 %v319_v35, 0.0  ;;  %v352_v45 = vmax.f32 %v320_v36, 0.0  ;;  %v322_v47 = vadd.f32 %v689_v46, %v287_v37  ;;  %v290_v48 = vmul.f32 %v671_v28, %v255_v33 }
  0x49   : > { %585 = vst [vmem:[%s710_s7 + $0x30] sm:$0xff] %v533_v39   ;;  %v353_v50 = vmax.f32 %v321_v40, 0.0  ;;  %v323_v51 = vadd.f32 %v689_v46, %v288_v41  ;;  %v324_v52 = vadd.f32 %v689_v46, %v289_v42  ;;  %v291_v53 = vmul.f32 %v671_v28, %v256_v38 }
  0x4a   : > { %v538_v55 = vpack.c.bf16 %v352_v45, %v351_v44  ;;  %v354_v56 = vmax.f32 %v322_v47, 0.0  ;;  %v325_v57 = vadd.f32 %v689_v46, %v290_v48  ;;  %v292_v58 = vmul.f32 %v671_v28, %v257_v43 }
  0x4b   : > { %v355_v60 = vmax.f32 %v323_v51, 0.0  ;;  %v356_v61 = vmax.f32 %v324_v52, 0.0  ;;  %v326_v62 = vadd.f32 %v689_v46, %v291_v53  ;;  %v293_v63 = vmul.f32 %v671_v28, %v258_v49 }
  0x4c   : > { %586 = vst [vmem:[%s710_s7 + $0x38] sm:$0xff] %v538_v55   ;;  %v543_v2 = vpack.c.bf16 %v354_v56, %v353_v50  ;;  %v357_v3 = vmax.f32 %v325_v57, 0.0  ;;  %v327_v4 = vadd.f32 %v689_v46, %v292_v58  ;;  %v294_v5 = vmul.f32 %v671_v28, %v259_v54 }
  0x4d   : > { %v548_v7 = vpack.c.bf16 %v356_v61, %v355_v60  ;;  %v358_v8 = vmax.f32 %v326_v62, 0.0  ;;  %v328_v9 = vadd.f32 %v689_v46, %v293_v63  ;;  %v295_v10 = vmul.f32 %v671_v28, %v260_v59 }
  0x4e   : > { %587 = vst [vmem:[%s710_s7 + $0x40] sm:$0xff] %v543_v2   ;;  %v359_v12 = vmax.f32 %v327_v4, 0.0  ;;  %v329_v13 = vadd.f32 %v689_v46, %v294_v5  ;;  %v296_v14 = vmul.f32 %v671_v28, %v261_v0  ;;  %v297_v15 = vmul.f32 %v671_v28, %v262_v1 }
  0x4f   : > { %588 = vst [vmem:[%s710_s7 + $0x48] sm:$0xff] %v548_v7   ;;  %v553_v17 = vpack.c.bf16 %v358_v8, %v357_v3  ;;  %v360_v18 = vmax.f32 %v328_v9, 0.0  ;;  %v330_v19 = vadd.f32 %v689_v46, %v295_v10  ;;  %v298_v20 = vmul.f32 %v671_v28, %v263_v6 }
  0x50   : > { %v361_v22 = vmax.f32 %v329_v13, 0.0  ;;  %v331_v23 = vadd.f32 %v689_v46, %v296_v14  ;;  %v332_v24 = vadd.f32 %v689_v46, %v297_v15  ;;  %v299_v25 = vmul.f32 %v671_v28, %v264_v11 }
  0x51   : > { %589 = vst [vmem:[%s710_s7 + $0x50] sm:$0xff] %v553_v17   ;;  %v558_v26 = vpack.c.bf16 %v360_v18, %v359_v12  ;;  %v362_v27 = vmax.f32 %v330_v19, 0.0  ;;  %v333_v29 = vadd.f32 %v689_v46, %v298_v20  ;;  %v300_v30 = vmul.f32 %v671_v28, %v265_v16 }
  0x52   : > { %v363_v31 = vmax.f32 %v331_v23, 0.0  ;;  %v364_v32 = vmax.f32 %v332_v24, 0.0  ;;  %v334_v33 = vadd.f32 %v689_v46, %v299_v25  ;;  %v301_v34 = vmul.f32 %v671_v28, %v266_v21 }
  0x53   : > { %590 = vst [vmem:[%s710_s7 + $0x58] sm:$0xff] %v558_v26   ;;  %v563_v35 = vpack.c.bf16 %v362_v27, %v361_v22  ;;  %v365_v36 = vmax.f32 %v333_v29, 0.0  ;;  %v335_v37 = vadd.f32 %v689_v46, %v300_v30 }
  0x54   : > { %v568_v38 = vpack.c.bf16 %v364_v32, %v363_v31  ;;  %v366_v39 = vmax.f32 %v334_v33, 0.0  ;;  %v336_v40 = vadd.f32 %v689_v46, %v301_v34 }
  0x55   : > { %591 = vst [vmem:[%s710_s7 + $0x60] sm:$0xff] %v563_v35   ;;  %v367_v41 = vmax.f32 %v335_v37, 0.0 }
  0x56   : > { %592 = vst [vmem:[%s710_s7 + $0x68] sm:$0xff] %v568_v38   ;;  %v573_v42 = vpack.c.bf16 %v366_v39, %v365_v36  ;;  %v368_v43 = vmax.f32 %v336_v40, 0.0 }
  0x58   : > { %593 = vst [vmem:[%s710_s7 + $0x70] sm:$0xff] %v573_v42   ;;  %v578_v44 = vpack.c.bf16 %v368_v43, %v367_v41 }
  0x5a   : > { %594 = vst [vmem:[%s710_s7 + $0x78] sm:$0xff] %v578_v44  }
  0x5b PF: > { %s14_s15 = sadd.s32 1, %s611_s15  }
  0x5c   : > { %p11_p4 = scmp.ge.s32.totalorder %s14_s15, 4  }
  0x5e   :  { %13 = sbr.rel (!%p11_p4) target bundleno = 1 (0x1), region = 67 }

// kernel: basic_block_forward.7
= control target key start
LH: loop header
LB: loop body
LE: loop exit
PB: predicated region body
PF: predicated region fallthrough
CT: control target
= control target key end

     0   :  { %10 = vsyncpa [#allocation3], 0  ;;  %s1039_s0 = inlined_call_operand.vmem [shape: f32[512,128], index: 0, kind: input, shape index: {}]   ;;  %s1040_s1 = inlined_call_operand.vmem [shape: f32[2,2,128], index: 1, kind: input, shape index: {}]   ;;  %s1041_s2 = inlined_call_operand.vmem [shape: f32[1,128], index: 2, kind: input, shape index: {}]   ;;  %s1042_s3 = inlined_call_operand.vmem [shape: f32[1,128], index: 3, kind: input, shape index: {}]   ;;  %s1043_s4 = inlined_call_operand.vmem [shape: f32[512,128], index: 4, kind: input, shape index: {}]   ;;  %s1044_s5 = inlined_call_operand.hbm [shape: f32[512,128], index: 5, kind: output, shape index: {}]  }
   0x1   :  { %12 = vsyncpa [#allocation3 + $0x1], 0  ;;  %s756_s18 = smov 0   ;;  %s758_s19 = smov 0  }
   0x2   :  { %s760_s20 = smov 0   ;;  %s762_s21 = smov 0  }
   0x3 LB: > { %s777_s22 = sadd.s32 4294967295, %s722_s21   ;;  %s602_s23 = sadd.s32 4294967294, %s722_s21   ;;  %s722_s21 = sphi %s762_s21, %s1050_s21   ;;  %s718_s20 = sphi %s760_s20, %s1049_s20   ;;  %s714_s19 = sphi %s758_s19, %s1048_s19   ;;  %s710_s18 = sphi %s756_s18, %s1047_s18  }
   0x4   : > { %s781_s24 = sadd.s32 1, %s722_s21   ;;  %s140_s25 = sadd.s32 1, %s718_s20 }
   0x5   : > { %s137_s26 = ssub.s32 %s722_s21, %s781_s24  ;;  %p150_p0 = scmp.ne.s32.totalorder %s718_s20, %s714_s19 }
   0x6   : > { %p138_p1 = scmp.eq.s32.totalorder %s137_s26, 0  ;;  %p151_p2 = scmp.eq.s32.totalorder %s777_s22, 1 }
   0x7   : > { %p156_p3 = scmp.ne.s32.totalorder %s714_s19, %s710_s18  ;;  %p157_p4 = scmp.eq.s32.totalorder %s602_s23, 1 }
   0x8   : > { %s792_s27 = scalar_select %p138_p1, %s718_s20, %s140_s25  }
   0x9   : > { %p794_p5 = por %p151_p2, %p150_p0  ;;  %p798_p6 = por %p157_p4, %p156_p3 }
   0xa   : > { %p605_p7 = scmp.ge.s32.totalorder %s722_s21, 1  ;;  %p202_p8 = scmp.lt.s32.totalorder %s722_s21, 3 }
   0xc   : > { %p203_p9 = pnand %p605_p7, %p202_p8 }
   0xd   : > { %s607_s9 = sshll.u32 (!%p203_p9), %s777_s22, 5  ;;  %s232_s30 = sand.u32 (!%p203_p9), 1, %s714_s19  }
   0xe   : > { %206 = sbr.rel (%p203_p9) target bundleno = 110 (0x6e), region = 40  ;;  %p236_p10 = scmp.lt.s32.totalorder (!%p203_p9), %s607_s9, 63 }
   0xf   : > { %s867_s6 = sshll.u32 (!%p203_p9), %s232_s30, 8  ;;  %s616_s8 = sshll.u32 (!%p203_p9), %s777_s22, 8 }
  0x10   : > { %s890_s7 = scalar_lea.vmem (!%p203_p9), [#allocation2], %s867_s6  ;;  %s524_s11 = scalar_lea.hbm (!%p203_p9), %s1044_s5, %s616_s8 }
  0x11   : > { %s525_s22 = sshll.u32 (!%p203_p9), %s890_s7, 4  ;;  %s527_s12 = sshll.u32 (!%p203_p9), %s524_s11, 4  ;;  %s526_s22 = int_to_ptr.vmem [resolvable:$true] %s525_s22  ;;  %s528_s12 = int_to_ptr.hbm [resolvable:$true] %s527_s12 }
  0x12   : > { %s513_s13 = scalar_lea.sflag (!%p203_p9), [#allocation3], %s232_s30  ;;  %s674_s14 = sshra.s32 (!%p203_p9), %s528_s12, 4  ;;  %s675_s14 = int_to_ptr.hbm [resolvable:$true] %s674_s14 }
  0x13   : > { %v248_v0 = vld [vmem:[%s1040_s1] sm:$0x3]  ;;  %v249_v1 = vld [vmem:[%s1040_s1 + $0x2] sm:$0x3]  ;;  %vm250_vm0 = vcmask 1041408   ;;  %s1052_s9 = smov (!%p236_p10, %s607_s9), 63  ;;  %p681_p0 = scmp.lt.s32.totalorder %s675_s14, %s1044_s5 }
  0x14   : > { %v251_v2 = vsel %vm250_vm0, %v248_v0, 0.0  ;;  %v252_v3 = vsel %vm250_vm0, %v249_v1, 0.0  ;;  %s608_s10 = sshll.u32 %s1052_s9, 3  ;;  %v261_v18 = vld [vmem:[%s1041_s2] sm:$0x1]  ;;  %s680_s23 = scalar_lea.hbm %s1044_s5, 512 }
  0x15   : > { %v253_v4 = vadd.f32 %v252_v3, %v251_v2  ;;  %s817_s15 = scalar_lea.vmem %s1039_s0, %s608_s10  ;;  %v279_v21 = vld [vmem:[%s1042_s3] sm:$0x1]  ;;  %s835_s26 = scalar_lea.vmem %s1043_s4, %s608_s10 }
  0x16   : > { %v282_v22 = vld [vmem:[%s817_s15] sm:$0xff]  ;;  %v283_v23 = vld [vmem:[%s817_s15 + $0x8] sm:$0xff]  ;;  %v284_v24 = vld [vmem:[%s817_s15 + $0x10] sm:$0xff] }
  0x17   : > { %v254_v5 = vmul.f32 0.001953125, %v253_v4  ;;  %v285_v25 = vld [vmem:[%s817_s15 + $0x18] sm:$0xff]  ;;  %v286_v26 = vld [vmem:[%s817_s15 + $0x20] sm:$0xff]  ;;  %v287_v29 = vld [vmem:[%s817_s15 + $0x28] sm:$0xff] }
  0x18   : > { %v288_v30 = vld [vmem:[%s817_s15 + $0x30] sm:$0xff]  ;;  %v289_v31 = vld [vmem:[%s817_s15 + $0x38] sm:$0xff]  ;;  %v290_v32 = vld [vmem:[%s817_s15 + $0x40] sm:$0xff] }
  0x19   : > { %v255_v6 = vmul.f32 %v254_v5, %v254_v5  ;;  %v291_v33 = vld [vmem:[%s817_s15 + $0x48] sm:$0xff]  ;;  %v292_v34 = vld [vmem:[%s817_s15 + $0x50] sm:$0xff]  ;;  %v293_v39 = vld [vmem:[%s817_s15 + $0x58] sm:$0xff] }
  0x1a   : > { %v294_v40 = vld [vmem:[%s817_s15 + $0x60] sm:$0xff]  ;;  %v295_v41 = vld [vmem:[%s817_s15 + $0x68] sm:$0xff]  ;;  %v386_v52 = vld [vmem:[%s835_s26 + $0x10] sm:$0xff] }
  0x1b   : > { %v257_v7 = vrot.slane %v255_v6, 7  ;;  %v384_v47 = vld [vmem:[%s835_s26] sm:$0xff]  ;;  %v385_v48 = vld [vmem:[%s835_s26 + $0x8] sm:$0xff]  ;;  %v387_v53 = vld [vmem:[%s835_s26 + $0x18] sm:$0xff] }
  0x1c   : > { %v388_v54 = vld [vmem:[%s835_s26 + $0x20] sm:$0xff]  ;;  %v389_v63 = vld [vmem:[%s835_s26 + $0x28] sm:$0xff]  ;;  %v390_v0 = vld [vmem:[%s835_s26 + $0x30] sm:$0xff] }
  0x1d   : > { %v259_v8 = vsub.f32 %v254_v5, %v257_v7  ;;  %v391_v1 = vld [vmem:[%s835_s26 + $0x38] sm:$0xff] }
  0x1f   : > { %v260_v9 = vmax.f32 %v259_v8, 0.0 }
  0x21   : > { %v262_v10 = vadd.f32 1e-05, %v260_v9 }
  0x23   : > { %658 = vrsqrt.f32 %v262_v10  ;;  %vm269_vm1 = vweird.f32 %v262_v10 }
  0x29   : > { %v659_v11 = vpop.eup %658 }
  0x2a   : > { %v264_v12 = vmul.f32 %v659_v11, %v262_v10  ;;  %vm270_vm2 = vweird.f32 %v659_v11 }
  0x2b   : > { %vm271_vm3 = vmor %vm269_vm1, %vm270_vm2 }
  0x2c   : > { %v265_v13 = vmul.f32 %v659_v11, %v264_v12 }
  0x2e   : > { %v266_v14 = vmul.f32 0.5, %v265_v13 }
  0x30   : > { %v267_v15 = vsub.f32 1.5, %v266_v14  ;;  %v392_v14 = vld [vmem:[%s835_s26 + $0x40] sm:$0xff] }
  0x32   : > { %v268_v16 = vmul.f32 %v659_v11, %v267_v15  ;;  %v296_v15 = vld [vmem:[%s817_s15 + $0x70] sm:$0xff] }
  0x34   : > { %v272_v17 = vsel %vm271_vm3, %v659_v11, %v268_v16 }
  0x35   : > { %274 = vst [vmem:[#allocation1] sm:$0xff] %v272_v17 }
  0x3c   : > { %v276_v19 = vld [vmem:[#allocation1 + $0x1] ss:$9 sm:$0xff] }
  0x3d   : > { %v278_v20 = vmul.f32 %v276_v19, %v261_v18 }
  0x3f   : > { %v280_v27 = vmul.f32 %v278_v20, %v254_v5  ;;  %v827_v28 = vperm.slane %v278_v20, 0  ;;  %v393_v20 = vld [vmem:[%s835_s26 + $0x48] sm:$0xff] }
  0x41   : > { %v281_v35 = vsub.f32 %v279_v21, %v280_v27  ;;  %v317_v36 = vmul.f32 %v827_v28, %v282_v22  ;;  %v318_v37 = vmul.f32 %v827_v28, %v283_v23  ;;  %v319_v38 = vmul.f32 %v827_v28, %v284_v24  ;;  %v297_v21 = vld [vmem:[%s817_s15 + $0x78] sm:$0xff] }
  0x42   : > { %v320_v42 = vmul.f32 %v827_v28, %v285_v25  ;;  %v321_v43 = vmul.f32 %v827_v28, %v286_v26  ;;  %v322_v44 = vmul.f32 %v827_v28, %v287_v29  ;;  %v323_v45 = vmul.f32 %v827_v28, %v288_v30  ;;  %v394_v26 = vld [vmem:[%s835_s26 + $0x50] sm:$0xff]  ;;  %v395_v27 = vld [vmem:[%s835_s26 + $0x58] sm:$0xff] }
  0x43   : > { %v851_v46 = vperm.slane %v281_v35, 0  ;;  %v324_v49 = vmul.f32 %v827_v28, %v289_v31  ;;  %v325_v50 = vmul.f32 %v827_v28, %v290_v32  ;;  %v326_v51 = vmul.f32 %v827_v28, %v291_v33  ;;  %v396_v33 = vld [vmem:[%s835_s26 + $0x60] sm:$0xff] }
  0x44   : > { %v327_v55 = vmul.f32 %v827_v28, %v292_v34  ;;  %v328_v56 = vmul.f32 %v827_v28, %v293_v39  ;;  %v329_v57 = vmul.f32 %v827_v28, %v294_v40  ;;  %v330_v58 = vmul.f32 %v827_v28, %v295_v41  ;;  %v397_v34 = vld [vmem:[%s835_s26 + $0x68] sm:$0xff]  ;;  %v298_v39 = vld [vmem:[%s817_s15 + $0x80] sm:$0xff] }
  0x45   : > { %v352_v59 = vadd.f32 %v851_v46, %v317_v36  ;;  %v353_v60 = vadd.f32 %v851_v46, %v318_v37  ;;  %v354_v61 = vadd.f32 %v851_v46, %v319_v38  ;;  %v355_v62 = vadd.f32 %v851_v46, %v320_v42 }
  0x46   : > { %v356_v2 = vadd.f32 %v851_v46, %v321_v43  ;;  %v357_v3 = vadd.f32 %v851_v46, %v322_v44  ;;  %v358_v4 = vadd.f32 %v851_v46, %v323_v45  ;;  %v359_v5 = vadd.f32 %v851_v46, %v324_v49  ;;  %v398_v44 = vld [vmem:[%s835_s26 + $0x70] sm:$0xff]  ;;  %v399_v45 = vld [vmem:[%s835_s26 + $0x78] sm:$0xff] }
  0x47   : > { %v416_v6 = vadd.f32 %v384_v47, %v352_v59  ;;  %v417_v7 = vadd.f32 %v385_v48, %v353_v60  ;;  %v418_v8 = vadd.f32 %v386_v52, %v354_v61  ;;  %v419_v9 = vadd.f32 %v387_v53, %v355_v62  ;;  %v299_v47 = vld [vmem:[%s817_s15 + $0x88] sm:$0xff]  ;;  %v300_v52 = vld [vmem:[%s817_s15 + $0x90] sm:$0xff]  ;;  %v301_v53 = vld [vmem:[%s817_s15 + $0x98] sm:$0xff] }
  0x48   : > { %v420_v10 = vadd.f32 %v388_v54, %v356_v2  ;;  %v421_v11 = vadd.f32 %v389_v63, %v357_v3  ;;  %v422_v12 = vadd.f32 %v390_v0, %v358_v4  ;;  %v880_v13 = vadd.f32 %v391_v1, %v359_v5  ;;  %v302_v54 = vld [vmem:[%s817_s15 + $0xa0] sm:$0xff]  ;;  %v303_v59 = vld [vmem:[%s817_s15 + $0xa8] sm:$0xff]  ;;  %v304_v5 = vld [vmem:[%s817_s15 + $0xb0] sm:$0xff] }
  0x49   : > { %v448_v16 = vmax.f32 %v416_v6, 0.0  ;;  %v449_v17 = vmax.f32 %v417_v7, 0.0  ;;  %v450_v18 = vmax.f32 %v418_v8, 0.0  ;;  %v451_v19 = vmax.f32 %v419_v9, 0.0  ;;  %v400_v1 = vld [vmem:[%s835_s26 + $0x80] sm:$0xff]  ;;  %v305_v6 = vld [vmem:[%s817_s15 + $0xb8] sm:$0xff] }
  0x4a   : > { %v452_v22 = vmax.f32 %v420_v10, 0.0  ;;  %v453_v23 = vmax.f32 %v421_v11, 0.0  ;;  %v454_v24 = vmax.f32 %v422_v12, 0.0  ;;  %v455_v25 = vmax.f32 %v880_v13, 0.0  ;;  %v401_v9 = vld [vmem:[%s835_s26 + $0x88] sm:$0xff]  ;;  %v402_v10 = vld [vmem:[%s835_s26 + $0x90] sm:$0xff] }
  0x4b   : > { %480 = vst [vmem:[%s890_s7] sm:$0xff] %v448_v16  ;;  %v360_v29 = vadd.f32 %v851_v46, %v325_v50  ;;  %v361_v30 = vadd.f32 %v851_v46, %v326_v51  ;;  %v362_v31 = vadd.f32 %v851_v46, %v327_v55  ;;  %v363_v32 = vadd.f32 %v851_v46, %v328_v56  ;;  %v403_v11 = vld [vmem:[%s835_s26 + $0x98] sm:$0xff] }
  0x4c   : > { %481 = vst [vmem:[%s890_s7 + $0x8] sm:$0xff] %v449_v17  ;;  %v364_v35 = vadd.f32 %v851_v46, %v329_v57  ;;  %v365_v36 = vadd.f32 %v851_v46, %v330_v58  ;;  %v331_v37 = vmul.f32 %v827_v28, %v296_v15  ;;  %v332_v38 = vmul.f32 %v827_v28, %v297_v21 }
  0x4d   : > { %482 = vst [vmem:[%s890_s7 + $0x10] sm:$0xff] %v450_v18  ;;  %v424_v40 = vadd.f32 %v392_v14, %v360_v29  ;;  %v425_v41 = vadd.f32 %v393_v20, %v361_v30  ;;  %v426_v42 = vadd.f32 %v394_v26, %v362_v31  ;;  %v427_v43 = vadd.f32 %v395_v27, %v363_v32  ;;  %v404_v18 = vld [vmem:[%s835_s26 + $0xa0] sm:$0xff]  ;;  %v406_v29 = vld [vmem:[%s835_s26 + $0xb0] sm:$0xff] }
  0x4e   : > { %483 = vst [vmem:[%s890_s7 + $0x18] sm:$0xff] %v451_v19  ;;  %v428_v48 = vadd.f32 %v396_v33, %v364_v35  ;;  %v910_v49 = vadd.f32 %v397_v34, %v365_v36  ;;  %v366_v50 = vadd.f32 %v851_v46, %v331_v37  ;;  %v367_v51 = vadd.f32 %v851_v46, %v332_v38  ;;  %v405_v19 = vld [vmem:[%s835_s26 + $0xa8] sm:$0xff]  ;;  %v306_v30 = vld [vmem:[%s817_s15 + $0xc0] sm:$0xff]  ;;  %v308_v36 = vld [vmem:[%s817_s15 + $0xd0] sm:$0xff] }
  0x4f   : > { %484 = vst [vmem:[%s890_s7 + $0x20] sm:$0xff] %v452_v22  ;;  %v456_v55 = vmax.f32 %v424_v40, 0.0  ;;  %v457_v56 = vmax.f32 %v425_v41, 0.0  ;;  %v458_v57 = vmax.f32 %v426_v42, 0.0  ;;  %v459_v58 = vmax.f32 %v427_v43, 0.0  ;;  %v307_v35 = vld [vmem:[%s817_s15 + $0xc8] sm:$0xff] }
  0x50   : > { %485 = vst [vmem:[%s890_s7 + $0x28] sm:$0xff] %v453_v23  ;;  %v460_v60 = vmax.f32 %v428_v48, 0.0  ;;  %v461_v61 = vmax.f32 %v910_v49, 0.0  ;;  %v430_v62 = vadd.f32 %v398_v44, %v366_v50  ;;  %v431_v63 = vadd.f32 %v399_v45, %v367_v51  ;;  %v309_v37 = vld [vmem:[%s817_s15 + $0xd8] sm:$0xff]  ;;  %v310_v41 = vld [vmem:[%s817_s15 + $0xe0] sm:$0xff]  ;;  %v311_v42 = vld [vmem:[%s817_s15 + $0xe8] sm:$0xff] }
  0x51   : > { %486 = vst [vmem:[%s890_s7 + $0x30] sm:$0xff] %v454_v24  ;;  %v333_v0 = vmul.f32 %v827_v28, %v298_v39  ;;  %v334_v2 = vmul.f32 %v827_v28, %v299_v47  ;;  %v335_v3 = vmul.f32 %v827_v28, %v300_v52  ;;  %v336_v4 = vmul.f32 %v827_v28, %v301_v53  ;;  %v407_v40 = vld [vmem:[%s835_s26 + $0xb8] sm:$0xff]  ;;  %v312_v52 = vld [vmem:[%s817_s15 + $0xf0] sm:$0xff] }
  0x52   : > { %487 = vst [vmem:[%s890_s7 + $0x38] sm:$0xff] %v455_v25  ;;  %v462_v7 = vmax.f32 %v430_v62, 0.0  ;;  %v463_v8 = vmax.f32 %v431_v63, 0.0  ;;  %v337_v12 = vmul.f32 %v827_v28, %v302_v54  ;;  %v338_v13 = vmul.f32 %v827_v28, %v303_v59  ;;  %v313_v53 = vld [vmem:[%s817_s15 + $0xf8] sm:$0xff]  ;;  %s676_s15 = scalar_lea.hbm %s675_s14, 256 }
  0x53   : > { %488 = vst [vmem:[%s890_s7 + $0x40] sm:$0xff] %v456_v55  ;;  %v368_v14 = vadd.f32 %v851_v46, %v333_v0  ;;  %v369_v15 = vadd.f32 %v851_v46, %v334_v2  ;;  %v370_v16 = vadd.f32 %v851_v46, %v335_v3  ;;  %v371_v17 = vadd.f32 %v851_v46, %v336_v4  ;;  %v412_v3 = vld [vmem:[%s835_s26 + $0xe0] sm:$0xff]  ;;  %p677_p11 = scmp.ne.s32.totalorder %s675_s14, %s676_s15  ;;  %p682_p1 = scmp.lt.s32.totalorder %s680_s23, %s676_s15 }
  0x54   : > { %489 = vst [vmem:[%s890_s7 + $0x48] sm:$0xff] %v457_v56  ;;  %v372_v20 = vadd.f32 %v851_v46, %v337_v12  ;;  %v373_v21 = vadd.f32 %v851_v46, %v338_v13  ;;  %v339_v22 = vmul.f32 %v827_v28, %v304_v5  ;;  %v340_v23 = vmul.f32 %v827_v28, %v305_v6  ;;  %v408_v56 = vld [vmem:[%s835_s26 + $0xc0] sm:$0xff] }
  0x55   : > { %490 = vst [vmem:[%s890_s7 + $0x50] sm:$0xff] %v458_v57  ;;  %v432_v24 = vadd.f32 %v400_v1, %v368_v14  ;;  %v433_v25 = vadd.f32 %v401_v9, %v369_v15  ;;  %v434_v26 = vadd.f32 %v402_v10, %v370_v16  ;;  %v435_v27 = vadd.f32 %v403_v11, %v371_v17  ;;  %v409_v57 = vld [vmem:[%s835_s26 + $0xc8] sm:$0xff]  ;;  %v411_v1 = vld [vmem:[%s835_s26 + $0xd8] sm:$0xff]  ;;  %v414_v15 = vld [vmem:[%s835_s26 + $0xf0] sm:$0xff]  ;;  %p678_p12 = pnand %p677_p11, %p794_p5  ;;  %p683_p2 = por %p682_p1, %p681_p0 }
  0x56   : > { %491 = vst [vmem:[%s890_s7 + $0x58] sm:$0xff] %v459_v58  ;;  %v436_v31 = vadd.f32 %v404_v18, %v372_v20  ;;  %v437_v32 = vadd.f32 %v405_v19, %v373_v21  ;;  %v374_v33 = vadd.f32 %v851_v46, %v339_v22  ;;  %v375_v34 = vadd.f32 %v851_v46, %v340_v23  ;;  %v410_v58 = vld [vmem:[%s835_s26 + $0xd0] sm:$0xff]  ;;  %v413_v11 = vld [vmem:[%s835_s26 + $0xe8] sm:$0xff]  ;;  %v415_v18 = vld [vmem:[%s835_s26 + $0xf8] sm:$0xff] }
  0x57   : > { %492 = vst [vmem:[%s890_s7 + $0x60] sm:$0xff] %v460_v60  ;;  %v464_v38 = vmax.f32 %v432_v24, 0.0  ;;  %v465_v39 = vmax.f32 %v433_v25, 0.0  ;;  %v466_v43 = vmax.f32 %v434_v26, 0.0  ;;  %v467_v44 = vmax.f32 %v435_v27, 0.0  ;;  %p679_p13 = pneg %p678_p12 }
  0x58   : > { %493 = vst [vmem:[%s890_s7 + $0x68] sm:$0xff] %v461_v61  ;;  %v468_v45 = vmax.f32 %v436_v31, 0.0  ;;  %v438_v47 = vadd.f32 %v406_v29, %v374_v33  ;;  %v341_v48 = vmul.f32 %v827_v28, %v306_v30  ;;  %v342_v49 = vmul.f32 %v827_v28, %v307_v35 }
  0x59   : > { %494 = vst [vmem:[%s890_s7 + $0x70] sm:$0xff] %v462_v7  ;;  %v343_v50 = vmul.f32 %v827_v28, %v308_v36  ;;  %v344_v51 = vmul.f32 %v827_v28, %v309_v37  ;;  %v469_v54 = vmax.f32 %v437_v32, 0.0  ;;  %v439_v55 = vadd.f32 %v407_v40, %v375_v34  ;;  %p684_p3 = pnand %p683_p2, %p679_p13 }
  0x5a   : > { %495 = vst [vmem:[%s890_s7 + $0x78] sm:$0xff] %v463_v8  ;;  %v345_v59 = vmul.f32 %v827_v28, %v310_v41  ;;  %v346_v60 = vmul.f32 %v827_v28, %v311_v42  ;;  %v376_v61 = vadd.f32 %v851_v46, %v341_v48  ;;  %v377_v62 = vadd.f32 %v851_v46, %v342_v49 }
  0x5b   : > { %496 = vst [vmem:[%s890_s7 + $0x80] sm:$0xff] %v464_v38  ;;  %v378_v63 = vadd.f32 %v851_v46, %v343_v50  ;;  %v379_v0 = vadd.f32 %v851_v46, %v344_v51  ;;  %v347_v5 = vmul.f32 %v827_v28, %v312_v52  ;;  %v348_v6 = vmul.f32 %v827_v28, %v313_v53 }
  0x5c   : > { %497 = vst [vmem:[%s890_s7 + $0x88] sm:$0xff] %v465_v39  ;;  %v380_v2 = vadd.f32 %v851_v46, %v345_v59  ;;  %v381_v4 = vadd.f32 %v851_v46, %v346_v60  ;;  %v470_v7 = vmax.f32 %v438_v47, 0.0  ;;  %v440_v8 = vadd.f32 %v408_v56, %v376_v61 }
  0x5d   : > { %498 = vst [vmem:[%s890_s7 + $0x90] sm:$0xff] %v466_v43  ;;  %v441_v9 = vadd.f32 %v409_v57, %v377_v62  ;;  %v442_v10 = vadd.f32 %v410_v58, %v378_v63  ;;  %v471_v12 = vmax.f32 %v439_v55, 0.0  ;;  %v443_v13 = vadd.f32 %v411_v1, %v379_v0 }
  0x5e   : > { %499 = vst [vmem:[%s890_s7 + $0x98] sm:$0xff] %v467_v44  ;;  %v382_v14 = vadd.f32 %v851_v46, %v347_v5  ;;  %v383_v16 = vadd.f32 %v851_v46, %v348_v6  ;;  %v472_v28 = vmax.f32 %v440_v8, 0.0  ;;  %v444_v17 = vadd.f32 %v412_v3, %v380_v2 }
  0x5f   : > { %500 = vst [vmem:[%s890_s7 + $0xa0] sm:$0xff] %v468_v45  ;;  %v473_v19 = vmax.f32 %v441_v9, 0.0  ;;  %v445_v20 = vadd.f32 %v413_v11, %v381_v4  ;;  %v474_v21 = vmax.f32 %v442_v10, 0.0  ;;  %v475_v46 = vmax.f32 %v443_v13, 0.0 }
  0x60   : > { %501 = vst [vmem:[%s890_s7 + $0xa8] sm:$0xff] %v469_v54  ;;  %v446_v22 = vadd.f32 %v414_v15, %v382_v14  ;;  %v447_v23 = vadd.f32 %v415_v18, %v383_v16  ;;  %v476_v24 = vmax.f32 %v444_v17, 0.0 }
  0x61   : > { %502 = vst [vmem:[%s890_s7 + $0xb0] sm:$0xff] %v470_v7  ;;  %v477_v25 = vmax.f32 %v445_v20, 0.0 }
  0x62   : > { %503 = vst [vmem:[%s890_s7 + $0xb8] sm:$0xff] %v471_v12  ;;  %v478_v26 = vmax.f32 %v446_v22, 0.0  ;;  %v479_v27 = vmax.f32 %v447_v23, 0.0 }
  0x63   : > { %504 = vst [vmem:[%s890_s7 + $0xc0] sm:$0xff] %v472_v28 }
  0x64   : > { %505 = vst [vmem:[%s890_s7 + $0xc8] sm:$0xff] %v473_v19 }
  0x65   : > { %506 = vst [vmem:[%s890_s7 + $0xd0] sm:$0xff] %v474_v21 }
  0x66   : > { %507 = vst [vmem:[%s890_s7 + $0xd8] sm:$0xff] %v475_v46 }
  0x67   : > { %508 = vst [vmem:[%s890_s7 + $0xe0] sm:$0xff] %v476_v24 }
  0x68   : > { %509 = vst [vmem:[%s890_s7 + $0xe8] sm:$0xff] %v477_v25 }
  0x69   : > { %510 = vst [vmem:[%s890_s7 + $0xf0] sm:$0xff] %v478_v26 }
  0x6a   : > { %511 = vst [vmem:[%s890_s7 + $0xf8] sm:$0xff] %v479_v27 }
  0x6b   : > { %687 = shalt.err (!%p684_p3)
}
  0x6c   : > { %s724_s30 = smov 128   ;;  %s725_s6 = smov 8  }
  0x6d   : > { %617 = dma.vmem_to_hbm [thread:$0]  (%p794_p5), %s526_s22, 4096, %s528_s12, %s513_s13, %s724_s30, %s724_s30, %s725_s6  }
  0x6e PF: > { %p623_p4 = scmp.ge.s32.totalorder %s722_s21, 2  ;;  %s542_s7 = sand.u32 1, %s710_s18  }
  0x6f   : > { %s543_s8 = scalar_lea.sflag [#allocation3], %s542_s7 }
  0x70   : > { %p620_p7 = pnand %p623_p4, %p798_p6 }
  0x72   : > { %p621_p8 = pneg %p620_p7 }
  0x74   : > { %705 = dma.done.wait (%p621_p8), %s543_s8, 4096  }
  0x75   : > { %707 = vsyncadd (%p621_p8), %s543_s8, 4294963200  ;;  %p15_p9 = scmp.ge.s32.totalorder %s781_s24, 4   ;;  %s1047_s18 = smov %s714_s19 }
  0x76   : > { %s1048_s19 = smov %s718_s20  ;;  %s1049_s20 = smov %s792_s27 }
  0x77   : > { %s1050_s21 = smov %s781_s24  ;;  %17 = sbr.rel (!%p15_p9) target bundleno = 3 (0x3), region = 79 }
  0x7c   :  { %549 = vsyncpa [#allocation3], 1 }
  0x7d   :  { %551 = vsyncpa [#allocation3 + $0x1], 1 }

// kernel: basic_block_forward.4
= control target key start
LH: loop header
LB: loop body
LE: loop exit
PB: predicated region body
PF: predicated region fallthrough
CT: control target
= control target key end

     0   :  { %s5529_s12 = smov 0   ;;  %s6953_s0 = inlined_call_operand.vmem [shape: bf16[2,18,18,128], index: 0, kind: input, shape index: {}]   ;;  %s6954_s1 = inlined_call_operand.vmem [shape: bf16[1152,128], index: 1, kind: input, shape index: {}]   ;;  %s6955_s2 = inlined_call_operand.vmem [shape: f32[512,128], index: 2, kind: output, shape index: {0}]   ;;  %s6956_s3 = inlined_call_operand.vmem [shape: f32[2,2,128], index: 3, kind: output, shape index: {1}]  }
   0x1 LB: > { %s5535_s13 = sadd.s32 4294967295, %s5507_s12   ;;  %p4568_p0 = scmp.ge.s32.totalorder %s5507_s12, 1  ;;  %s5507_s12 = sphi %s5529_s12, %s14_s12  }
   0x2   : > { %p140_p1 = scmp.lt.s32.totalorder %s5507_s12, 3 }
   0x4   : > { %p141_p2 = pnand %p4568_p0, %p140_p1 }
   0x6   : > { %144 = sbr.rel (%p141_p2) target bundleno = 772 (0x304), region = 28 }
   0xb   : > { %v5326_v0 = vld [vmem:[%s6954_s1 + $0x78] sm:$0xff]  ;;  %p168_p3 = scmp.lt.s32.totalorder %s5535_s13, 1  ;;  %v5325_v1 = vld [vmem:[%s6954_s1 + $0x70] sm:$0xff]  ;;  %v5324_v2 = vld [vmem:[%s6954_s1 + $0x68] sm:$0xff]  ;;  %vm247_vm0 = vsmask.f32 3328 }
   0xc   : > { %5415 = vmatpush.bf16.msra.mxu1 %v5326_v0  ;;  %5416 = vmatpush.bf16.msra.mxu2 %v5326_v0  ;;  %vm248_vm1 = vsmask.f32 7440  ;;  %v5323_v6 = vld [vmem:[%s6954_s1 + $0x60] sm:$0xff]  ;;  %v5322_v35 = vld [vmem:[%s6954_s1 + $0x58] sm:$0xff]  ;;  %v5321_v54 = vld [vmem:[%s6954_s1 + $0x50] sm:$0xff]  ;;  %vm1132_vm3 = vcmask 1042432  }
   0xd   : > { %s5547_s18 = scalar_select %p168_p3, %s5535_s13, 1  ;;  %5417 = vmatpush.bf16.msra.mxu3 %v5326_v0  ;;  %762 = vmatpush.bf16.msra.mxu0 %v5326_v0  ;;  %vm5571_vm2 = vmor %vm247_vm0, %vm248_vm1  ;;  %vm1133_vm4 = vcmask 1046532   ;;  %vm4474_vm6 = vcmask 1040384  }
   0xe   : > { %vm5871_vm5 = vmor %vm1132_vm3, %vm1133_vm4  ;;  %s4570_s25 = sshll.u32 %s5535_s13, 5 }
   0xf   : > { %s5439_s19 = smul.u32 216, %s5547_s18  ;;  %p6684_p4 = scmp.lt.s32.totalorder %s4570_s25, 63 }
  0x10   : > { %5418 = vmatpush.bf16.msra.mxu1 %v5325_v1  ;;  %5419 = vmatpush.bf16.msra.mxu2 %v5325_v1 }
  0x11   : > { %s5556_s24 = scalar_lea.vmem %s6953_s0, %s5439_s19  ;;  %5420 = vmatpush.bf16.msra.mxu3 %v5325_v1  ;;  %763 = vmatpush.bf16.msra.mxu0 %v5325_v1  ;;  %s6967_s25 = smov (!%p6684_p4, %s4570_s25), 63 }
  0x12   : > { %v191_v3 = vld [vmem:[%s5556_s24 + $0x30] sm:$0xf]  ;;  %v192_v4 = vld [vmem:[%s5556_s24 + $0x34] sm:$0xf]  ;;  %v235_v5 = vld [vmem:[%s5556_s24 + $0x38] sm:$0x1] }
  0x13   : > { %v347_v7 = vshrl.u32 %v191_v3, 16  ;;  %v350_v8 = vshll.u32 %v191_v3, 16  ;;  %v356_v9 = vshll.u32 %v192_v4, 16  ;;  %v360_v10 = vshrl.u32 %v192_v4, 16  ;;  %v199_v11 = vld [vmem:[%s5556_s24 + $0x60] sm:$0xf] }
  0x14   : > { %v366_v12 = vshll.u32 %v235_v5, 16  ;;  %v200_v13 = vld [vmem:[%s5556_s24 + $0x64] sm:$0xf]  ;;  %v239_v14 = vld [vmem:[%s5556_s24 + $0x68] sm:$0x1]  ;;  %v443_v15 = vshrl.u32 %v199_v11, 16  ;;  %5421 = vmatpush.bf16.msra.mxu1 %v5324_v2  ;;  %5422 = vmatpush.bf16.msra.mxu2 %v5324_v2 }
  0x15   : > { %v349_v16 = vrot.slane %v347_v7, 4  ;;  %v352_v17 = vrot.slane %v350_v8, 5  ;;  %v358_v18 = vrot.slane %v356_v9, 5  ;;  %v362_v19 = vrot.slane %v360_v10, 4  ;;  %v207_v20 = vld [vmem:[%s5556_s24 + $0x90] sm:$0xf]  ;;  %5423 = vmatpush.bf16.msra.mxu3 %v5324_v2  ;;  %764 = vmatpush.bf16.msra.mxu0 %v5324_v2 }
  0x16   : > { %v368_v21 = vrot.slane %v366_v12, 5  ;;  %v445_v22 = vrot.slane %v443_v15, 4  ;;  %v446_v23 = vshll.u32 %v199_v11, 16  ;;  %v452_v24 = vshll.u32 %v200_v13, 16  ;;  %v208_v29 = vld [vmem:[%s5556_s24 + $0x94] sm:$0xf] }
  0x17   : > { %v353_v25 = vor.u32 %v352_v17, %v349_v16  ;;  %v363_v26 = vor.u32 %v362_v19, %v358_v18  ;;  %v456_v27 = vshrl.u32 %v200_v13, 16  ;;  %v462_v28 = vshll.u32 %v239_v14, 16  ;;  %v243_v41 = vld [vmem:[%s5556_s24 + $0x98] sm:$0x1]  ;;  %v183_v49 = vld [vmem:[%s5556_s24] sm:$0xf] }
  0x18   : > { %v448_v31 = vrot.slane %v446_v23, 5  ;;  %v454_v32 = vrot.slane %v452_v24, 5  ;;  %v539_v33 = vshrl.u32 %v207_v20, 16  ;;  %v542_v34 = vshll.u32 %v207_v20, 16  ;;  %5424 = vmatpush.bf16.msra.mxu1 %v5323_v6  ;;  %5425 = vmatpush.bf16.msra.mxu2 %v5323_v6  ;;  %v5596_v62 = vld [vmem:[%s5556_s24 + $0x4] sm:$0xf] }
  0x19   : > { %v354_v36 = vrot.slane %v353_v25, 4  ;;  %v364_v37 = vrot.slane %v363_v26, 4  ;;  %v458_v38 = vrot.slane %v456_v27, 4  ;;  %v464_v39 = vrot.slane %v462_v28, 5  ;;  %5426 = vmatpush.bf16.msra.mxu3 %v5323_v6  ;;  %765 = vmatpush.bf16.msra.mxu0 %v5323_v6  ;;  %v5603_v4 = vld [vmem:[%s5556_s24 + $0x8] sm:$0x1] }
  0x1a   : > { %v449_v40 = vor.u32 %v448_v31, %v445_v22  ;;  %v541_v42 = vrot.slane %v539_v33, 4  ;;  %v544_v43 = vrot.slane %v542_v34, 5  ;;  %v548_v44 = vshll.u32 %v208_v29, 16  ;;  %v193_v5 = vld [vmem:[%s5556_s24 + $0x3c] sm:$0xf]  ;;  %v5320_v10 = vld [vmem:[%s6954_s1 + $0x48] sm:$0xff] }
  0x1b   : > { %v359_v45 = vsel %vm5571_vm2, %v354_v36, %v358_v18  ;;  %v369_v46 = vsel %vm5571_vm2, %v364_v37, %v368_v21  ;;  %v459_v47 = vor.u32 %v458_v38, %v454_v32  ;;  %v552_v48 = vshrl.u32 %v208_v29, 16  ;;  %v194_v15 = vld [vmem:[%s5556_s24 + $0x40] sm:$0xf]  ;;  %v236_v19 = vld [vmem:[%s5556_s24 + $0x44] sm:$0x1]  ;;  %v5334_v37 = vld [vmem:[%s6954_s1 + $0xb8] sm:$0xff] }
  0x1c   : > { %v5584_v50 = vunpack.c.l.b16 %v359_v45  ;;  %v5586_v51 = vunpack.c.l.b16 %v369_v46  ;;  %v450_v52 = vrot.slane %v449_v40, 4  ;;  %v545_v53 = vor.u32 %v544_v43, %v541_v42  ;;  %5427 = vmatpush.bf16.msra.mxu1 %v5322_v35  ;;  %5428 = vmatpush.bf16.msra.mxu2 %v5322_v35  ;;  %v201_v25 = vld [vmem:[%s5556_s24 + $0x6c] sm:$0xf]  ;;  %v5319_v31 = vld [vmem:[%s6954_s1 + $0x40] sm:$0xff]  ;;  %v202_v40 = vld [vmem:[%s5556_s24 + $0x70] sm:$0xf] }
  0x1d   : > { %v460_v55 = vrot.slane %v459_v47, 4  ;;  %v550_v56 = vrot.slane %v548_v44, 5  ;;  %v554_v57 = vrot.slane %v552_v48, 4  ;;  %v558_v58 = vshll.u32 %v243_v41, 16  ;;  %5429 = vmatpush.bf16.msra.mxu3 %v5322_v35  ;;  %766 = vmatpush.bf16.msra.mxu0 %v5322_v35  ;;  %v5358_v43 = vld [vmem:[%s6954_s1 + $0xf8] sm:$0xff]  ;;  %s4571_s13 = sshll.u32 %s6967_s25, 3 }
  0x1e   : > { %v686_v59 = vpack.c.b16 %v5586_v51, %v5584_v50  ;;  %v455_v60 = vsel %vm5571_vm2, %v450_v52, %v454_v32  ;;  %v546_v61 = vrot.slane %v545_v53, 4  ;;  %v251_v63 = vshrl.u32 %v183_v49, 16  ;;  %v240_v47 = vld [vmem:[%s5556_s24 + $0x74] sm:$0x1]  ;;  %s6720_s29 = scalar_lea.vmem %s6955_s2, %s4571_s13 }
  0x1f   : > { %v465_v0 = vsel %vm5571_vm2, %v460_v55, %v464_v39  ;;  %v5600_v1 = vunpack.c.l.b16 %v455_v60  ;;  %v555_v2 = vor.u32 %v554_v57, %v550_v56  ;;  %v560_v3 = vrot.slane %v558_v58, 5  ;;  %v5318_v57 = vld [vmem:[%s6954_s1 + $0x38] sm:$0xff] }
  0x20   : > { %v5606_v6 = vunpack.c.l.b16 %v465_v0  ;;  %v551_v7 = vsel %vm5571_vm2, %v546_v61, %v550_v56  ;;  %v253_v8 = vrot.slane %v251_v63, 4  ;;  %v254_v9 = vshll.u32 %v183_v49, 16  ;;  %5430 = vmatpush.bf16.msra.mxu1 %v5321_v54  ;;  %5431 = vmatpush.bf16.msra.mxu2 %v5321_v54  ;;  %v5333_v63 = vld [vmem:[%s6954_s1 + $0xb0] sm:$0xff] }
  0x21   : > { %v556_v11 = vrot.slane %v555_v2, 4  ;;  %v5613_v12 = vunpack.c.l.b16 %v551_v7  ;;  %v260_v13 = vshll.u32 %v5596_v62, 16  ;;  %v264_v14 = vshrl.u32 %v5596_v62, 16  ;;  %5432 = vmatpush.bf16.msra.mxu3 %v5321_v54  ;;  %767 = vmatpush.bf16.msra.mxu0 %v5321_v54  ;;  %v209_v54 = vld [vmem:[%s5556_s24 + $0x9c] sm:$0xf] }
  0x22   : > { %v690_v16 = vpack.c.b16 %v5606_v6, %v5600_v1  ;;  %v256_v17 = vrot.slane %v254_v9, 5  ;;  %v270_v18 = vshll.u32 %v5603_v4, 16  ;;  %v371_v20 = vshrl.u32 %v193_v5, 16 }
  0x23   : > { %v561_v21 = vsel %vm5571_vm2, %v556_v11, %v560_v3  ;;  %v262_v22 = vrot.slane %v260_v13, 5  ;;  %v266_v23 = vrot.slane %v264_v14, 4  ;;  %v374_v24 = vshll.u32 %v193_v5, 16  ;;  %v5357_v3 = vld [vmem:[%s6954_s1 + $0xf0] sm:$0xff]  ;;  %v5366_v11 = vld [vmem:[%s6954_s1 + $0x138] sm:$0xff] }
  0x24   : > { %v675_v26 = vunpack.c.l.b16 %v561_v21  ;;  %v257_v27 = vor.u32 %v256_v17, %v253_v8  ;;  %v272_v28 = vrot.slane %v270_v18, 5  ;;  %v373_v29 = vrot.slane %v371_v20, 4  ;;  %5433 = vmatpush.bf16.msra.mxu1 %v5320_v10  ;;  %5434 = vmatpush.bf16.msra.mxu2 %v5320_v10  ;;  %v210_v8 = vld [vmem:[%s5556_s24 + $0xa0] sm:$0xf]  ;;  %v185_v17 = vld [vmem:[%s5556_s24 + $0xc] sm:$0xf] }
  0x25   : > { %v267_v32 = vor.u32 %v266_v23, %v262_v22  ;;  %v376_v33 = vrot.slane %v374_v24, 5  ;;  %v380_v34 = vshll.u32 %v194_v15, 16  ;;  %v384_v35 = vshrl.u32 %v194_v15, 16  ;;  %5435 = vmatpush.bf16.msra.mxu3 %v5320_v10  ;;  %768 = vmatpush.bf16.msra.mxu0 %v5320_v10  ;;  %v244_v15 = vld [vmem:[%s5556_s24 + $0xa4] sm:$0x1]  ;;  %v5317_v18 = vld [vmem:[%s6954_s1 + $0x30] sm:$0xff] }
  0x26   : > { %v694_v36 = vpack.c.b16 %v675_v26, %v5613_v12  ;;  %v258_v38 = vrot.slane %v257_v27, 4  ;;  %v390_v39 = vshll.u32 %v236_v19, 16  ;;  %v467_v41 = vshrl.u32 %v201_v25, 16  ;;  %v5332_v23 = vld [vmem:[%s6954_s1 + $0xa8] sm:$0xff]  ;;  %v5675_v27 = vld [vmem:[%s5556_s24 + $0x10] sm:$0xf] }
  0x27   : > { %v268_v42 = vrot.slane %v267_v32, 4  ;;  %v377_v44 = vor.u32 %v376_v33, %v373_v29  ;;  %v382_v45 = vrot.slane %v380_v34, 5  ;;  %v386_v46 = vrot.slane %v384_v35, 4  ;;  %v5356_v29 = vld [vmem:[%s6954_s1 + $0xe8] sm:$0xff]  ;;  %v5685_v35 = vld [vmem:[%s5556_s24 + $0x14] sm:$0x1] }
  0x28   : > { %v263_v48 = vsel %vm5571_vm2, %v258_v38, %v262_v22  ;;  %v392_v49 = vrot.slane %v390_v39, 5  ;;  %v469_v52 = vrot.slane %v467_v41, 4  ;;  %v470_v53 = vshll.u32 %v201_v25, 16  ;;  %5436 = vmatpush.bf16.msra.mxu1 %v5319_v31  ;;  %5437 = vmatpush.bf16.msra.mxu2 %v5319_v31  ;;  %v5316_v41 = vld [vmem:[%s6954_s1 + $0x28] sm:$0xff] }
  0x29   : > { %v273_v55 = vsel %vm5571_vm2, %v268_v42, %v272_v28  ;;  %v650_v56 = vunpack.c.l.b16 %v263_v48  ;;  %v378_v58 = vrot.slane %v377_v44, 4  ;;  %v387_v60 = vor.u32 %v386_v46, %v382_v45  ;;  %5438 = vmatpush.bf16.msra.mxu3 %v5319_v31  ;;  %769 = vmatpush.bf16.msra.mxu0 %v5319_v31  ;;  %v195_v46 = vld [vmem:[%s5556_s24 + $0x48] sm:$0xf] }
  0x2a   : > { %v651_v61 = vunpack.c.l.b16 %v273_v55  ;;  %v472_v0 = vrot.slane %v470_v53, 5  ;;  %v476_v1 = vshll.u32 %v202_v40, 16  ;;  %v480_v2 = vshrl.u32 %v202_v40, 16  ;;  %v5331_v53 = vld [vmem:[%s6954_s1 + $0xa0] sm:$0xff] }
  0x2b   : > { %v383_v5 = vsel %vm5571_vm2, %v378_v58, %v382_v45  ;;  %v388_v6 = vrot.slane %v387_v60, 4  ;;  %v486_v7 = vshll.u32 %v240_v47, 16  ;;  %v563_v9 = vshrl.u32 %v209_v54, 16  ;;  %790 = vmatmul.bf16.vlgmr.msra.gmra.mxu1 %v686_v59  ;;  %810 = vmatmul.bf16.vlgmr.msra.gmra.mxu2 %v690_v16  ;;  %v5364_v60 = vld [vmem:[%s6954_s1 + $0x128] sm:$0xff] }
  0x2c   : > { %1375 = vmatpush.bf16.msrb.mxu2 %v5334_v37  ;;  %v682_v10 = vpack.c.b16 %v651_v61, %v650_v56  ;;  %v5660_v12 = vunpack.c.l.b16 %v383_v5  ;;  %v473_v13 = vor.u32 %v472_v0, %v469_v52  ;;  %v478_v14 = vrot.slane %v476_v1, 5  ;;  %830 = vmatmul.bf16.vlgmr.msra.gmra.mxu3 %v694_v36  ;;  %v5365_v36 = vld [vmem:[%s6954_s1 + $0x130] sm:$0xff]  ;;  %v5315_v61 = vld [vmem:[%s6954_s1 + $0x20] sm:$0xff] }
  0x2d   : > { %1689 = vmatpush.bf16.msrb.mxu3 %v5358_v43  ;;  %995 = vmatpush.bf16.msrb.mxu1 %v5318_v57  ;;  %v393_v50 = vsel %vm5571_vm2, %v388_v6, %v392_v49  ;;  %v482_v51 = vrot.slane %v480_v2, 4  ;;  %v488_v59 = vrot.slane %v486_v7, 5  ;;  %v565_v16 = vrot.slane %v563_v9, 4  ;;  %v5714_v2 = vld [vmem:[%s5556_s24 + $0x4c] sm:$0xf] }
  0x2e   : > { %770 = vmatmul.bf16.vlgmr.msra.gmra.mxu0 %v682_v10  ;;  %v5669_v19 = vunpack.c.l.b16 %v393_v50  ;;  %v474_v20 = vrot.slane %v473_v13, 4  ;;  %v566_v21 = vshll.u32 %v209_v54, 16  ;;  %v572_v22 = vshll.u32 %v210_v8, 16  ;;  %v5355_v54 = vld [vmem:[%s6954_s1 + $0xe0] sm:$0xff]  ;;  %v203_v10 = vld [vmem:[%s5556_s24 + $0x78] sm:$0xf] }
  0x2f   : > { %v483_v24 = vor.u32 %v482_v51, %v478_v14  ;;  %v576_v25 = vshrl.u32 %v210_v8, 16  ;;  %v582_v26 = vshll.u32 %v244_v15, 16  ;;  %v275_v28 = vshrl.u32 %v185_v17, 16  ;;  %2370 = vmatpush.bf16.msrb.mxu0 %v5366_v11  ;;  %v237_v8 = vld [vmem:[%s5556_s24 + $0x50] sm:$0x1] }
  0x30   : > { %1376 = vmatpush.bf16.msrb.mxu2 %v5333_v63  ;;  %v687_v31 = vpack.c.b16 %v5669_v19, %v5660_v12  ;;  %v479_v32 = vsel %vm5571_vm2, %v474_v20, %v478_v14  ;;  %v568_v33 = vrot.slane %v566_v21, 5  ;;  %v574_v34 = vrot.slane %v572_v22, 5 }
  0x31   : > { %1690 = vmatpush.bf16.msrb.mxu3 %v5357_v3  ;;  %996 = vmatpush.bf16.msrb.mxu1 %v5317_v18  ;;  %v484_v37 = vrot.slane %v483_v24, 4  ;;  %v5690_v38 = vunpack.c.l.b16 %v479_v32  ;;  %v578_v39 = vrot.slane %v576_v25, 4  ;;  %v584_v40 = vrot.slane %v582_v26, 5  ;;  %v5354_v18 = vld [vmem:[%s6954_s1 + $0xd8] sm:$0xff]  ;;  %v5363_v24 = vld [vmem:[%s6954_s1 + $0x120] sm:$0xff] }
  0x32   : > { %v569_v42 = vor.u32 %v568_v33, %v565_v16  ;;  %v277_v43 = vrot.slane %v275_v28, 4  ;;  %v278_v44 = vshll.u32 %v185_v17, 16  ;;  %v284_v45 = vshll.u32 %v5675_v27, 16  ;;  %v5330_v17 = vld [vmem:[%s6954_s1 + $0x98] sm:$0xff]  ;;  %v241_v33 = vld [vmem:[%s5556_s24 + $0x80] sm:$0x1] }
  0x33   : > { %v489_v47 = vsel %vm5571_vm2, %v484_v37, %v488_v59  ;;  %v579_v48 = vor.u32 %v578_v39, %v574_v34  ;;  %v288_v49 = vshrl.u32 %v5675_v27, 16  ;;  %v294_v52 = vshll.u32 %v5685_v35, 16  ;;  %2371 = vmatpush.bf16.msrb.mxu0 %v5365_v36  ;;  %v204_v32 = vld [vmem:[%s5556_s24 + $0x7c] sm:$0xf] }
  0x34   : > { %1377 = vmatpush.bf16.msrb.mxu2 %v5332_v23  ;;  %v669_v55 = vunpack.c.l.b16 %v489_v47  ;;  %v570_v56 = vrot.slane %v569_v42, 4  ;;  %v280_v57 = vrot.slane %v278_v44, 5  ;;  %v286_v58 = vrot.slane %v284_v45, 5  ;;  %v5353_v42 = vld [vmem:[%s6954_s1 + $0xd0] sm:$0xff] }
  0x35   : > { %1691 = vmatpush.bf16.msrb.mxu3 %v5356_v29  ;;  %v580_v63 = vrot.slane %v579_v48, 4  ;;  %v290_v0 = vrot.slane %v288_v49, 4  ;;  %v296_v1 = vrot.slane %v294_v52, 5  ;;  %997 = vmatpush.bf16.msrb.mxu1 %v5316_v41  ;;  %v395_v3 = vshrl.u32 %v195_v46, 16  ;;  %v5329_v41 = vld [vmem:[%s6954_s1 + $0x90] sm:$0xff] }
  0x36   : > { %v691_v5 = vpack.c.b16 %v669_v55, %v5690_v38  ;;  %v575_v6 = vsel %vm5571_vm2, %v570_v56, %v574_v34  ;;  %v281_v7 = vor.u32 %v280_v57, %v277_v43  ;;  %v398_v9 = vshll.u32 %v195_v46, 16  ;;  %v5314_v34 = vld [vmem:[%s6954_s1 + $0x18] sm:$0xff]  ;;  %v5313_v56 = vld [vmem:[%s6954_s1 + $0x10] sm:$0xff] }
  0x37   : > { %v585_v11 = vsel %vm5571_vm2, %v580_v63, %v584_v40  ;;  %v676_v13 = vunpack.c.l.b16 %v575_v6  ;;  %v291_v14 = vor.u32 %v290_v0, %v286_v58  ;;  %v397_v15 = vrot.slane %v395_v3, 4  ;;  %2372 = vmatpush.bf16.msrb.mxu0 %v5364_v60  ;;  %v211_v40 = vld [vmem:[%s5556_s24 + $0xa8] sm:$0xf]  ;;  %v245_v63 = vld [vmem:[%s5556_s24 + $0xb0] sm:$0x1] }
  0x38   : > { %1378 = vmatpush.bf16.msrb.mxu2 %v5331_v53  ;;  %v677_v50 = vunpack.c.l.b16 %v585_v11  ;;  %v282_v51 = vrot.slane %v281_v7, 4  ;;  %v400_v59 = vrot.slane %v398_v9, 5  ;;  %v404_v16 = vshll.u32 %v5714_v2, 16  ;;  %v5362_v53 = vld [vmem:[%s6954_s1 + $0x118] sm:$0xff] }
  0x39   : > { %1692 = vmatpush.bf16.msrb.mxu3 %v5355_v54  ;;  %v292_v20 = vrot.slane %v291_v14, 4  ;;  %998 = vmatpush.bf16.msrb.mxu1 %v5315_v61  ;;  %v408_v21 = vshrl.u32 %v5714_v2, 16  ;;  %v414_v22 = vshll.u32 %v237_v8, 16  ;;  %v491_v23 = vshrl.u32 %v203_v10, 16  ;;  %v187_v6 = vld [vmem:[%s5556_s24 + $0x18] sm:$0xf] }
  0x3a   : > { %v695_v25 = vpack.c.b16 %v677_v50, %v676_v13  ;;  %v287_v26 = vsel %vm5571_vm2, %v282_v51, %v286_v58  ;;  %v401_v28 = vor.u32 %v400_v59, %v397_v15  ;;  %v406_v29 = vrot.slane %v404_v16, 5  ;;  %v5772_v59 = vld [vmem:[%s5556_s24 + $0x1c] sm:$0xf] }
  0x3b   : > { %v297_v36 = vsel %vm5571_vm2, %v292_v20, %v296_v1  ;;  %v652_v37 = vunpack.c.l.b16 %v287_v26  ;;  %v410_v38 = vrot.slane %v408_v21, 4  ;;  %v416_v39 = vrot.slane %v414_v22, 5  ;;  %795 = vmatmul.bf16.gmra.mxu1 %v687_v31  ;;  %815 = vmatmul.bf16.gmra.mxu2 %v691_v5  ;;  %v212_v31 = vld [vmem:[%s5556_s24 + $0xac] sm:$0xf] }
  0x3c   : > { %1379 = vmatpush.bf16.msrb.mxu2 %v5330_v17  ;;  %v653_v43 = vunpack.c.l.b16 %v297_v36  ;;  %v402_v44 = vrot.slane %v401_v28, 4  ;;  %v493_v45 = vrot.slane %v491_v23, 4  ;;  %v494_v46 = vshll.u32 %v203_v10, 16  ;;  %835 = vmatmul.bf16.gmra.mxu3 %v695_v25  ;;  %v5328_v17 = vld [vmem:[%s6954_s1 + $0x88] sm:$0xff]  ;;  %v197_v25 = vld [vmem:[%s5556_s24 + $0x54] sm:$0xf] }
  0x3d   : > { %1693 = vmatpush.bf16.msrb.mxu3 %v5354_v18  ;;  %v411_v47 = vor.u32 %v410_v38, %v406_v29  ;;  %v500_v48 = vshll.u32 %v204_v32, 16  ;;  %v504_v49 = vshrl.u32 %v204_v32, 16  ;;  %v510_v52 = vshll.u32 %v241_v33, 16  ;;  %2373 = vmatpush.bf16.msrb.mxu0 %v5363_v24  ;;  %v5778_v24 = vld [vmem:[%s5556_s24 + $0x20] sm:$0x1]  ;;  %v5352_v38 = vld [vmem:[%s6954_s1 + $0xc8] sm:$0xff] }
  0x3e   : > { %v683_v54 = vpack.c.b16 %v653_v43, %v652_v37  ;;  %v407_v12 = vsel %vm5571_vm2, %v402_v44, %v406_v29  ;;  %v496_v19 = vrot.slane %v494_v46, 5  ;;  %v587_v55 = vshrl.u32 %v211_v40, 16  ;;  %999 = vmatpush.bf16.msrb.mxu1 %v5314_v34 }
  0x3f   : > { %v412_v57 = vrot.slane %v411_v47, 4  ;;  %v5762_v58 = vunpack.c.l.b16 %v407_v12  ;;  %v502_v60 = vrot.slane %v500_v48, 5  ;;  %v506_v61 = vrot.slane %v504_v49, 4 }
  0x40   : > { %1380 = vmatpush.bf16.msrb.mxu2 %v5329_v41  ;;  %775 = vmatmul.bf16.gmra.mxu0 %v683_v54  ;;  %v497_v0 = vor.u32 %v496_v19, %v493_v45  ;;  %v512_v1 = vrot.slane %v510_v52, 5  ;;  %v589_v3 = vrot.slane %v587_v55, 4  ;;  %v590_v5 = vshll.u32 %v211_v40, 16  ;;  %v5312_v40 = vld [vmem:[%s6954_s1 + $0x8] sm:$0xff]  ;;  %v5327_v45 = vld [vmem:[%s6954_s1 + $0x80] sm:$0xff] }
  0x41   : > { %1694 = vmatpush.bf16.msrb.mxu3 %v5353_v42  ;;  %v417_v7 = vsel %vm5571_vm2, %v412_v57, %v416_v39  ;;  %v507_v8 = vor.u32 %v506_v61, %v502_v60  ;;  %v596_v9 = vshll.u32 %v212_v31, 16  ;;  %v600_v10 = vshrl.u32 %v212_v31, 16  ;;  %2374 = vmatpush.bf16.msrb.mxu0 %v5362_v53  ;;  %v5361_v39 = vld [vmem:[%s6954_s1 + $0x110] sm:$0xff]  ;;  %v5801_v52 = vld [vmem:[%s5556_s24 + $0x58] sm:$0xf]  ;;  %v5360_v57 = vld [vmem:[%s6954_s1 + $0x108] sm:$0xff] }
  0x42   : > { %v663_v11 = vunpack.c.l.b16 %v417_v7  ;;  %v498_v13 = vrot.slane %v497_v0, 4  ;;  %v592_v14 = vrot.slane %v590_v5, 5  ;;  %v606_v15 = vshll.u32 %v245_v63, 16  ;;  %1000 = vmatpush.bf16.msrb.mxu1 %v5313_v56  ;;  %v5804_v53 = vld [vmem:[%s5556_s24 + $0x5c] sm:$0x1]  ;;  %v5351_v56 = vld [vmem:[%s6954_s1 + $0xc0] sm:$0xff] }
  0x43   : > { %v508_v18 = vrot.slane %v507_v8, 4  ;;  %v598_v50 = vrot.slane %v596_v9, 5  ;;  %v602_v51 = vrot.slane %v600_v10, 4  ;;  %v299_v16 = vshrl.u32 %v187_v6, 16  ;;  %v205_v55 = vld [vmem:[%s5556_s24 + $0x84] sm:$0xf] }
  0x44   : > { %v688_v20 = vpack.c.b16 %v663_v11, %v5762_v58  ;;  %v503_v21 = vsel %vm5571_vm2, %v498_v13, %v502_v60  ;;  %v593_v22 = vor.u32 %v592_v14, %v589_v3  ;;  %v608_v23 = vrot.slane %v606_v15, 5  ;;  %1381 = vmatpush.bf16.msrb.mxu2 %v5328_v17  ;;  %v5311_v0 = vld [vmem:[%s6954_s1] sm:$0xff]  ;;  %v206_v10 = vld [vmem:[%s5556_s24 + $0x88] sm:$0xf] }
  0x45   : > { %v513_v26 = vsel %vm5571_vm2, %v508_v18, %v512_v1  ;;  %v670_v28 = vunpack.c.l.b16 %v503_v21  ;;  %v603_v29 = vor.u32 %v602_v51, %v598_v50  ;;  %v301_v32 = vrot.slane %v299_v16, 4  ;;  %1695 = vmatpush.bf16.msrb.mxu3 %v5352_v38  ;;  %2375 = vmatpush.bf16.msrb.mxu0 %v5361_v39  ;;  %v5359_v18 = vld [vmem:[%s6954_s1 + $0x100] sm:$0xff]  ;;  %v242_v16 = vld [vmem:[%s5556_s24 + $0x8c] sm:$0x1]  ;;  %v214_v39 = vld [vmem:[%s5556_s24 + $0xb8] sm:$0xf] }
  0x46   : > { %v671_v33 = vunpack.c.l.b16 %v513_v26  ;;  %v594_v34 = vrot.slane %v593_v22, 4  ;;  %v302_v36 = vshll.u32 %v187_v6, 16  ;;  %v308_v37 = vshll.u32 %v5772_v59, 16  ;;  %1001 = vmatpush.bf16.msrb.mxu1 %v5312_v40  ;;  %v213_v22 = vld [vmem:[%s5556_s24 + $0xb4] sm:$0xf] }
  0x47   : > { %v604_v41 = vrot.slane %v603_v29, 4  ;;  %v312_v42 = vshrl.u32 %v5772_v59, 16  ;;  %v318_v43 = vshll.u32 %v5778_v24, 16  ;;  %v419_v44 = vshrl.u32 %v197_v25, 16 }
  0x48   : > { %v692_v46 = vpack.c.b16 %v671_v33, %v670_v28  ;;  %v599_v47 = vsel %vm5571_vm2, %v594_v34, %v598_v50  ;;  %v304_v48 = vrot.slane %v302_v36, 5  ;;  %v310_v49 = vrot.slane %v308_v37, 5  ;;  %1382 = vmatpush.bf16.msrb.mxu2 %v5327_v45  ;;  %v246_v45 = vld [vmem:[%s5556_s24 + $0xbc] sm:$0x1] }
  0x49   : > { %v609_v54 = vsel %vm5571_vm2, %v604_v41, %v608_v23  ;;  %v678_v12 = vunpack.c.l.b16 %v599_v47  ;;  %v314_v19 = vrot.slane %v312_v42, 4  ;;  %v320_v31 = vrot.slane %v318_v43, 5  ;;  %1696 = vmatpush.bf16.msrb.mxu3 %v5351_v56  ;;  %2376 = vmatpush.bf16.msrb.mxu0 %v5360_v57  ;;  %v5398_v47 = vld [vmem:[%s6954_s1 + $0x1b8] sm:$0xff] }
  0x4a   : > { %v679_v58 = vunpack.c.l.b16 %v609_v54  ;;  %v305_v60 = vor.u32 %v304_v48, %v301_v32  ;;  %v421_v61 = vrot.slane %v419_v44, 4  ;;  %v422_v63 = vshll.u32 %v197_v25, 16  ;;  %1002 = vmatpush.bf16.msrb.mxu1 %v5311_v0 }
  0x4b   : > { %v315_v1 = vor.u32 %v314_v19, %v310_v49  ;;  %v428_v3 = vshll.u32 %v5801_v52, 16  ;;  %v432_v5 = vshrl.u32 %v5801_v52, 16  ;;  %v438_v6 = vshll.u32 %v5804_v53, 16  ;;  %800 = vmatmul.bf16.gmra.mxu1 %v688_v20  ;;  %820 = vmatmul.bf16.gmra.mxu2 %v692_v46  ;;  %v189_v46 = vld [vmem:[%s5556_s24 + $0x24] sm:$0xf] }
  0x4c   : > { %v696_v7 = vpack.c.b16 %v679_v58, %v678_v12  ;;  %v306_v8 = vrot.slane %v305_v60, 4  ;;  %v424_v9 = vrot.slane %v422_v63, 5  ;;  %v515_v11 = vshrl.u32 %v205_v55, 16  ;;  %3109 = vmatpush.bf16.msra.mxu2 %v5398_v47 }
  0x4d   : > { %v316_v13 = vrot.slane %v315_v1, 4  ;;  %v430_v14 = vrot.slane %v428_v3, 5  ;;  %v434_v15 = vrot.slane %v432_v5, 4  ;;  %v440_v17 = vrot.slane %v438_v6, 5  ;;  %2377 = vmatpush.bf16.msrb.mxu0 %v5359_v18  ;;  %v5406_v6 = vld [vmem:[%s6954_s1 + $0x1f8] sm:$0xff] }
  0x4e   : > { %840 = vmatmul.bf16.gmra.mxu3 %v696_v7  ;;  %v311_v50 = vsel %vm5571_vm2, %v306_v8, %v310_v49  ;;  %v425_v51 = vor.u32 %v424_v9, %v421_v61  ;;  %v517_v20 = vrot.slane %v515_v11, 4  ;;  %v518_v21 = vshll.u32 %v205_v55, 16  ;;  %v5842_v61 = vld [vmem:[%s5556_s24 + $0x28] sm:$0xf]  ;;  %v5374_v7 = vld [vmem:[%s6954_s1 + $0x178] sm:$0xff] }
  0x4f   : > { %v321_v23 = vsel %vm5571_vm2, %v316_v13, %v320_v31  ;;  %v654_v25 = vunpack.c.l.b16 %v311_v50  ;;  %v435_v26 = vor.u32 %v434_v15, %v430_v14  ;;  %v524_v28 = vshll.u32 %v206_v10, 16  ;;  %v5414_v8 = vld [vmem:[%s6954_s1 + $0x238] sm:$0xff]  ;;  %3790 = vmatpush.bf16.msra.mxu3 %v5406_v6  ;;  %2795 = vmatpush.bf16.msra.mxu1 %v5374_v7 }
  0x50   : > { %v655_v29 = vunpack.c.l.b16 %v321_v23  ;;  %v426_v32 = vrot.slane %v425_v51, 4  ;;  %v520_v33 = vrot.slane %v518_v21, 5  ;;  %v528_v34 = vshrl.u32 %v206_v10, 16 }
  0x51   : > { %v436_v36 = vrot.slane %v435_v26, 4  ;;  %v526_v37 = vrot.slane %v524_v28, 5  ;;  %v534_v38 = vshll.u32 %v242_v16, 16  ;;  %v611_v40 = vshrl.u32 %v213_v22, 16  ;;  %4215 = vmatpush.bf16.msra.mxu0 %v5414_v8  ;;  %v1084_v26 = vld [vmem:[%s5556_s24] sm:$0xe] }
  0x52   : > { %v684_v41 = vpack.c.b16 %v655_v29, %v654_v25  ;;  %v431_v42 = vsel %vm5571_vm2, %v426_v32, %v430_v14  ;;  %v521_v43 = vor.u32 %v520_v33, %v517_v20  ;;  %v530_v44 = vrot.slane %v528_v34, 4  ;;  %v5856_v14 = vld [vmem:[%s5556_s24 + $0x2c] sm:$0x1] }
  0x53   : > { %v441_v48 = vsel %vm5571_vm2, %v436_v36, %v440_v17  ;;  %v664_v49 = vunpack.c.l.b16 %v431_v42  ;;  %v536_v54 = vrot.slane %v534_v38, 5  ;;  %v613_v12 = vrot.slane %v611_v40, 4  ;;  %v4877_v38 = vld [vmem:[%s5556_s24 + $0xc] sm:$0xf] }
  0x54   : > { %780 = vmatmul.bf16.gmra.mxu0 %v684_v41  ;;  %v665_v19 = vunpack.c.l.b16 %v441_v48  ;;  %v522_v31 = vrot.slane %v521_v43, 4  ;;  %v531_v55 = vor.u32 %v530_v44, %v526_v37  ;;  %v614_v56 = vshll.u32 %v213_v22, 16 }
  0x55   : > { %v620_v57 = vshll.u32 %v214_v39, 16  ;;  %v624_v58 = vshrl.u32 %v214_v39, 16  ;;  %v630_v60 = vshll.u32 %v246_v45, 16  ;;  %v323_v63 = vshrl.u32 %v189_v46, 16  ;;  %v4878_v39 = vld [vmem:[%s5556_s24 + $0x10] sm:$0xf] }
  0x56   : > { %v689_v0 = vpack.c.b16 %v665_v19, %v664_v49  ;;  %v527_v1 = vsel %vm5571_vm2, %v522_v31, %v526_v37  ;;  %v532_v3 = vrot.slane %v531_v55, 4  ;;  %v616_v5 = vrot.slane %v614_v56, 5 }
  0x57   : > { %v672_v9 = vunpack.c.l.b16 %v527_v1  ;;  %v622_v10 = vrot.slane %v620_v57, 5  ;;  %v626_v11 = vrot.slane %v624_v58, 4  ;;  %v632_v13 = vrot.slane %v630_v60, 5  ;;  %v4879_v58 = vld [vmem:[%s5556_s24 + $0x14] sm:$0x1] }
  0x58   : > { %v537_v15 = vsel %vm5571_vm2, %v532_v3, %v536_v54  ;;  %v617_v17 = vor.u32 %v616_v5, %v613_v12  ;;  %v325_v18 = vrot.slane %v323_v63, 4  ;;  %v326_v50 = vshll.u32 %v189_v46, 16 }
  0x59   : > { %v673_v51 = vunpack.c.l.b16 %v537_v15  ;;  %v627_v16 = vor.u32 %v626_v11, %v622_v10  ;;  %v332_v20 = vshll.u32 %v5842_v61, 16  ;;  %v336_v21 = vshrl.u32 %v5842_v61, 16 }
  0x5a   : > { %v618_v22 = vrot.slane %v617_v17, 4  ;;  %v328_v23 = vrot.slane %v326_v50, 5  ;;  %v342_v25 = vshll.u32 %v5856_v14, 16  ;;  %v4701_v44 = vrot.slane %v1084_v26, 9  ;;  %v4880_v50 = vld [vmem:[%s5556_s24 + $0x18] sm:$0xf] }
  0x5b   : > { %v693_v28 = vpack.c.b16 %v673_v51, %v672_v9  ;;  %v628_v29 = vrot.slane %v627_v16, 4  ;;  %v334_v32 = vrot.slane %v332_v20, 5  ;;  %v338_v33 = vrot.slane %v336_v21, 4  ;;  %805 = vmatmul.bf16.gmra.mxu1 %v689_v0  ;;  %v5295_v51 = vld [vmem:[%s5556_s24] sm:$0xff]  ;;  %v4881_v16 = vld [vmem:[%s5556_s24 + $0x1c] sm:$0xf] }
  0x5c   : > { %v623_v34 = vsel %vm5571_vm2, %v618_v22, %v622_v10  ;;  %v329_v36 = vor.u32 %v328_v23, %v325_v18  ;;  %v344_v37 = vrot.slane %v342_v25, 5  ;;  %v1137_v47 = vrot.slane %v5596_v62, 5  ;;  %v1085_v21 = vld [vmem:[%s5556_s24 + $0xc] sm:$0xe] }
  0x5d   : > { %825 = vmatmul.bf16.gmra.mxu2 %v693_v28  ;;  %v633_v40 = vsel %vm5571_vm2, %v628_v29, %v632_v13  ;;  %v680_v41 = vunpack.c.l.b16 %v623_v34  ;;  %v339_v42 = vor.u32 %v338_v33, %v334_v32  ;;  %v1140_v48 = vrot.slane %v5603_v4, 5  ;;  %v5335_v34 = vld [vmem:[%s5556_s24 + $0xc] sm:$0xff] }
  0x5e   : > { %v681_v45 = vunpack.c.l.b16 %v633_v40  ;;  %v330_v46 = vrot.slane %v329_v36, 4  ;;  %v1859_v54 = vshrl.u32 %v4877_v38, 16  ;;  %v1862_v12 = vshll.u32 %v4877_v38, 16 }
  0x5f   : > { %v340_v49 = vrot.slane %v339_v42, 4  ;;  %v1868_v19 = vshll.u32 %v4878_v39, 16  ;;  %v1138_v56 = vsel %vm5871_vm5, %v4701_v44, %v1137_v47  ;;  %v1139_v57 = vrot.slane %v1137_v47, 4  ;;  %v4882_v44 = vld [vmem:[%s5556_s24 + $0x20] sm:$0x1] }
  0x60   : > { %v697_v31 = vpack.c.b16 %v681_v45, %v680_v41  ;;  %v335_v55 = vsel %vm5571_vm2, %v330_v46, %v334_v32  ;;  %v1263_v62 = vunpack.c.l.b16 %v1138_v56  ;;  %v1861_v0 = vrot.slane %v1859_v54, 4  ;;  %v5373_v56 = vld [vmem:[%s6954_s1 + $0x170] sm:$0xff] }
  0x61   : > { %v345_v60 = vsel %vm5571_vm2, %v340_v49, %v344_v37  ;;  %v656_v63 = vunpack.c.l.b16 %v335_v55  ;;  %v1141_v1 = vsel %vm5871_vm5, %v1139_v57, %v1140_v48  ;;  %v1864_v3 = vrot.slane %v1862_v12, 5  ;;  %v5397_v48 = vld [vmem:[%s6954_s1 + $0x1b0] sm:$0xff]  ;;  %2796 = vmatpush.bf16.msra.mxu1 %v5373_v56 }
  0x62   : > { %845 = vmatmul.bf16.gmra.mxu3 %v697_v31  ;;  %v657_v4 = vunpack.c.l.b16 %v345_v60  ;;  %v1264_v5 = vunpack.c.l.b16 %v1141_v1  ;;  %v1870_v6 = vrot.slane %v1868_v19, 5  ;;  %v1872_v7 = vshrl.u32 %v4878_v39, 16  ;;  %3110 = vmatpush.bf16.msra.mxu2 %v5397_v48  ;;  %v4883_v31 = vld [vmem:[%s5556_s24 + $0x24] sm:$0xf]  ;;  %v5405_v55 = vld [vmem:[%s6954_s1 + $0x1f0] sm:$0xff] }
  0x63   : > { %v1878_v8 = vshll.u32 %v4879_v58, 16  ;;  %v1865_v10 = vor.u32 %v1864_v3, %v1861_v0  ;;  %v1144_v22 = vrot.slane %v5675_v27, 5  ;;  %v1883_v23 = vshrl.u32 %v4880_v50, 16  ;;  %v5413_v57 = vld [vmem:[%s6954_s1 + $0x230] sm:$0xff]  ;;  %3791 = vmatpush.bf16.msra.mxu3 %v5405_v55  ;;  %v1087_v48 = vld [vmem:[%s5556_s24 + $0x24] sm:$0xe] }
  0x64   : > { %v685_v9 = vpack.c.b16 %v657_v4, %v656_v63  ;;  %v1295_v11 = vpack.c.b16 %v1264_v5, %v1263_v62  ;;  %v1874_v13 = vrot.slane %v1872_v7, 4  ;;  %v1886_v25 = vshll.u32 %v4880_v50, 16  ;;  %v4884_v62 = vld [vmem:[%s5556_s24 + $0x28] sm:$0xf]  ;;  %v5296_v0 = vld [vmem:[%s5556_s24 + $0xc] sm:$0xff]  ;;  %4216 = vmatpush.bf16.msra.mxu0 %v5413_v57 }
  0x65   : > { %v1866_v15 = vrot.slane %v1865_v10, 4  ;;  %v1880_v18 = vrot.slane %v1878_v8, 5  ;;  %v1892_v29 = vshll.u32 %v4881_v16, 16  ;;  %v1896_v32 = vshrl.u32 %v4881_v16, 16 }
  0x66   : > { %785 = vmatmul.bf16.gmra.mxu0 %v685_v9  ;;  %v1875_v17 = vor.u32 %v1874_v13, %v1870_v6  ;;  %v4702_v33 = vrot.slane %v1085_v21, 9  ;;  %v1146_v38 = vrot.slane %v1144_v22, 4  ;;  %v1147_v27 = vrot.slane %v5685_v35, 5  ;;  %v4885_v21 = vld [vmem:[%s5556_s24 + $0x2c] sm:$0x1] }
  0x67   : > { %v1871_v26 = vsel %vm5571_vm2, %v1866_v15, %v1870_v6  ;;  %v1885_v39 = vrot.slane %v1883_v23, 4  ;;  %v1888_v40 = vrot.slane %v1886_v25, 5  ;;  %v1894_v41 = vrot.slane %v1892_v29, 5  ;;  %v1086_v6 = vld [vmem:[%s5556_s24 + $0x18] sm:$0xe] }
  0x68   : > { %v1876_v20 = vrot.slane %v1875_v17, 4  ;;  %v2258_v36 = vunpack.c.l.b16 %v1871_v26  ;;  %v1898_v42 = vrot.slane %v1896_v32, 4  ;;  %v1145_v46 = vsel %vm5871_vm5, %v4702_v33, %v1144_v22 }
  0x69   : > { %v1148_v47 = vsel %vm5871_vm5, %v1146_v38, %v1147_v27  ;;  %v1889_v35 = vor.u32 %v1888_v40, %v1885_v39  ;;  %v1902_v54 = vshll.u32 %v4882_v44, 16  ;;  %v1265_v12 = vunpack.c.l.b16 %v1145_v46  ;;  %v4887_v38 = vld [vmem:[%s5556_s24 + $0x34] sm:$0xf]  ;;  %v5297_v27 = vld [vmem:[%s5556_s24 + $0x18] sm:$0xff] }
  0x6a   : > { %v1881_v28 = vsel %vm5571_vm2, %v1876_v20, %v1880_v18  ;;  %v1899_v49 = vor.u32 %v1898_v42, %v1894_v41  ;;  %v1266_v19 = vunpack.c.l.b16 %v1148_v47  ;;  %v1151_v1 = vrot.slane %v5772_v59, 5  ;;  %v5336_v18 = vld [vmem:[%s5556_s24 + $0x18] sm:$0xff] }
  0x6b   : > { %1003 = vmatmul.bf16.vlgmr.msrb.gmra.mxu1 %v5295_v51  ;;  %v2259_v37 = vunpack.c.l.b16 %v1881_v28  ;;  %v1890_v58 = vrot.slane %v1889_v35, 4  ;;  %v1904_v63 = vrot.slane %v1902_v54, 5  ;;  %v1907_v3 = vshrl.u32 %v4883_v31, 16 }
  0x6c   : > { %v1900_v60 = vrot.slane %v1899_v49, 4  ;;  %v1296_v4 = vpack.c.b16 %v1266_v19, %v1265_v12  ;;  %v1910_v5 = vshll.u32 %v4883_v31, 16  ;;  %v1916_v7 = vshll.u32 %v4884_v62, 16  ;;  %v5337_v31 = vld [vmem:[%s5556_s24 + $0x24] sm:$0xff] }
  0x6d   : > { %1383 = vmatmul.bf16.vlgmr.msrb.gmra.mxu2 %v1295_v11  ;;  %v2290_v45 = vpack.c.b16 %v2259_v37, %v2258_v36  ;;  %v1920_v8 = vshrl.u32 %v4884_v62, 16  ;;  %v1895_v9 = vsel %vm5571_vm2, %v1890_v58, %v1894_v41  ;;  %v1154_v11 = vrot.slane %v5778_v24, 5  ;;  %v4886_v37 = vld [vmem:[%s5556_s24 + $0x30] sm:$0xf] }
  0x6e   : > { %v1905_v10 = vsel %vm5571_vm2, %v1900_v60, %v1904_v63  ;;  %v4703_v13 = vrot.slane %v1086_v6, 9  ;;  %v1153_v59 = vrot.slane %v1151_v1, 4  ;;  %v1909_v15 = vrot.slane %v1907_v3, 4  ;;  %v4889_v6 = vld [vmem:[%s5556_s24 + $0x3c] sm:$0xf] }
  0x6f   : > { %v1912_v17 = vrot.slane %v1910_v5, 5  ;;  %v2260_v50 = vunpack.c.l.b16 %v1895_v9  ;;  %v2261_v51 = vunpack.c.l.b16 %v1905_v10  ;;  %v1918_v16 = vrot.slane %v1916_v7, 5  ;;  %v4890_v7 = vld [vmem:[%s5556_s24 + $0x40] sm:$0xf] }
  0x70   : > { %v1922_v20 = vrot.slane %v1920_v8, 4  ;;  %v1152_v22 = vsel %vm5871_vm5, %v4703_v13, %v1151_v1  ;;  %v1155_v25 = vsel %vm5871_vm5, %v1153_v59, %v1154_v11  ;;  %v1926_v28 = vshll.u32 %v4885_v21, 16  ;;  %v5396_v1 = vld [vmem:[%s6954_s1 + $0x1a8] sm:$0xff]  ;;  %v5448_v21 = vld [vmem:[%s5556_s24 + $0x34] sm:$0xf] }
  0x71   : > { %v1913_v23 = vor.u32 %v1912_v17, %v1909_v15  ;;  %v2291_v24 = vpack.c.b16 %v2261_v51, %v2260_v50  ;;  %v1267_v29 = vunpack.c.l.b16 %v1152_v22  ;;  %v1268_v32 = vunpack.c.l.b16 %v1155_v25  ;;  %3111 = vmatpush.bf16.msra.mxu2 %v5396_v1  ;;  %v5404_v11 = vld [vmem:[%s6954_s1 + $0x1e8] sm:$0xff]  ;;  %v1089_v1 = vld [vmem:[%s5556_s24 + $0x3c] sm:$0xe] }
  0x72   : > { %1697 = vmatmul.bf16.vlgmr.msrb.gmra.mxu3 %v5335_v34  ;;  %v1923_v26 = vor.u32 %v1922_v20, %v1918_v16  ;;  %v1928_v36 = vrot.slane %v1926_v28, 5  ;;  %v1931_v41 = vshrl.u32 %v4886_v37, 16  ;;  %v1934_v42 = vshll.u32 %v4886_v37, 16  ;;  %v5372_v13 = vld [vmem:[%s6954_s1 + $0x168] sm:$0xff]  ;;  %v5449_v37 = vld [vmem:[%s5556_s24 + $0x38] sm:$0x1] }
  0x73   : > { %v1914_v33 = vrot.slane %v1913_v23, 4  ;;  %v1297_v39 = vpack.c.b16 %v1268_v32, %v1267_v29  ;;  %v1940_v46 = vshll.u32 %v4887_v38, 16  ;;  %v1944_v47 = vshrl.u32 %v4887_v38, 16  ;;  %v5412_v59 = vld [vmem:[%s6954_s1 + $0x228] sm:$0xff]  ;;  %3792 = vmatpush.bf16.msra.mxu3 %v5404_v11  ;;  %2797 = vmatpush.bf16.msra.mxu1 %v5372_v13  ;;  %v5451_v13 = vld [vmem:[%s5556_s24 + $0x44] sm:$0x1] }
  0x74   : > { %v1924_v34 = vrot.slane %v1923_v26, 4  ;;  %v1161_v54 = vrot.slane %v5856_v14, 5  ;;  %v1933_v12 = vrot.slane %v1931_v41, 4  ;;  %v1936_v19 = vrot.slane %v1934_v42, 5  ;;  %v5298_v15 = vld [vmem:[%s5556_s24 + $0x24] sm:$0xff]  ;;  %4217 = vmatpush.bf16.msra.mxu0 %v5412_v59 }
  0x75   : > { %v1919_v40 = vsel %vm5571_vm2, %v1914_v33, %v1918_v16  ;;  %v4704_v55 = vrot.slane %v1087_v48, 9  ;;  %v1942_v57 = vrot.slane %v1940_v46, 5  ;;  %v1946_v58 = vrot.slane %v1944_v47, 4  ;;  %v5338_v33 = vld [vmem:[%s5556_s24 + $0x30] sm:$0xff] }
  0x76   : > { %2378 = vmatmul.bf16.vlgmr.msrb.gmra.mxu0 %v2290_v45  ;;  %v1929_v44 = vsel %vm5571_vm2, %v1924_v34, %v1928_v36  ;;  %v1158_v45 = vrot.slane %v5842_v61, 5  ;;  %v2262_v35 = vunpack.c.l.b16 %v1919_v40  ;;  %v4888_v61 = vld [vmem:[%s5556_s24 + $0x38] sm:$0x1]  ;;  %v1937_v63 = vor.u32 %v1936_v19, %v1933_v12  ;;  %v4892_v12 = vld [vmem:[%s5556_s24 + $0x48] sm:$0xf] }
  0x77   : > { %v2263_v49 = vunpack.c.l.b16 %v1929_v44  ;;  %v1947_v14 = vor.u32 %v1946_v58, %v1942_v57  ;;  %v1955_v17 = vshrl.u32 %v4889_v6, 16  ;;  %v1964_v51 = vshll.u32 %v4890_v7, 16  ;;  %v4893_v19 = vld [vmem:[%s5556_s24 + $0x4c] sm:$0xf] }
  0x78   : > { %v1160_v56 = vrot.slane %v1158_v45, 4  ;;  %v1159_v62 = vsel %vm5871_vm5, %v4704_v55, %v1158_v45  ;;  %v1938_v8 = vrot.slane %v1937_v63, 4  ;;  %v1165_v22 = vrot.slane %v5448_v21, 5 }
  0x79   : > { %v2292_v60 = vpack.c.b16 %v2263_v49, %v2262_v35  ;;  %v1269_v3 = vunpack.c.l.b16 %v1159_v62  ;;  %v1948_v9 = vrot.slane %v1947_v14, 4  ;;  %v1968_v23 = vshrl.u32 %v4890_v7, 16  ;;  %v5450_v62 = vld [vmem:[%s5556_s24 + $0x40] sm:$0xf] }
  0x7a   : > { %v1943_v16 = vsel %vm5571_vm2, %v1938_v8, %v1942_v57  ;;  %v1957_v25 = vrot.slane %v1955_v17, 4  ;;  %v1966_v32 = vrot.slane %v1964_v51, 5  ;;  %v1167_v36 = vrot.slane %v1165_v22, 4 }
  0x7b   : > { %1008 = vmatmul.bf16.gmra.mxu1 %v5296_v0  ;;  %v1162_v0 = vsel %vm5871_vm5, %v1160_v56, %v1161_v54  ;;  %v2264_v28 = vunpack.c.l.b16 %v1943_v16  ;;  %v1168_v38 = vrot.slane %v5449_v37, 5  ;;  %v1979_v58 = vshrl.u32 %v4892_v12, 16  ;;  %v4896_v37 = vld [vmem:[%s5556_s24 + $0x58] sm:$0xf] }
  0x7c   : > { %v1270_v5 = vunpack.c.l.b16 %v1162_v0  ;;  %v1172_v0 = vrot.slane %v5450_v62, 5  ;;  %v1992_v14 = vshrl.u32 %v4893_v19, 16  ;;  %v1175_v59 = vrot.slane %v5451_v13, 5 }
  0x7d   : > { %1388 = vmatmul.bf16.gmra.mxu2 %v1296_v4  ;;  %v1950_v4 = vshll.u32 %v4888_v61, 16  ;;  %v1169_v44 = vsel %vm5871_vm5, %v1167_v36, %v1168_v38  ;;  %v1982_v61 = vshll.u32 %v4892_v12, 16  ;;  %v5403_v38 = vld [vmem:[%s6954_s1 + $0x1e0] sm:$0xff]  ;;  %v2016_v12 = vshrl.u32 %v4896_v37, 16 }
  0x7e   : > { %v1298_v50 = vpack.c.b16 %v1270_v5, %v1269_v3  ;;  %v1272_v35 = vunpack.c.l.b16 %v1169_v44  ;;  %v1174_v11 = vrot.slane %v1172_v0, 4  ;;  %3793 = vmatpush.bf16.msra.mxu3 %v5403_v38 }
  0x7f   : > { %v1952_v10 = vrot.slane %v1950_v4, 5  ;;  %v1984_v7 = vrot.slane %v1982_v61, 5 }
  0x81   : > { %v1953_v20 = vsel %vm5571_vm2, %v1948_v9, %v1952_v10  ;;  %v5339_v9 = vld [vmem:[%s5556_s24 + $0x3c] sm:$0xff]  ;;  %v4706_v10 = vrot.slane %v1089_v1, 9 }
  0x82   : > { %1702 = vmatmul.bf16.gmra.mxu3 %v5336_v18  ;;  %v1958_v18 = vshll.u32 %v4889_v6, 16  ;;  %v2265_v29 = vunpack.c.l.b16 %v1953_v20  ;;  %v1981_v6 = vrot.slane %v1979_v58, 4 }
  0x83   : > { %v1173_v21 = vsel %vm5871_vm5, %v4706_v10, %v1172_v0 }
  0x84   : > { %v1960_v26 = vrot.slane %v1958_v18, 5  ;;  %v2293_v41 = vpack.c.b16 %v2265_v29, %v2264_v28  ;;  %v4894_v18 = vld [vmem:[%s5556_s24 + $0x50] sm:$0x1]  ;;  %v1985_v20 = vor.u32 %v1984_v7, %v1981_v6  ;;  %v1273_v28 = vunpack.c.l.b16 %v1173_v21 }
  0x86   : > { %2383 = vmatmul.bf16.gmra.mxu0 %v2291_v24  ;;  %v1088_v24 = vld [vmem:[%s5556_s24 + $0x30] sm:$0xe]  ;;  %v1961_v40 = vor.u32 %v1960_v26, %v1957_v25  ;;  %v5395_v25 = vld [vmem:[%s6954_s1 + $0x1a0] sm:$0xff] }
  0x87   : > { %v4705_v34 = vrot.slane %v1088_v24, 9  ;;  %v1998_v24 = vshll.u32 %v4894_v18, 16  ;;  %3112 = vmatpush.bf16.msra.mxu2 %v5395_v25 }
  0x88   : > { %v1962_v47 = vrot.slane %v1961_v40, 4 }
  0x89   : > { %v1166_v42 = vsel %vm5871_vm5, %v4705_v34, %v1165_v22  ;;  %v1176_v22 = vsel %vm5871_vm5, %v1174_v11, %v1175_v59  ;;  %v2000_v36 = vrot.slane %v1998_v24, 5 }
  0x8a   : > { %v1271_v48 = vunpack.c.l.b16 %v1166_v42  ;;  %v1967_v55 = vsel %vm5571_vm2, %v1962_v47, %v1966_v32  ;;  %v1274_v29 = vunpack.c.l.b16 %v1176_v22  ;;  %v2012_v47 = vshll.u32 %v4896_v37, 16  ;;  %v4898_v22 = vld [vmem:[%s5556_s24 + $0x60] sm:$0xf] }
  0x8b   : > { %1013 = vmatmul.bf16.gmra.mxu1 %v5297_v27  ;;  %v1970_v27 = vrot.slane %v1968_v23, 4  ;;  %v2266_v3 = vunpack.c.l.b16 %v1967_v55  ;;  %v2030_v37 = vshll.u32 %v4898_v22, 16 }
  0x8c   : > { %v1299_v57 = vpack.c.b16 %v1272_v35, %v1271_v48  ;;  %v5411_v48 = vld [vmem:[%s6954_s1 + $0x220] sm:$0xff] }
  0x8d   : > { %1393 = vmatmul.bf16.gmra.mxu2 %v1297_v39  ;;  %v4891_v39 = vld [vmem:[%s5556_s24 + $0x44] sm:$0x1]  ;;  %v1971_v45 = vor.u32 %v1970_v27, %v1966_v32  ;;  %v1986_v32 = vrot.slane %v1985_v20, 4  ;;  %4218 = vmatpush.bf16.msra.mxu0 %v5411_v48 }
  0x8e   : > { %v1974_v46 = vshll.u32 %v4891_v39, 16  ;;  %v5371_v27 = vld [vmem:[%s6954_s1 + $0x160] sm:$0xff] }
  0x8f   : > { %v1972_v49 = vrot.slane %v1971_v45, 4  ;;  %2798 = vmatpush.bf16.msra.mxu1 %v5371_v27 }
  0x90   : > { %v1976_v54 = vrot.slane %v1974_v46, 5  ;;  %v1300_v46 = vpack.c.b16 %v1274_v29, %v1273_v28  ;;  %v5301_v29 = vld [vmem:[%s5556_s24 + $0x48] sm:$0xff] }
  0x92   : > { %1707 = vmatmul.bf16.gmra.mxu3 %v5337_v31  ;;  %v5299_v31 = vld [vmem:[%s5556_s24 + $0x30] sm:$0xff]  ;;  %v1977_v63 = vsel %vm5571_vm2, %v1972_v49, %v1976_v54  ;;  %v1179_v54 = vrot.slane %v5714_v2, 5 }
  0x93   : > { %v2267_v5 = vunpack.c.l.b16 %v1977_v63  ;;  %v5340_v63 = vld [vmem:[%s5556_s24 + $0x48] sm:$0xff] }
  0x94   : > { %v1181_v0 = vrot.slane %v1179_v54, 4 }
  0x95   : > { %v2294_v51 = vpack.c.b16 %v2267_v5, %v2266_v3  ;;  %v2018_v3 = vrot.slane %v2016_v12, 4  ;;  %v4897_v5 = vld [vmem:[%s5556_s24 + $0x5c] sm:$0x1] }
  0x96   : > { %2388 = vmatmul.bf16.gmra.mxu0 %v2292_v60  ;;  %v1988_v60 = vshll.u32 %v4893_v19, 16  ;;  %v1090_v19 = vld [vmem:[%s5556_s24 + $0x48] sm:$0xe]  ;;  %v2022_v59 = vshll.u32 %v4897_v5, 16  ;;  %v5394_v5 = vld [vmem:[%s6954_s1 + $0x198] sm:$0xff] }
  0x97   : > { %v4707_v62 = vrot.slane %v1090_v19, 9  ;;  %3113 = vmatpush.bf16.msra.mxu2 %v5394_v5 }
  0x98   : > { %v1990_v8 = vrot.slane %v1988_v60, 5  ;;  %v2014_v60 = vrot.slane %v2012_v47, 5  ;;  %v2024_v21 = vrot.slane %v2022_v59, 5  ;;  %v4901_v59 = vld [vmem:[%s5556_s24 + $0x6c] sm:$0xf] }
  0x99   : > { %v1180_v10 = vsel %vm5871_vm5, %v4707_v62, %v1179_v54  ;;  %v5341_v54 = vld [vmem:[%s5556_s24 + $0x54] sm:$0xff] }
  0x9a   : > { %v1991_v35 = vsel %vm5571_vm2, %v1986_v32, %v1990_v8  ;;  %v2019_v13 = vor.u32 %v2018_v3, %v2014_v60  ;;  %v1275_v18 = vunpack.c.l.b16 %v1180_v10 }
  0x9b   : > { %1018 = vmatmul.bf16.gmra.mxu1 %v5298_v15  ;;  %v1994_v15 = vrot.slane %v1992_v14, 4  ;;  %v2268_v58 = vunpack.c.l.b16 %v1991_v35  ;;  %v5452_v14 = vld [vmem:[%s5556_s24 + $0x50] sm:$0x1]  ;;  %v2032_v35 = vrot.slane %v2030_v37, 5  ;;  %v5453_v37 = vld [vmem:[%s5556_s24 + $0x64] sm:$0xf] }
  0x9c   : > { %v1182_v1 = vrot.slane %v5452_v14, 5  ;;  %v2020_v20 = vrot.slane %v2019_v13, 4 }
  0x9d   : > { %1398 = vmatmul.bf16.gmra.mxu2 %v1298_v50  ;;  %v1995_v23 = vor.u32 %v1994_v15, %v1990_v8 }
  0x9e   : > { %v1183_v11 = vsel %vm5871_vm5, %v1181_v0, %v1182_v1  ;;  %v2025_v27 = vsel %vm5571_vm2, %v2020_v20, %v2024_v21  ;;  %v5302_v20 = vld [vmem:[%s5556_s24 + $0x54] sm:$0xff]  ;;  %v4902_v21 = vld [vmem:[%s5556_s24 + $0x70] sm:$0xf] }
  0x9f   : > { %v1996_v34 = vrot.slane %v1995_v23, 4  ;;  %v4899_v23 = vld [vmem:[%s5556_s24 + $0x64] sm:$0xf]  ;;  %v2271_v47 = vunpack.c.l.b16 %v2025_v27  ;;  %v2054_v27 = vshll.u32 %v4901_v59, 16 }
  0xa0   : > { %v2036_v38 = vshll.u32 %v4899_v23, 16 }
  0xa1   : > { %v2001_v49 = vsel %vm5571_vm2, %v1996_v34, %v2000_v36  ;;  %v2027_v36 = vshrl.u32 %v4898_v22, 16 }
  0xa2   : > { %1712 = vmatmul.bf16.gmra.mxu3 %v5338_v33  ;;  %v4895_v33 = vld [vmem:[%s5556_s24 + $0x54] sm:$0xf]  ;;  %v2269_v61 = vunpack.c.l.b16 %v2001_v49  ;;  %v2038_v49 = vrot.slane %v2036_v38, 5  ;;  %v1193_v38 = vrot.slane %v5453_v37, 5 }
  0xa3   : > { %v2003_v42 = vshrl.u32 %v4895_v33, 16  ;;  %v2006_v44 = vshll.u32 %v4895_v33, 16  ;;  %v2029_v48 = vrot.slane %v2027_v36, 4 }
  0xa4   : > { %v2295_v8 = vpack.c.b16 %v2269_v61, %v2268_v58  ;;  %v4900_v61 = vld [vmem:[%s5556_s24 + $0x68] sm:$0x1] }
  0xa5   : > { %v2008_v55 = vrot.slane %v2006_v44, 5  ;;  %v1091_v44 = vld [vmem:[%s5556_s24 + $0x54] sm:$0xe]  ;;  %v2033_v62 = vor.u32 %v2032_v35, %v2029_v48  ;;  %v2046_v3 = vshll.u32 %v4900_v61, 16  ;;  %v2056_v61 = vrot.slane %v2054_v27, 5  ;;  %v5303_v27 = vld [vmem:[%s5556_s24 + $0x60] sm:$0xff] }
  0xa6   : > { %2393 = vmatmul.bf16.gmra.mxu0 %v2293_v41  ;;  %v5300_v41 = vld [vmem:[%s5556_s24 + $0x3c] sm:$0xff]  ;;  %v4708_v12 = vrot.slane %v1091_v44, 9  ;;  %v2060_v44 = vshll.u32 %v4902_v21, 16 }
  0xa7   : > { %v2034_v10 = vrot.slane %v2033_v62, 4  ;;  %v2048_v13 = vrot.slane %v2046_v3, 5 }
  0xa8   : > { %v5979_v56 = vpop.f32.mrf.mxu1 }
  0xab   : > { %v5984_v4 = vpop.f32.mrf.mxu0  ;;  %1023 = vmatmul.bf16.gmra.mxu1 %v5299_v31  ;;  %v2005_v31 = vrot.slane %v2003_v42, 4  ;;  %v2040_v42 = vshrl.u32 %v4899_v23, 16 }
  0xad   : > { %1403 = vmatmul.bf16.gmra.mxu2 %v1299_v57  ;;  %v2009_v7 = vor.u32 %v2008_v55, %v2005_v31  ;;  %v1189_v31 = vrot.slane %v5804_v53, 5  ;;  %v2042_v55 = vrot.slane %v2040_v42, 4  ;;  %v1092_v42 = vld [vmem:[%s5556_s24 + $0x60] sm:$0xe] }
  0xae   : > { %v5989_v17 = vpop.f32.mrf.mxu2 }
  0xaf   : > { %v5992_v50 = vpop.f32.mrf.mxu3  ;;  %v2010_v15 = vrot.slane %v2009_v7, 4  ;;  %v2043_v1 = vor.u32 %v2042_v55, %v2038_v49 }
  0xb0   : > { %v5994_v16 = vpop.f32.mrf.mxu1 }
  0xb1   : > { %v2015_v32 = vsel %vm5571_vm2, %v2010_v15, %v2014_v60  ;;  %v5402_v15 = vld [vmem:[%s6954_s1 + $0x1d8] sm:$0xff] }
  0xb2   : > { %1717 = vmatmul.bf16.gmra.mxu3 %v5339_v9 }
  0xb3   : > { %v6003_v26 = vpop.f32.mrf.mxu0  ;;  %3794 = vmatpush.bf16.msra.mxu3 %v5402_v15 }
  0xb6   : > { %2398 = vmatmul.bf16.gmra.mxu0 %v2294_v51  ;;  %v6013_v39 = vpop.f32.mrf.mxu2  ;;  %v1276_v51 = vunpack.c.l.b16 %v1183_v11  ;;  %v2044_v11 = vrot.slane %v2043_v1, 4 }
  0xb7   : > { %v6015_v40 = vpop.f32.mrf.mxu3 }
  0xb8   : > { %v6018_v45 = vpop.f32.mrf.mxu1  ;;  %v1301_v34 = vpack.c.b16 %v1276_v51, %v1275_v18  ;;  %v5370_v18 = vld [vmem:[%s6954_s1 + $0x158] sm:$0xff]  ;;  %v2049_v36 = vsel %vm5571_vm2, %v2044_v11, %v2048_v13 }
  0xb9   : > { %2799 = vmatpush.bf16.msra.mxu1 %v5370_v18  ;;  %v2273_v35 = vunpack.c.l.b16 %v2049_v36 }
  0xbb   : > { %1028 = vmatmul.bf16.gmra.mxu1 %v5300_v41  ;;  %v1186_v41 = vrot.slane %v5801_v52, 5 }
  0xbd   : > { %v6029_v57 = vpop.f32.mrf.mxu0  ;;  %1408 = vmatmul.bf16.gmra.mxu2 %v1300_v46  ;;  %v2270_v46 = vunpack.c.l.b16 %v2015_v32  ;;  %v1188_v19 = vrot.slane %v1186_v41, 4  ;;  %v1187_v14 = vsel %vm5871_vm5, %v4708_v12, %v1186_v41  ;;  %v4709_v12 = vrot.slane %v1092_v42, 9 }
  0xbe   : > { %v6033_v2 = vpop.f32.mrf.mxu2  ;;  %v1277_v7 = vunpack.c.l.b16 %v1187_v14 }
  0xbf   : > { %v6036_v6 = vpop.f32.mrf.mxu3  ;;  %v2296_v60 = vpack.c.b16 %v2271_v47, %v2270_v46  ;;  %v1190_v53 = vsel %vm5871_vm5, %v1188_v19, %v1189_v31  ;;  %v2064_v46 = vshrl.u32 %v4902_v21, 16  ;;  %v5410_v47 = vld [vmem:[%s6954_s1 + $0x218] sm:$0xff]  ;;  %v1195_v19 = vrot.slane %v1193_v38, 4  ;;  %v5454_v31 = vld [vmem:[%s5556_s24 + $0x68] sm:$0x1] }
  0xc0   : > { %v6038_v9 = vpop.f32.mrf.mxu1  ;;  %4219 = vmatpush.bf16.msra.mxu0 %v5410_v47  ;;  %v1196_v55 = vrot.slane %v5454_v31, 5  ;;  %v1194_v5 = vsel %vm5871_vm5, %v4709_v12, %v1193_v38  ;;  %v4905_v21 = vld [vmem:[%s5556_s24 + $0x7c] sm:$0xf]  ;;  %v5455_v47 = vld [vmem:[%s5556_s24 + $0x70] sm:$0xf] }
  0xc1   : > { %v2066_v62 = vrot.slane %v2064_v46, 4  ;;  %v1279_v18 = vunpack.c.l.b16 %v1194_v5  ;;  %v2084_v42 = vshll.u32 %v4905_v21, 16 }
  0xc2   : > { %1722 = vmatmul.bf16.gmra.mxu3 %v5340_v63 }
  0xc5   : > { %v6046_v24 = vpop.f32.mrf.mxu0 }
  0xc6   : > { %2403 = vmatmul.bf16.gmra.mxu0 %v2295_v8  ;;  %v6048_v25 = vpop.f32.mrf.mxu2  ;;  %v1278_v8 = vunpack.c.l.b16 %v1190_v53  ;;  %v4903_v53 = vld [vmem:[%s5556_s24 + $0x74] sm:$0x1] }
  0xc7   : > { %v6050_v28 = vpop.f32.mrf.mxu3  ;;  %v2070_v13 = vshll.u32 %v4903_v53, 16 }
  0xc8   : > { %v6055_v33 = vpop.f32.mrf.mxu1  ;;  %v1302_v23 = vpack.c.b16 %v1278_v8, %v1277_v7  ;;  %v1197_v7 = vsel %vm5871_vm5, %v1195_v19, %v1196_v55 }
  0xcb   : > { %1033 = vmatmul.bf16.gmra.mxu1 %v5301_v29  ;;  %v2051_v29 = vshrl.u32 %v4901_v59, 16  ;;  %v4904_v59 = vld [vmem:[%s5556_s24 + $0x78] sm:$0xf] }
  0xcc   : > { %v2075_v36 = vshrl.u32 %v4904_v59, 16  ;;  %v2078_v37 = vshll.u32 %v4904_v59, 16 }
  0xcd   : > { %1413 = vmatmul.bf16.gmra.mxu2 %v1301_v34  ;;  %v2039_v34 = vsel %vm5571_vm2, %v2034_v10, %v2038_v49  ;;  %v2053_v49 = vrot.slane %v2051_v29, 4 }
  0xce   : > { %v6063_v58 = vpop.f32.mrf.mxu2  ;;  %v2272_v48 = vunpack.c.l.b16 %v2039_v34  ;;  %v2072_v34 = vrot.slane %v2070_v13, 5  ;;  %v2077_v55 = vrot.slane %v2075_v36, 4  ;;  %v5343_v13 = vld [vmem:[%s5556_s24 + $0x6c] sm:$0xff] }
  0xcf   : > { %v2057_v8 = vor.u32 %v2056_v61, %v2053_v49  ;;  %v2080_v61 = vrot.slane %v2078_v37, 5 }
  0xd0   : > { %v6070_v0 = vpop.f32.mrf.mxu1  ;;  %v2297_v1 = vpack.c.b16 %v2273_v35, %v2272_v48  ;;  %v1200_v48 = vrot.slane %v5455_v47, 5  ;;  %v5393_v47 = vld [vmem:[%s6954_s1 + $0x190] sm:$0xff] }
  0xd1   : > { %v6066_v52 = vpop.f32.mrf.mxu0  ;;  %v6068_v63 = vpop.f32.mrf.mxu3  ;;  %3114 = vmatpush.bf16.msra.mxu2 %v5393_v47 }
  0xd2   : > { %1727 = vmatmul.bf16.gmra.mxu3 %v5341_v54  ;;  %v5342_v54 = vld [vmem:[%s5556_s24 + $0x60] sm:$0xff] }
  0xd6   : > { %2408 = vmatmul.bf16.gmra.mxu0 %v2296_v60  ;;  %v6086_v51 = vpop.f32.mrf.mxu2  ;;  %v2062_v60 = vrot.slane %v2060_v44, 5  ;;  %v2088_v44 = vshrl.u32 %v4905_v21, 16 }
  0xd8   : > { %v6092_v32 = vpop.f32.mrf.mxu1  ;;  %v2067_v11 = vor.u32 %v2066_v62, %v2062_v60  ;;  %v2086_v62 = vrot.slane %v2084_v42, 5  ;;  %v2090_v53 = vrot.slane %v2088_v44, 4 }
  0xd9   : > { %v6090_v22 = vpop.f32.mrf.mxu0  ;;  %v6099_v41 = vpop.f32.mrf.mxu3 }
  0xda   : > { %v2068_v29 = vrot.slane %v2067_v11, 4  ;;  %v4906_v11 = vld [vmem:[%s5556_s24 + $0x80] sm:$0x1]  ;;  %v2091_v21 = vor.u32 %v2090_v53, %v2086_v62  ;;  %v5369_v53 = vld [vmem:[%s6954_s1 + $0x150] sm:$0xff] }
  0xdb   : > { %1038 = vmatmul.bf16.gmra.mxu1 %v5302_v20  ;;  %v1280_v20 = vunpack.c.l.b16 %v1197_v7  ;;  %v5456_v7 = vld [vmem:[%s5556_s24 + $0x74] sm:$0x1] }
  0xdc   : > { %v2073_v31 = vsel %vm5571_vm2, %v2068_v29, %v2072_v34  ;;  %2800 = vmatpush.bf16.msra.mxu1 %v5369_v53 }
  0xdd   : > { %1418 = vmatmul.bf16.gmra.mxu2 %v1302_v23  ;;  %v2058_v23 = vrot.slane %v2057_v8, 4  ;;  %v1303_v46 = vpack.c.b16 %v1280_v20, %v1279_v18  ;;  %v1203_v8 = vrot.slane %v5456_v7, 5  ;;  %v2275_v18 = vunpack.c.l.b16 %v2073_v31  ;;  %v4907_v31 = vld [vmem:[%s5556_s24 + $0x84] sm:$0xf]  ;;  %v5304_v7 = vld [vmem:[%s5556_s24 + $0x6c] sm:$0xff] }
  0xdf   : > { %v2063_v49 = vsel %vm5571_vm2, %v2058_v23, %v2062_v60  ;;  %v1202_v60 = vrot.slane %v1200_v48, 4  ;;  %v2094_v23 = vshll.u32 %v4906_v11, 16 }
  0xe0   : > { %v6107_v14 = vpop.f32.mrf.mxu2  ;;  %v6110_v3 = vpop.f32.mrf.mxu1  ;;  %v2274_v59 = vunpack.c.l.b16 %v2063_v49 }
  0xe1   : > { %v1204_v36 = vsel %vm5871_vm5, %v1202_v60, %v1203_v8 }
  0xe2   : > { %1732 = vmatmul.bf16.gmra.mxu3 %v5342_v54  ;;  %v1093_v54 = vld [vmem:[%s5556_s24 + $0x6c] sm:$0xe]  ;;  %v2298_v37 = vpack.c.b16 %v2275_v18, %v2274_v59  ;;  %v1282_v49 = vunpack.c.l.b16 %v1204_v36 }
  0xe3   : > { %v6116_v10 = vpop.f32.mrf.mxu0  ;;  %v4710_v5 = vrot.slane %v1093_v54, 9  ;;  %v2092_v54 = vrot.slane %v2091_v21, 4 }
  0xe5   : > { %v6119_v15 = vpop.f32.mrf.mxu3  ;;  %v1201_v34 = vsel %vm5871_vm5, %v4710_v5, %v1200_v48  ;;  %v2096_v48 = vrot.slane %v2094_v23, 5 }
  0xe6   : > { %2413 = vmatmul.bf16.gmra.mxu0 %v2297_v1 }
  0xe7   : > { %v2097_v11 = vsel %vm5571_vm2, %v2092_v54, %v2096_v48 }
  0xe8   : > { %v6122_v38 = vpop.f32.mrf.mxu2  ;;  %v1004_v35 = vpop.f32.mrf.mxu1 }
  0xe9   : > { %v1005_v19 = vadd.f32 %v1004_v35, %v5984_v4  ;;  %v2081_v4 = vor.u32 %v2080_v61, %v2077_v55  ;;  %v1281_v35 = vunpack.c.l.b16 %v1201_v34  ;;  %v4908_v61 = vld [vmem:[%s5556_s24 + $0x88] sm:$0xf] }
  0xea   : > { %v2112_v21 = vshrl.u32 %v4908_v61, 16 }
  0xeb   : > { %v6129_v12 = vpop.f32.mrf.mxu0  ;;  %1043 = vmatmul.bf16.gmra.mxu1 %v5303_v27  ;;  %v1304_v8 = vpack.c.b16 %v1282_v49, %v1281_v35 }
  0xec   : > { %v2114_v54 = vrot.slane %v2112_v21, 4 }
  0xed   : > { %v6134_v1 = vpop.f32.mrf.mxu3  ;;  %1423 = vmatmul.bf16.gmra.mxu2 %v1303_v46  ;;  %v2082_v46 = vrot.slane %v2081_v4, 4  ;;  %v2102_v4 = vshll.u32 %v4907_v31, 16 }
  0xef   : > { %v2087_v5 = vsel %vm5571_vm2, %v2082_v46, %v2086_v62  ;;  %v2104_v35 = vrot.slane %v2102_v4, 5 }
  0xf0   : > { %v1384_v20 = vpop.f32.mrf.mxu2  ;;  %v1006_v27 = vpop.f32.mrf.mxu1 }
  0xf1   : > { %v1464_v29 = vadd.f32 %v1384_v20, %v1005_v19  ;;  %v1007_v44 = vadd.f32 %v1006_v27, %v6003_v26  ;;  %v5401_v26 = vld [vmem:[%s6954_s1 + $0x1d0] sm:$0xff]  ;;  %v2108_v20 = vshll.u32 %v4908_v61, 16 }
  0xf2   : > { %1737 = vmatmul.bf16.gmra.mxu3 %v5343_v13  ;;  %v2099_v13 = vshrl.u32 %v4907_v31, 16  ;;  %v5409_v27 = vld [vmem:[%s6954_s1 + $0x210] sm:$0xff] }
  0xf3   : > { %v2379_v42 = vpop.f32.mrf.mxu0  ;;  %3795 = vmatpush.bf16.msra.mxu3 %v5401_v26  ;;  %v2110_v49 = vrot.slane %v2108_v20, 5  ;;  %4220 = vmatpush.bf16.msra.mxu0 %v5409_v27  ;;  %v4909_v26 = vld [vmem:[%s5556_s24 + $0x8c] sm:$0x1] }
  0xf4   : > { %v2101_v47 = vrot.slane %v2099_v13, 4  ;;  %v2118_v4 = vshll.u32 %v4909_v26, 16  ;;  %v5459_v26 = vld [vmem:[%s5556_s24 + $0x88] sm:$0xf] }
  0xf5   : > { %v1698_v19 = vpop.f32.mrf.mxu3 }
  0xf6   : > { %2418 = vmatmul.bf16.gmra.mxu0 %v2298_v37  ;;  %v1778_v55 = vadd.f32 %v1698_v19, %v1464_v29  ;;  %v5457_v29 = vld [vmem:[%s5556_s24 + $0x7c] sm:$0xf]  ;;  %v1094_v37 = vld [vmem:[%s5556_s24 + $0x78] sm:$0xe] }
  0xf7   : > { %v1207_v34 = vrot.slane %v5457_v29, 5  ;;  %v5344_v19 = vld [vmem:[%s5556_s24 + $0x78] sm:$0xff] }
  0xf8   : > { %v1386_v60 = vpop.f32.mrf.mxu2  ;;  %v6160_v59 = vadd.f32 %v2379_v42, %v1778_v55  ;;  %v1009_v23 = vpop.f32.mrf.mxu1  ;;  %v2276_v42 = vunpack.c.l.b16 %v2087_v5  ;;  %v5458_v55 = vld [vmem:[%s5556_s24 + $0x80] sm:$0x1] }
  0xf9   : > { %v1465_v18 = vadd.f32 %v1386_v60, %v1007_v44  ;;  %v1010_v36 = vadd.f32 %v1009_v23, %v6029_v57  ;;  %v2277_v44 = vunpack.c.l.b16 %v2097_v11  ;;  %v4711_v57 = vrot.slane %v1094_v37, 9 }
  0xfa   : > { %v1209_v31 = vrot.slane %v1207_v34, 4  ;;  %v1210_v61 = vrot.slane %v5458_v55, 5  ;;  %v2105_v23 = vor.u32 %v2104_v35, %v2101_v47  ;;  %v5305_v47 = vld [vmem:[%s5556_s24 + $0x78] sm:$0xff]  ;;  %v4911_v35 = vld [vmem:[%s5556_s24 + $0x94] sm:$0xf] }
  0xfb   : > { %v2381_v62 = vpop.f32.mrf.mxu0  ;;  %1048 = vmatmul.bf16.gmra.mxu1 %v5304_v7  ;;  %v2299_v60 = vpack.c.b16 %v2277_v44, %v2276_v42  ;;  %v1208_v11 = vsel %vm5871_vm5, %v4711_v57, %v1207_v34  ;;  %v2120_v44 = vrot.slane %v2118_v4, 5  ;;  %v4910_v34 = vld [vmem:[%s5556_s24 + $0x90] sm:$0xf] }
  0xfc   : > { %v1211_v13 = vsel %vm5871_vm5, %v1209_v31, %v1210_v61  ;;  %v2106_v27 = vrot.slane %v2105_v23, 4  ;;  %v2123_v57 = vshrl.u32 %v4910_v34, 16  ;;  %v1095_v23 = vld [vmem:[%s5556_s24 + $0x84] sm:$0xe] }
  0xfd   : > { %v1700_v46 = vpop.f32.mrf.mxu3  ;;  %1428 = vmatmul.bf16.gmra.mxu2 %v1304_v8 }
  0xfe   : > { %v1779_v48 = vadd.f32 %v1700_v46, %v1465_v18  ;;  %v2115_v18 = vor.u32 %v2114_v54, %v2110_v49  ;;  %v2111_v55 = vsel %vm5571_vm2, %v2106_v27, %v2110_v49  ;;  %v2125_v49 = vrot.slane %v2123_v57, 4 }
 0x100   : > { %v1389_v53 = vpop.f32.mrf.mxu2  ;;  %v6171_v5 = vadd.f32 %v2381_v62, %v1779_v48  ;;  %v1011_v8 = vpop.f32.mrf.mxu1  ;;  %v1284_v62 = vunpack.c.l.b16 %v1211_v13  ;;  %v2116_v42 = vrot.slane %v2115_v18, 4  ;;  %v2278_v18 = vunpack.c.l.b16 %v2111_v55 }
 0x101   : > { %v1466_v7 = vadd.f32 %v1389_v53, %v1010_v36  ;;  %v1012_v21 = vadd.f32 %v1011_v8, %v6046_v24  ;;  %v1283_v36 = vunpack.c.l.b16 %v1208_v11  ;;  %v2126_v24 = vshll.u32 %v4910_v34, 16  ;;  %v4912_v34 = vld [vmem:[%s5556_s24 + $0x98] sm:$0x1] }
 0x102   : > { %1742 = vmatmul.bf16.gmra.mxu3 %v5344_v19  ;;  %v2121_v61 = vsel %vm5571_vm2, %v2116_v42, %v2120_v44  ;;  %v1214_v53 = vrot.slane %v5459_v26, 5  ;;  %v2132_v8 = vshll.u32 %v4911_v35, 16  ;;  %v2136_v11 = vshrl.u32 %v4911_v35, 16 }
 0x103   : > { %v2384_v20 = vpop.f32.mrf.mxu0  ;;  %v1305_v19 = vpack.c.b16 %v1284_v62, %v1283_v36  ;;  %v2279_v4 = vunpack.c.l.b16 %v2121_v61  ;;  %v4712_v36 = vrot.slane %v1095_v23, 9  ;;  %v2142_v26 = vshll.u32 %v4912_v34, 16 }
 0x104   : > { %v1216_v62 = vrot.slane %v1214_v53, 4  ;;  %v6192_v42 = vrot.slane %v2132_v8, 5 }
 0x105   : > { %v1703_v29 = vpop.f32.mrf.mxu3  ;;  %v2300_v35 = vpack.c.b16 %v2279_v4, %v2278_v18  ;;  %v5368_v4 = vld [vmem:[%s6954_s1 + $0x148] sm:$0xff] }
 0x106   : > { %2423 = vmatmul.bf16.gmra.mxu0 %v2299_v60  ;;  %v1780_v37 = vadd.f32 %v1703_v29, %v1466_v7  ;;  %v5345_v29 = vld [vmem:[%s5556_s24 + $0x84] sm:$0xff]  ;;  %2801 = vmatpush.bf16.msra.mxu1 %v5368_v4 }
 0x108   : > { %v1391_v46 = vpop.f32.mrf.mxu2  ;;  %v6181_v48 = vadd.f32 %v2384_v20, %v1780_v37  ;;  %v1014_v31 = vpop.f32.mrf.mxu1  ;;  %v2128_v20 = vrot.slane %v2126_v24, 5  ;;  %v5460_v37 = vld [vmem:[%s5556_s24 + $0x8c] sm:$0x1] }
 0x109   : > { %v1467_v54 = vadd.f32 %v1391_v46, %v1012_v21  ;;  %v1015_v7 = vadd.f32 %v1014_v31, %v6066_v52  ;;  %v1217_v27 = vrot.slane %v5460_v37, 5  ;;  %v2138_v52 = vrot.slane %v2136_v11, 4 }
 0x10a   : > { %v2129_v24 = vor.u32 %v2128_v20, %v2125_v49  ;;  %v2144_v20 = vrot.slane %v2142_v26, 5 }
 0x10b   : > { %v2386_v60 = vpop.f32.mrf.mxu0  ;;  %1053 = vmatmul.bf16.gmra.mxu1 %v5305_v47  ;;  %v1218_v57 = vsel %vm5871_vm5, %v1216_v62, %v1217_v27  ;;  %v2139_v61 = vor.u32 %v2138_v52, %v6192_v42  ;;  %v5306_v62 = vld [vmem:[%s5556_s24 + $0x84] sm:$0xff] }
 0x10c   : > { %v1286_v11 = vunpack.c.l.b16 %v1218_v57  ;;  %v2130_v18 = vrot.slane %v2129_v24, 4  ;;  %v1096_v57 = vld [vmem:[%s5556_s24 + $0x90] sm:$0xe] }
 0x10d   : > { %v1705_v13 = vpop.f32.mrf.mxu3  ;;  %1433 = vmatmul.bf16.gmra.mxu2 %v1305_v19  ;;  %v2140_v49 = vrot.slane %v2139_v61, 4 }
 0x10e   : > { %v1781_v21 = vadd.f32 %v1705_v13, %v1467_v54  ;;  %v1215_v54 = vsel %vm5871_vm5, %v4712_v36, %v1214_v53  ;;  %v4914_v53 = vld [vmem:[%s5556_s24 + $0xa0] sm:$0xf] }
 0x10f   : > { %v1285_v8 = vunpack.c.l.b16 %v1215_v54  ;;  %v2156_v37 = vshll.u32 %v4914_v53, 16  ;;  %v2160_v27 = vshrl.u32 %v4914_v53, 16  ;;  %v2135_v54 = vsel %vm5571_vm2, %v2130_v18, %v6192_v42  ;;  %v5462_v53 = vld [vmem:[%s5556_s24 + $0x98] sm:$0x1] }
 0x110   : > { %v1394_v44 = vpop.f32.mrf.mxu2  ;;  %v6195_v47 = vadd.f32 %v2386_v60, %v1781_v21  ;;  %v1016_v19 = vpop.f32.mrf.mxu1  ;;  %v5392_v60 = vld [vmem:[%s6954_s1 + $0x188] sm:$0xff]  ;;  %v2145_v26 = vsel %vm5571_vm2, %v2140_v49, %v2144_v20  ;;  %v4713_v42 = vrot.slane %v1096_v57, 9  ;;  %v2280_v4 = vunpack.c.l.b16 %v2135_v54 }
 0x111   : > { %v1468_v46 = vadd.f32 %v1394_v44, %v1015_v7  ;;  %v1017_v55 = vadd.f32 %v1016_v19, %v6090_v22  ;;  %v4913_v7 = vld [vmem:[%s5556_s24 + $0x9c] sm:$0xf]  ;;  %3115 = vmatpush.bf16.msra.mxu2 %v5392_v60  ;;  %v5400_v22 = vld [vmem:[%s6954_s1 + $0x1c8] sm:$0xff]  ;;  %v1306_v34 = vpack.c.b16 %v1286_v11, %v1285_v8  ;;  %v2281_v49 = vunpack.c.l.b16 %v2145_v26 }
 0x112   : > { %1747 = vmatmul.bf16.gmra.mxu3 %v5345_v29  ;;  %v2147_v21 = vshrl.u32 %v4913_v7, 16  ;;  %v2150_v29 = vshll.u32 %v4913_v7, 16  ;;  %v5408_v60 = vld [vmem:[%s6954_s1 + $0x208] sm:$0xff]  ;;  %v2158_v7 = vrot.slane %v2156_v37, 5 }
 0x113   : > { %v2389_v31 = vpop.f32.mrf.mxu0  ;;  %3796 = vmatpush.bf16.msra.mxu3 %v5400_v22  ;;  %4221 = vmatpush.bf16.msra.mxu0 %v5408_v60  ;;  %v5346_v22 = vld [vmem:[%s5556_s24 + $0x90] sm:$0xff] }
 0x115   : > { %v1708_v23 = vpop.f32.mrf.mxu3 }
 0x116   : > { %2428 = vmatmul.bf16.gmra.mxu0 %v2300_v35  ;;  %v1782_v13 = vadd.f32 %v1708_v23, %v1468_v46  ;;  %v5461_v46 = vld [vmem:[%s5556_s24 + $0x94] sm:$0xf]  ;;  %v2162_v23 = vrot.slane %v2160_v27, 4 }
 0x117   : > { %v1221_v35 = vrot.slane %v5461_v46, 5 }
 0x118   : > { %v1396_v36 = vpop.f32.mrf.mxu2  ;;  %v6215_v52 = vadd.f32 %v2389_v31, %v1782_v13  ;;  %v1019_v19 = vpop.f32.mrf.mxu1  ;;  %v2149_v31 = vrot.slane %v2147_v21, 4  ;;  %v1224_v13 = vrot.slane %v5462_v53, 5 }
 0x119   : > { %v1469_v44 = vadd.f32 %v1396_v36, %v1017_v55  ;;  %v1020_v61 = vadd.f32 %v1019_v19, %v6116_v10  ;;  %v2152_v55 = vrot.slane %v2150_v29, 5  ;;  %v1223_v11 = vrot.slane %v1221_v35, 4  ;;  %v4915_v10 = vld [vmem:[%s5556_s24 + $0xa4] sm:$0x1] }
 0x11a   : > { %v2163_v29 = vor.u32 %v2162_v23, %v2158_v7  ;;  %v2166_v36 = vshll.u32 %v4915_v10, 16  ;;  %v1222_v37 = vsel %vm5871_vm5, %v4713_v42, %v1221_v35  ;;  %v4916_v35 = vld [vmem:[%s5556_s24 + $0xa8] sm:$0xf] }
 0x11b   : > { %v2391_v24 = vpop.f32.mrf.mxu0  ;;  %1058 = vmatmul.bf16.gmra.mxu1 %v5306_v62  ;;  %v2153_v20 = vor.u32 %v2152_v55, %v2149_v31  ;;  %v1225_v27 = vsel %vm5871_vm5, %v1223_v11, %v1224_v13  ;;  %v1287_v26 = vunpack.c.l.b16 %v1222_v37  ;;  %v5307_v11 = vld [vmem:[%s5556_s24 + $0x90] sm:$0xff]  ;;  %v2171_v13 = vshrl.u32 %v4916_v35, 16 }
 0x11c   : > { %v1288_v31 = vunpack.c.l.b16 %v1225_v27  ;;  %v2168_v55 = vrot.slane %v2166_v36, 5 }
 0x11d   : > { %v1710_v8 = vpop.f32.mrf.mxu3  ;;  %1438 = vmatmul.bf16.gmra.mxu2 %v1306_v34  ;;  %v2154_v57 = vrot.slane %v2153_v20, 4 }
 0x11e   : > { %v1783_v18 = vadd.f32 %v1710_v8, %v1469_v44  ;;  %v2301_v44 = vpack.c.b16 %v2281_v49, %v2280_v4  ;;  %v4917_v8 = vld [vmem:[%s5556_s24 + $0xac] sm:$0xf]  ;;  %v1307_v53 = vpack.c.b16 %v1288_v31, %v1287_v26  ;;  %v5347_v26 = vld [vmem:[%s5556_s24 + $0x9c] sm:$0xff] }
 0x11f   : > { %v2180_v4 = vshll.u32 %v4917_v8, 16  ;;  %v2184_v49 = vshrl.u32 %v4917_v8, 16 }
 0x120   : > { %v1399_v21 = vpop.f32.mrf.mxu2  ;;  %v6235_v34 = vadd.f32 %v2391_v24, %v1783_v18  ;;  %v1021_v46 = vpop.f32.mrf.mxu1  ;;  %v2159_v24 = vsel %vm5571_vm2, %v2154_v57, %v2158_v7  ;;  %v1097_v7 = vld [vmem:[%s5556_s24 + $0x9c] sm:$0xe] }
 0x121   : > { %v1470_v62 = vadd.f32 %v1399_v21, %v1020_v61  ;;  %v1022_v54 = vadd.f32 %v1021_v46, %v6129_v12  ;;  %v2164_v61 = vrot.slane %v2163_v29, 4  ;;  %v5463_v21 = vld [vmem:[%s5556_s24 + $0xa0] sm:$0xf]  ;;  %v4714_v31 = vrot.slane %v1097_v7, 9  ;;  %v4919_v7 = vld [vmem:[%s5556_s24 + $0xb4] sm:$0xf] }
 0x122   : > { %1752 = vmatmul.bf16.gmra.mxu3 %v5346_v22  ;;  %v2174_v22 = vshll.u32 %v4916_v35, 16  ;;  %v1228_v29 = vrot.slane %v5463_v21, 5 }
 0x123   : > { %v2394_v19 = vpop.f32.mrf.mxu0  ;;  %v2169_v12 = vsel %vm5571_vm2, %v2164_v61, %v2168_v55  ;;  %v5464_v55 = vld [vmem:[%s5556_s24 + $0xa4] sm:$0x1] }
 0x124   : > { %v2283_v37 = vunpack.c.l.b16 %v2169_v12  ;;  %v2176_v46 = vrot.slane %v2174_v22, 5  ;;  %v1230_v61 = vrot.slane %v1228_v29, 4 }
 0x125   : > { %v1713_v60 = vpop.f32.mrf.mxu3 }
 0x126   : > { %2433 = vmatmul.bf16.gmra.mxu0 %v2301_v44  ;;  %v1784_v23 = vadd.f32 %v1713_v60, %v1470_v62  ;;  %v2282_v62 = vunpack.c.l.b16 %v2159_v24  ;;  %v2173_v44 = vrot.slane %v2171_v13, 4  ;;  %v1231_v60 = vrot.slane %v5464_v55, 5 }
 0x127   : > { %v1229_v13 = vsel %vm5871_vm5, %v4714_v31, %v1228_v29  ;;  %v4920_v31 = vld [vmem:[%s5556_s24 + $0xb8] sm:$0xf]  ;;  %v2198_v55 = vshll.u32 %v4919_v7, 16 }
 0x128   : > { %v1401_v42 = vpop.f32.mrf.mxu2  ;;  %v6245_v10 = vadd.f32 %v2394_v19, %v1784_v23  ;;  %v1024_v20 = vpop.f32.mrf.mxu1  ;;  %v2182_v19 = vrot.slane %v2180_v4, 5  ;;  %v4918_v23 = vld [vmem:[%s5556_s24 + $0xb0] sm:$0x1]  ;;  %v1289_v21 = vunpack.c.l.b16 %v1229_v13  ;;  %v1098_v13 = vld [vmem:[%s5556_s24 + $0xa8] sm:$0xe] }
 0x129   : > { %v1471_v18 = vadd.f32 %v1401_v42, %v1022_v54  ;;  %v2186_v54 = vrot.slane %v2184_v49, 4  ;;  %v1025_v35 = vadd.f32 %v1024_v20, %v5979_v56  ;;  %v2302_v42 = vpack.c.b16 %v2283_v37, %v2282_v62  ;;  %v5391_v56 = vld [vmem:[%s6954_s1 + $0x180] sm:$0xff] }
 0x12a   : > { %v2190_v4 = vshll.u32 %v4918_v23, 16  ;;  %3116 = vmatpush.bf16.msra.mxu2 %v5391_v56  ;;  %v2200_v56 = vrot.slane %v2198_v55, 5 }
 0x12b   : > { %v2396_v36 = vpop.f32.mrf.mxu0  ;;  %1063 = vmatmul.bf16.gmra.mxu1 %v5307_v11  ;;  %v2177_v11 = vor.u32 %v2176_v46, %v2173_v44  ;;  %v2187_v22 = vor.u32 %v2186_v54, %v2182_v19  ;;  %v5399_v44 = vld [vmem:[%s6954_s1 + $0x1c0] sm:$0xff] }
 0x12c   : > { %v5367_v46 = vld [vmem:[%s6954_s1 + $0x140] sm:$0xff]  ;;  %3797 = vmatpush.bf16.msra.mxu3 %v5399_v44 }
 0x12d   : > { %v1715_v27 = vpop.f32.mrf.mxu3  ;;  %1443 = vmatmul.bf16.gmra.mxu2 %v1307_v53  ;;  %v2178_v29 = vrot.slane %v2177_v11, 4  ;;  %v2188_v37 = vrot.slane %v2187_v22, 4  ;;  %2802 = vmatpush.bf16.msra.mxu1 %v5367_v46  ;;  %v2208_v22 = vshrl.u32 %v4920_v31, 16 }
 0x12e   : > { %v1785_v57 = vadd.f32 %v1715_v27, %v1471_v18  ;;  %v1232_v18 = vsel %vm5871_vm5, %v1230_v61, %v1231_v60  ;;  %v2192_v27 = vrot.slane %v2190_v4, 5  ;;  %v2195_v61 = vshrl.u32 %v4919_v7, 16  ;;  %v5407_v4 = vld [vmem:[%s6954_s1 + $0x200] sm:$0xff]  ;;  %v5348_v7 = vld [vmem:[%s5556_s24 + $0xa8] sm:$0xff] }
 0x12f   : > { %4222 = vmatpush.bf16.msra.mxu0 %v5407_v4  ;;  %v4922_v4 = vld [vmem:[%s5556_s24 + $0xc0] sm:$0xf] }
 0x130   : > { %v1404_v8 = vpop.f32.mrf.mxu2  ;;  %v6253_v12 = vadd.f32 %v2396_v36, %v1785_v57  ;;  %v1026_v53 = vpop.f32.mrf.mxu1  ;;  %v1290_v36 = vunpack.c.l.b16 %v1232_v18  ;;  %v2204_v18 = vshll.u32 %v4920_v31, 16 }
 0x131   : > { %v1472_v24 = vadd.f32 %v1404_v8, %v1025_v35  ;;  %v1027_v54 = vadd.f32 %v1026_v53, %v5994_v16  ;;  %v5465_v16 = vld [vmem:[%s5556_s24 + $0xac] sm:$0xf] }
 0x132   : > { %1757 = vmatmul.bf16.gmra.mxu3 %v5347_v26  ;;  %v5308_v26 = vld [vmem:[%s5556_s24 + $0x9c] sm:$0xff]  ;;  %v1308_v23 = vpack.c.b16 %v1290_v36, %v1289_v21  ;;  %v1235_v11 = vrot.slane %v5465_v16, 5  ;;  %v2206_v46 = vrot.slane %v2204_v18, 5 }
 0x133   : > { %v2399_v49 = vpop.f32.mrf.mxu0 }
 0x135   : > { %v1718_v20 = vpop.f32.mrf.mxu3 }
 0x136   : > { %2438 = vmatmul.bf16.gmra.mxu0 %v2302_v42  ;;  %v1786_v62 = vadd.f32 %v1718_v20, %v1472_v24  ;;  %v2183_v42 = vsel %vm5571_vm2, %v2178_v29, %v2182_v19  ;;  %v2193_v24 = vsel %vm5571_vm2, %v2188_v37, %v2192_v27  ;;  %v1237_v29 = vrot.slane %v1235_v11, 4  ;;  %v5466_v37 = vld [vmem:[%s5556_s24 + $0xb0] sm:$0x1] }
 0x137   : > { %v2284_v20 = vunpack.c.l.b16 %v2183_v42  ;;  %v2285_v21 = vunpack.c.l.b16 %v2193_v24  ;;  %v1238_v27 = vrot.slane %v5466_v37, 5  ;;  %v2219_v37 = vshrl.u32 %v4922_v4, 16 }
 0x138   : > { %v1406_v57 = vpop.f32.mrf.mxu2  ;;  %v6272_v60 = vadd.f32 %v2399_v49, %v1786_v62  ;;  %v1029_v8 = vpop.f32.mrf.mxu1  ;;  %v2197_v49 = vrot.slane %v2195_v61, 4  ;;  %v4715_v62 = vrot.slane %v1098_v13, 9 }
 0x139   : > { %v1473_v35 = vadd.f32 %v1406_v57, %v1027_v54  ;;  %v1030_v44 = vadd.f32 %v1029_v8, %v6018_v45  ;;  %v2210_v54 = vrot.slane %v2208_v22, 4  ;;  %v1239_v45 = vsel %vm5871_vm5, %v1237_v29, %v1238_v27 }
 0x13a   : > { %v2201_v31 = vor.u32 %v2200_v56, %v2197_v49  ;;  %v1236_v42 = vsel %vm5871_vm5, %v4715_v62, %v1235_v11  ;;  %v4923_v56 = vld [vmem:[%s5556_s24 + $0xc4] sm:$0xf]  ;;  %v5309_v62 = vld [vmem:[%s5556_s24 + $0xa8] sm:$0xff]  ;;  %v2222_v27 = vshll.u32 %v4922_v4, 16 }
 0x13b   : > { %v2401_v53 = vpop.f32.mrf.mxu0  ;;  %1068 = vmatmul.bf16.gmra.mxu1 %v5308_v26  ;;  %v4921_v26 = vld [vmem:[%s5556_s24 + $0xbc] sm:$0x1]  ;;  %v2211_v24 = vor.u32 %v2210_v54, %v2206_v46  ;;  %v1291_v22 = vunpack.c.l.b16 %v1236_v42 }
 0x13c   : > { %v2214_v16 = vshll.u32 %v4921_v26, 16  ;;  %v2202_v13 = vrot.slane %v2201_v31, 4  ;;  %v2228_v26 = vshll.u32 %v4923_v56, 16  ;;  %v2232_v31 = vshrl.u32 %v4923_v56, 16 }
 0x13d   : > { %v1720_v19 = vpop.f32.mrf.mxu3  ;;  %1448 = vmatmul.bf16.gmra.mxu2 %v1308_v23 }
 0x13e   : > { %v1787_v36 = vadd.f32 %v1720_v19, %v1473_v35  ;;  %v2303_v35 = vpack.c.b16 %v2285_v21, %v2284_v20  ;;  %v5467_v19 = vld [vmem:[%s5556_s24 + $0x10] sm:$0xf]  ;;  %v2212_v21 = vrot.slane %v2211_v24, 4  ;;  %v2207_v29 = vsel %vm5571_vm2, %v2202_v13, %v2206_v46 }
 0x13f   : > { %v2557_v20 = vrot.slane %v5467_v19, 5  ;;  %v2221_v13 = vrot.slane %v2219_v37, 4  ;;  %v2234_v56 = vrot.slane %v2232_v31, 4 }
 0x140   : > { %v1409_v57 = vpop.f32.mrf.mxu2  ;;  %v6287_v55 = vadd.f32 %v2401_v53, %v1787_v36  ;;  %v1031_v23 = vpop.f32.mrf.mxu1  ;;  %v1292_v53 = vunpack.c.l.b16 %v1239_v45  ;;  %v2216_v36 = vrot.slane %v2214_v16, 5  ;;  %v5469_v45 = vld [vmem:[%s5556_s24 + $0x14] sm:$0x1] }
 0x141   : > { %v1474_v61 = vadd.f32 %v1409_v57, %v1030_v44  ;;  %v1032_v11 = vadd.f32 %v1031_v23, %v6038_v9  ;;  %v5468_v9 = vld [vmem:[%s5556_s24 + $0xb8] sm:$0xf]  ;;  %v2559_v42 = vrot.slane %v2557_v20, 4  ;;  %v2560_v24 = vrot.slane %v5469_v45, 5 }
 0x142   : > { %6961 = vst [vmem:[#allocation2_spill] sm:$0xff] %v6287_v55  ;;  %1762 = vmatmul.bf16.gmra.mxu3 %v5348_v7  ;;  %v1309_v57 = vpack.c.b16 %v1292_v53, %v1291_v22  ;;  %v1242_v23 = vrot.slane %v5468_v9, 5  ;;  %v2217_v46 = vsel %vm5571_vm2, %v2212_v21, %v2216_v36  ;;  %v4957_v22 = vld [vmem:[%s5556_s24 + $0xc] sm:$0xe]  ;;  %v4924_v21 = vld [vmem:[%s5556_s24 + $0xc8] sm:$0x1] }
 0x143   : > { %v2404_v8 = vpop.f32.mrf.mxu0  ;;  %v4973_v19 = vrot.slane %v4957_v22, 9  ;;  %v2287_v9 = vunpack.c.l.b16 %v2217_v46 }
 0x144   : > { %v1244_v45 = vrot.slane %v1242_v23, 4 }
 0x145   : > { %v1723_v18 = vpop.f32.mrf.mxu3 }
 0x146   : > { %2443 = vmatmul.bf16.gmra.mxu0 %v2303_v35  ;;  %v1788_v49 = vadd.f32 %v1723_v18, %v1474_v61  ;;  %v1099_v35 = vld [vmem:[%s5556_s24 + $0xb4] sm:$0xe]  ;;  %v2224_v18 = vrot.slane %v2222_v27, 5 }
 0x147   : > { %v4716_v4 = vrot.slane %v1099_v35, 9  ;;  %v2238_v35 = vshll.u32 %v4924_v21, 16  ;;  %v5310_v21 = vld [vmem:[%s5556_s24 + $0xb4] sm:$0xff] }
 0x148   : > { %v1411_v7 = vpop.f32.mrf.mxu2  ;;  %v6300_v44 = vadd.f32 %v2404_v8, %v1788_v49  ;;  %v1034_v61 = vpop.f32.mrf.mxu1  ;;  %v2286_v8 = vunpack.c.l.b16 %v2207_v29  ;;  %v2230_v49 = vrot.slane %v2228_v26, 5  ;;  %v2561_v29 = vsel %vm5871_vm5, %v2559_v42, %v2560_v24  ;;  %v5149_v42 = vld [vmem:[%s5556_s24 + $0x18] sm:$0xf] }
 0x149   : > { %v1475_v54 = vadd.f32 %v1411_v7, %v1032_v11  ;;  %v5349_v7 = vld [vmem:[%s5556_s24 + $0xb4] sm:$0xff]  ;;  %v1035_v36 = vadd.f32 %v1034_v61, %v6055_v33  ;;  %v2225_v27 = vor.u32 %v2224_v18, %v2221_v13  ;;  %v1243_v31 = vsel %vm5871_vm5, %v4716_v4, %v1242_v23  ;;  %v6326_v18 = vld [vmem:[%s5556_s24 + $0x1c] sm:$0xf] }
 0x14a   : > { %6962 = vst [vmem:[#allocation3_spill] sm:$0xff] %v6300_v44  ;;  %v5470_v44 = vld [vmem:[%s5556_s24 + $0xbc] sm:$0x1]  ;;  %v2304_v33 = vpack.c.b16 %v2287_v9, %v2286_v8  ;;  %v1293_v22 = vunpack.c.l.b16 %v1243_v31  ;;  %v3279_v8 = vshrl.u32 %v5149_v42, 16  ;;  %v3282_v9 = vshll.u32 %v5149_v42, 16 }
 0x14b   : > { %v2406_v16 = vpop.f32.mrf.mxu0  ;;  %1073 = vmatmul.bf16.gmra.mxu1 %v5309_v62  ;;  %v1245_v55 = vrot.slane %v5470_v44, 5  ;;  %v2558_v62 = vsel %vm5871_vm5, %v4973_v19, %v2557_v20  ;;  %v2235_v44 = vor.u32 %v2234_v56, %v2230_v49  ;;  %v2240_v19 = vrot.slane %v2238_v35, 5  ;;  %v5151_v35 = vld [vmem:[%s5556_s24 + $0x20] sm:$0x1] }
 0x14d   : > { %v1725_v53 = vpop.f32.mrf.mxu3  ;;  %1453 = vmatmul.bf16.gmra.mxu2 %v1309_v57  ;;  %v2683_v57 = vunpack.c.l.b16 %v2558_v62  ;;  %v1246_v20 = vsel %vm5871_vm5, %v1244_v45, %v1245_v55  ;;  %v2236_v56 = vrot.slane %v2235_v44, 4  ;;  %v3288_v55 = vshll.u32 %v6326_v18, 16 }
 0x14e   : > { %v1789_v11 = vadd.f32 %v1725_v53, %v1475_v54  ;;  %v2684_v54 = vunpack.c.l.b16 %v2561_v29  ;;  %v2226_v53 = vrot.slane %v2225_v27, 4  ;;  %v1294_v4 = vunpack.c.l.b16 %v1246_v20 }
 0x14f   : > { %v2241_v27 = vsel %vm5571_vm2, %v2236_v56, %v2240_v19  ;;  %v3290_v31 = vrot.slane %v3288_v55, 5  ;;  %v5152_v56 = vld [vmem:[%s5556_s24 + $0x24] sm:$0xf] }
 0x150   : > { %v1414_v37 = vpop.f32.mrf.mxu2  ;;  %v1036_v61 = vpop.f32.mrf.mxu1  ;;  %v6320_v46 = vpack.c.b16 %v2684_v54, %v2683_v57  ;;  %v6323_v24 = vadd.f32 %v2406_v16, %v1789_v11  ;;  %v3292_v16 = vshrl.u32 %v6326_v18, 16  ;;  %v1310_v29 = vpack.c.b16 %v1294_v4, %v1293_v22 }
 0x151   : > { %v1476_v26 = vadd.f32 %v1414_v37, %v1035_v36  ;;  %v1037_v11 = vadd.f32 %v1036_v61, %v6070_v0  ;;  %v2231_v37 = vsel %vm5571_vm2, %v2226_v53, %v2230_v49  ;;  %v3281_v54 = vrot.slane %v3279_v8, 4 }
 0x152   : > { %1767 = vmatmul.bf16.gmra.mxu3 %v5349_v7  ;;  %v3294_v44 = vrot.slane %v3292_v16, 4  ;;  %v2288_v61 = vunpack.c.l.b16 %v2231_v37  ;;  %v2289_v20 = vunpack.c.l.b16 %v2241_v27  ;;  %v3298_v53 = vshll.u32 %v5151_v35, 16 }
 0x153   : > { %v2409_v13 = vpop.f32.mrf.mxu0  ;;  %v3303_v37 = vshrl.u32 %v5152_v56, 16  ;;  %v3306_v27 = vshll.u32 %v5152_v56, 16  ;;  %v5471_v56 = vld [vmem:[%s5556_s24 + $0x1c] sm:$0xf] }
 0x154   : > { %v3295_v22 = vor.u32 %v3294_v44, %v3290_v31  ;;  %v2305_v19 = vpack.c.b16 %v2289_v20, %v2288_v61  ;;  %v3980_v20 = vrot.slane %v5151_v35, 5 }
 0x155   : > { %v1728_v23 = vpop.f32.mrf.mxu3 }
 0x156   : > { %2448 = vmatmul.bf16.gmra.mxu0 %v2304_v33  ;;  %v1790_v7 = vadd.f32 %v1728_v23, %v1476_v26  ;;  %v3284_v26 = vrot.slane %v3282_v9, 5  ;;  %v3296_v16 = vrot.slane %v3295_v22, 4 }
 0x158   : > { %v1416_v45 = vpop.f32.mrf.mxu2  ;;  %v6332_v36 = vadd.f32 %v2409_v13, %v1790_v7  ;;  %v1039_v57 = vpop.f32.mrf.mxu1  ;;  %v5350_v13 = vld [vmem:[%s5556_s24 + $0xc0] sm:$0xff]  ;;  %v3285_v49 = vor.u32 %v3284_v26, %v3281_v54  ;;  %v6343_v7 = vld [vmem:[%s5556_s24 + $0x28] sm:$0xf] }
 0x159   : > { %v1477_v62 = vadd.f32 %v1416_v45, %v1037_v11  ;;  %v1040_v23 = vadd.f32 %v1039_v57, %v6092_v32  ;;  %v3300_v11 = vrot.slane %v3298_v53, 5  ;;  %v3312_v32 = vshll.u32 %v6343_v7, 16 }
 0x15a   : > { %v3286_v55 = vrot.slane %v3285_v49, 4  ;;  %v3316_v57 = vshrl.u32 %v6343_v7, 16  ;;  %v3308_v49 = vrot.slane %v3306_v27, 5 }
 0x15b   : > { %v2411_v0 = vpop.f32.mrf.mxu0  ;;  %1078 = vmatmul.bf16.gmra.mxu1 %v5310_v21  ;;  %v6356_v22 = vrot.slane %v3312_v32, 5 }
 0x15c   : > { %v3291_v44 = vsel %vm5571_vm2, %v3286_v55, %v3290_v31  ;;  %v3318_v53 = vrot.slane %v3316_v57, 4  ;;  %v5375_v31 = vld [vmem:[%s5556_s24 + $0x18] sm:$0xff] }
 0x15d   : > { %v1730_v33 = vpop.f32.mrf.mxu3  ;;  %1458 = vmatmul.bf16.gmra.mxu2 %v1310_v29  ;;  %v3977_v29 = vrot.slane %v6326_v18, 5 }
 0x15e   : > { %v1791_v42 = vadd.f32 %v1730_v33, %v1477_v62  ;;  %v5229_v62 = vld [vmem:[%s5556_s24 + $0x18] sm:$0xe] }
 0x15f   : > { %v5245_v33 = vrot.slane %v5229_v62, 9  ;;  %v3979_v61 = vrot.slane %v3977_v29, 4 }
 0x160   : > { %v1419_v4 = vpop.f32.mrf.mxu2  ;;  %v1041_v9 = vpop.f32.mrf.mxu1  ;;  %v6345_v45 = vadd.f32 %v2411_v0, %v1791_v42  ;;  %v3301_v0 = vsel %vm5571_vm2, %v3296_v16, %v3300_v11  ;;  %v3305_v42 = vrot.slane %v3303_v37, 4  ;;  %v4958_v16 = vld [vmem:[%s5556_s24 + $0x18] sm:$0xe]  ;;  %v3319_v37 = vor.u32 %v3318_v53, %v6356_v22 }
 0x161   : > { %v1478_v8 = vadd.f32 %v1419_v4, %v1040_v23  ;;  %v1042_v18 = vadd.f32 %v1041_v9, %v6110_v3  ;;  %v3678_v3 = vunpack.c.l.b16 %v3291_v44  ;;  %v3679_v9 = vunpack.c.l.b16 %v3301_v0 }
 0x162   : > { %1772 = vmatmul.bf16.gmra.mxu3 %v5350_v13  ;;  %v3978_v11 = vsel %vm5871_vm5, %v5245_v33, %v3977_v29  ;;  %v3981_v62 = vsel %vm5871_vm5, %v3979_v61, %v3980_v20  ;;  %v4974_v57 = vrot.slane %v4958_v16, 9  ;;  %v5155_v16 = vld [vmem:[%s5556_s24 + $0x30] sm:$0xf] }
 0x163   : > { %v2414_v21 = vpop.f32.mrf.mxu0  ;;  %v4103_v29 = vunpack.c.l.b16 %v3978_v11  ;;  %v4104_v33 = vunpack.c.l.b16 %v3981_v62  ;;  %v6385_v11 = vld [vmem:[%s5556_s24 + $0x34] sm:$0xf] }
 0x165   : > { %v1733_v54 = vpop.f32.mrf.mxu3 }
 0x166   : > { %2453 = vmatmul.bf16.gmra.mxu0 %v2305_v19  ;;  %v1792_v26 = vadd.f32 %v1733_v54, %v1478_v8  ;;  %v2564_v19 = vrot.slane %v5471_v56, 5  ;;  %v6363_v8 = vld [vmem:[%s5556_s24 + $0x2c] sm:$0x1]  ;;  %v5230_v56 = vld [vmem:[%s5556_s24 + $0x24] sm:$0xe] }
 0x167   : > { %v3322_v27 = vshll.u32 %v6363_v8, 16 }
 0x168   : > { %v1421_v13 = vpop.f32.mrf.mxu2  ;;  %v6358_v23 = vadd.f32 %v2414_v21, %v1792_v26  ;;  %v1044_v55 = vpop.f32.mrf.mxu1  ;;  %v3309_v21 = vor.u32 %v3308_v49, %v3305_v42  ;;  %v2566_v54 = vrot.slane %v2564_v19, 4  ;;  %v5472_v26 = vld [vmem:[%s5556_s24 + $0x20] sm:$0x1]  ;;  %v3320_v42 = vrot.slane %v3319_v37, 4 }
 0x169   : > { %v1479_v4 = vadd.f32 %v1421_v13, %v1042_v18  ;;  %v2567_v44 = vrot.slane %v5472_v26, 5  ;;  %v3710_v18 = vpack.c.b16 %v3679_v9, %v3678_v3  ;;  %v1045_v61 = vadd.f32 %v1044_v55, %v5989_v17 }
 0x16a   : > { %v3310_v20 = vrot.slane %v3309_v21, 4  ;;  %v3324_v13 = vrot.slane %v3322_v27, 5  ;;  %v2565_v53 = vsel %vm5871_vm5, %v4974_v57, %v2564_v19  ;;  %v4135_v3 = vpack.c.b16 %v4104_v33, %v4103_v29 }
 0x16b   : > { %v2416_v35 = vpop.f32.mrf.mxu0  ;;  %2803 = vmatmul.bf16.vlgmr.msra.gmra.mxu1 %v6320_v46  ;;  %v2685_v62 = vunpack.c.l.b16 %v2565_v53  ;;  %v5246_v37 = vrot.slane %v5230_v56, 9  ;;  %v3327_v57 = vshrl.u32 %v5155_v16, 16  ;;  %v3987_v26 = vrot.slane %v6363_v8, 5  ;;  %v4959_v53 = vld [vmem:[%s5556_s24 + $0x24] sm:$0xe] }
 0x16c   : > { %v3315_v19 = vsel %vm5571_vm2, %v3310_v20, %v6356_v22 }
 0x16d   : > { %v1735_v32 = vpop.f32.mrf.mxu3  ;;  %3117 = vmatmul.bf16.vlgmr.msra.gmra.mxu2 %v5375_v31  ;;  %v2568_v31 = vsel %vm5871_vm5, %v2566_v54, %v2567_v44  ;;  %v3336_v44 = vshll.u32 %v6385_v11, 16  ;;  %v3680_v33 = vunpack.c.l.b16 %v3315_v19  ;;  %v3329_v8 = vrot.slane %v3327_v57, 4 }
 0x16e   : > { %v1793_v0 = vadd.f32 %v1735_v32, %v1479_v4  ;;  %v3984_v4 = vrot.slane %v6343_v7, 5  ;;  %v2686_v21 = vunpack.c.l.b16 %v2568_v31  ;;  %v3325_v7 = vsel %vm5571_vm2, %v3320_v42, %v3324_v13  ;;  %v5376_v13 = vld [vmem:[%s5556_s24 + $0x24] sm:$0xff] }
 0x170   : > { %v1424_v46 = vpop.f32.mrf.mxu2  ;;  %v1046_v9 = vpop.f32.mrf.mxu1  ;;  %v6382_v17 = vadd.f32 %v2416_v35, %v1793_v0  ;;  %v3986_v32 = vrot.slane %v3984_v4, 4  ;;  %v3330_v35 = vshll.u32 %v5155_v16, 16  ;;  %v3340_v0 = vshrl.u32 %v6385_v11, 16 }
 0x171   : > { %v1480_v49 = vadd.f32 %v1424_v46, %v1045_v61  ;;  %v1047_v22 = vadd.f32 %v1046_v9, %v6013_v39  ;;  %v2716_v29 = vpack.c.b16 %v2686_v21, %v2685_v62  ;;  %v5473_v61 = vld [vmem:[%s5556_s24 + $0x28] sm:$0xf]  ;;  %v6405_v9 = vrot.slane %v3336_v44, 5 }
 0x172   : > { %3798 = vmatmul.bf16.vlgmr.msra.gmra.mxu3 %v3710_v18  ;;  %v2571_v46 = vrot.slane %v5473_v61, 5  ;;  %v3332_v31 = vrot.slane %v3330_v35, 5  ;;  %v3988_v39 = vsel %vm5871_vm5, %v3986_v32, %v3987_v26  ;;  %v3342_v16 = vrot.slane %v3340_v0, 4  ;;  %v5158_v61 = vld [vmem:[%s5556_s24 + $0x3c] sm:$0xf] }
 0x173   : > { %v2419_v55 = vpop.f32.mrf.mxu0  ;;  %v4975_v21 = vrot.slane %v4959_v53, 9 }
 0x174   : > { %v2573_v19 = vrot.slane %v2571_v46, 4  ;;  %v3343_v26 = vor.u32 %v3342_v16, %v6405_v9  ;;  %v5231_v16 = vld [vmem:[%s5556_s24 + $0x30] sm:$0xe] }
 0x175   : > { %v1738_v27 = vpop.f32.mrf.mxu3 }
 0x176   : > { %4223 = vmatmul.bf16.vlgmr.msra.gmra.mxu0 %v4135_v3  ;;  %v1794_v54 = vadd.f32 %v1738_v27, %v1480_v49  ;;  %v3681_v49 = vunpack.c.l.b16 %v3325_v7  ;;  %v3985_v3 = vsel %vm5871_vm5, %v5246_v37, %v3984_v4  ;;  %v5474_v27 = vld [vmem:[%s5556_s24 + $0x2c] sm:$0x1]  ;;  %v4106_v4 = vunpack.c.l.b16 %v3988_v39 }
 0x177   : > { %v2574_v7 = vrot.slane %v5474_v27, 5  ;;  %v4105_v35 = vunpack.c.l.b16 %v3985_v3  ;;  %v3333_v37 = vor.u32 %v3332_v31, %v3329_v8 }
 0x178   : > { %v1426_v18 = vpop.f32.mrf.mxu2  ;;  %v6397_v20 = vadd.f32 %v2419_v55, %v1794_v54  ;;  %v1049_v56 = vpop.f32.mrf.mxu1  ;;  %v6408_v55 = vld [vmem:[%s5556_s24 + $0x38] sm:$0x1]  ;;  %v3711_v32 = vpack.c.b16 %v3681_v49, %v3680_v33  ;;  %v3344_v49 = vrot.slane %v3343_v26, 4 }
 0x179   : > { %v1481_v42 = vadd.f32 %v1426_v18, %v1047_v22  ;;  %v3346_v44 = vshll.u32 %v6408_v55, 16  ;;  %v1050_v0 = vadd.f32 %v1049_v56, %v6033_v2  ;;  %v2572_v18 = vsel %vm5871_vm5, %v4975_v21, %v2571_v46 }
 0x17a   : > { %v3334_v8 = vrot.slane %v3333_v37, 4  ;;  %v3991_v2 = vrot.slane %v6385_v11, 5  ;;  %v2687_v46 = vunpack.c.l.b16 %v2572_v18  ;;  %v3351_v21 = vshrl.u32 %v5158_v61, 16 }
 0x17b   : > { %v2421_v62 = vpop.f32.mrf.mxu0  ;;  %2808 = vmatmul.bf16.gmra.mxu1 %v2716_v29  ;;  %v2575_v29 = vsel %vm5871_vm5, %v2573_v19, %v2574_v7  ;;  %v3348_v31 = vrot.slane %v3346_v44, 5  ;;  %v3354_v19 = vshll.u32 %v5158_v61, 16  ;;  %v3994_v26 = vrot.slane %v6408_v55, 5 }
 0x17c   : > { %v2688_v39 = vunpack.c.l.b16 %v2575_v29  ;;  %v3993_v37 = vrot.slane %v3991_v2, 4  ;;  %v3353_v44 = vrot.slane %v3351_v21, 4 }
 0x17d   : > { %v1740_v57 = vpop.f32.mrf.mxu3  ;;  %3122 = vmatmul.bf16.gmra.mxu2 %v5376_v13  ;;  %v4136_v13 = vpack.c.b16 %v4106_v4, %v4105_v35  ;;  %v3339_v35 = vsel %vm5571_vm2, %v3334_v8, %v6405_v9  ;;  %v5247_v4 = vrot.slane %v5231_v16, 9 }
 0x17e   : > { %v1795_v54 = vadd.f32 %v1740_v57, %v1481_v42  ;;  %v6420_v42 = vld [vmem:[%s5556_s24 + $0x40] sm:$0xf]  ;;  %v3995_v16 = vsel %vm5871_vm5, %v3993_v37, %v3994_v26 }
 0x17f   : > { %v3360_v27 = vshll.u32 %v6420_v42, 16  ;;  %v3364_v7 = vshrl.u32 %v6420_v42, 16 }
 0x180   : > { %v1429_v22 = vpop.f32.mrf.mxu2  ;;  %v1051_v33 = vpop.f32.mrf.mxu1  ;;  %v6423_v56 = vadd.f32 %v2421_v62, %v1795_v54  ;;  %v3349_v62 = vsel %vm5571_vm2, %v3344_v49, %v3348_v31  ;;  %v6442_v49 = vld [vmem:[%s5556_s24 + $0x44] sm:$0x1] }
 0x181   : > { %v1482_v53 = vadd.f32 %v1429_v22, %v1050_v0  ;;  %v1052_v54 = vadd.f32 %v1051_v33, %v6048_v25  ;;  %v3356_v22 = vrot.slane %v3354_v19, 5  ;;  %v6435_v9 = vrot.slane %v3360_v27, 5 }
 0x182   : > { %3803 = vmatmul.bf16.gmra.mxu3 %v3711_v32  ;;  %v2717_v32 = vpack.c.b16 %v2688_v39, %v2687_v46  ;;  %v3366_v18 = vrot.slane %v3364_v7, 4  ;;  %v3682_v33 = vunpack.c.l.b16 %v3339_v35  ;;  %v3683_v31 = vunpack.c.l.b16 %v3349_v62  ;;  %v4960_v46 = vld [vmem:[%s5556_s24 + $0x30] sm:$0xe]  ;;  %v5476_v35 = vld [vmem:[%s5556_s24 + $0x38] sm:$0x1] }
 0x183   : > { %v2424_v3 = vpop.f32.mrf.mxu0  ;;  %v3992_v39 = vsel %vm5871_vm5, %v5247_v4, %v3991_v2  ;;  %v3370_v19 = vshll.u32 %v6442_v49, 16  ;;  %v4976_v7 = vrot.slane %v4960_v46, 9  ;;  %v4108_v4 = vunpack.c.l.b16 %v3995_v16  ;;  %v5161_v46 = vld [vmem:[%s5556_s24 + $0x48] sm:$0xf] }
 0x184   : > { %v3367_v21 = vor.u32 %v3366_v18, %v6435_v9  ;;  %v4107_v2 = vunpack.c.l.b16 %v3992_v39  ;;  %v6463_v39 = vld [vmem:[%s5556_s24 + $0x4c] sm:$0xf] }
 0x185   : > { %v1743_v57 = vpop.f32.mrf.mxu3 }
 0x186   : > { %4228 = vmatmul.bf16.gmra.mxu0 %v4136_v13  ;;  %v1796_v11 = vadd.f32 %v1743_v57, %v1482_v53  ;;  %v5377_v13 = vld [vmem:[%s5556_s24 + $0x30] sm:$0xff] }
 0x187   : > { %v5475_v53 = vld [vmem:[%s5556_s24 + $0x34] sm:$0xf] }
 0x188   : > { %v1431_v0 = vpop.f32.mrf.mxu2  ;;  %v6437_v29 = vadd.f32 %v2424_v3, %v1796_v11  ;;  %v2578_v8 = vrot.slane %v5475_v53, 5  ;;  %v1054_v25 = vpop.f32.mrf.mxu1  ;;  %v3357_v3 = vor.u32 %v3356_v22, %v3353_v44  ;;  %v2581_v11 = vrot.slane %v5476_v35, 5  ;;  %v5232_v53 = vld [vmem:[%s5556_s24 + $0x3c] sm:$0xe] }
 0x189   : > { %v1483_v61 = vadd.f32 %v1431_v0, %v1052_v54  ;;  %v3712_v54 = vpack.c.b16 %v3683_v31, %v3682_v33  ;;  %v1055_v37 = vadd.f32 %v1054_v25, %v6063_v58  ;;  %v3368_v44 = vrot.slane %v3367_v21, 4 }
 0x18a   : > { %v2580_v57 = vrot.slane %v2578_v8, 4  ;;  %v3358_v26 = vrot.slane %v3357_v3, 4  ;;  %v3372_v0 = vrot.slane %v3370_v19, 5  ;;  %v2579_v18 = vsel %vm5871_vm5, %v4976_v7, %v2578_v8 }
 0x18b   : > { %v2426_v55 = vpop.f32.mrf.mxu0  ;;  %2813 = vmatmul.bf16.gmra.mxu1 %v2717_v32  ;;  %v4137_v33 = vpack.c.b16 %v4108_v4, %v4107_v2  ;;  %v2689_v16 = vunpack.c.l.b16 %v2579_v18  ;;  %v5248_v21 = vrot.slane %v5232_v53, 9  ;;  %v3375_v7 = vshrl.u32 %v5161_v46, 16  ;;  %v4961_v18 = vld [vmem:[%s5556_s24 + $0x3c] sm:$0xe] }
 0x18c   : > { %v3363_v8 = vsel %vm5571_vm2, %v3358_v26, %v6435_v9  ;;  %v4001_v35 = vrot.slane %v6442_v49, 5 }
 0x18d   : > { %v1745_v27 = vpop.f32.mrf.mxu3  ;;  %3127 = vmatmul.bf16.gmra.mxu2 %v5377_v13  ;;  %v2582_v13 = vsel %vm5871_vm5, %v2580_v57, %v2581_v11  ;;  %v3384_v11 = vshll.u32 %v6463_v39, 16  ;;  %v3684_v4 = vunpack.c.l.b16 %v3363_v8  ;;  %v3377_v49 = vrot.slane %v3375_v7, 4 }
 0x18e   : > { %v1797_v62 = vadd.f32 %v1745_v27, %v1483_v61  ;;  %v3998_v61 = vrot.slane %v6420_v42, 5  ;;  %v2690_v3 = vunpack.c.l.b16 %v2582_v13  ;;  %v3373_v42 = vsel %vm5571_vm2, %v3368_v44, %v3372_v0  ;;  %v5378_v0 = vld [vmem:[%s5556_s24 + $0x3c] sm:$0xff] }
 0x190   : > { %v1434_v32 = vpop.f32.mrf.mxu2  ;;  %v1056_v31 = vpop.f32.mrf.mxu1  ;;  %v6460_v58 = vadd.f32 %v2426_v55, %v1797_v62  ;;  %v4000_v27 = vrot.slane %v3998_v61, 4  ;;  %v3378_v55 = vshll.u32 %v5161_v46, 16  ;;  %v3388_v62 = vshrl.u32 %v6463_v39, 16 }
 0x191   : > { %v1484_v22 = vadd.f32 %v1434_v32, %v1055_v37  ;;  %v1057_v9 = vadd.f32 %v1056_v31, %v6086_v51  ;;  %v2718_v2 = vpack.c.b16 %v2690_v3, %v2689_v16  ;;  %v5477_v37 = vld [vmem:[%s5556_s24 + $0x40] sm:$0xf]  ;;  %v6483_v31 = vrot.slane %v3384_v11, 5 }
 0x192   : > { %3808 = vmatmul.bf16.gmra.mxu3 %v3712_v54  ;;  %v2585_v32 = vrot.slane %v5477_v37, 5  ;;  %v3380_v13 = vrot.slane %v3378_v55, 5  ;;  %v4002_v51 = vsel %vm5871_vm5, %v4000_v27, %v4001_v35  ;;  %v3390_v46 = vrot.slane %v3388_v62, 4  ;;  %v5164_v37 = vld [vmem:[%s5556_s24 + $0x54] sm:$0xf] }
 0x193   : > { %v2429_v25 = vpop.f32.mrf.mxu0  ;;  %v4977_v3 = vrot.slane %v4961_v18, 9 }
 0x194   : > { %v2587_v8 = vrot.slane %v2585_v32, 4  ;;  %v3391_v35 = vor.u32 %v3390_v46, %v6483_v31  ;;  %v5233_v46 = vld [vmem:[%s5556_s24 + $0x48] sm:$0xe] }
 0x195   : > { %v1748_v19 = vpop.f32.mrf.mxu3 }
 0x196   : > { %4233 = vmatmul.bf16.gmra.mxu0 %v4137_v33  ;;  %v1798_v57 = vadd.f32 %v1748_v19, %v1484_v22  ;;  %v3685_v22 = vunpack.c.l.b16 %v3373_v42  ;;  %v3999_v33 = vsel %vm5871_vm5, %v5248_v21, %v3998_v61  ;;  %v5478_v19 = vld [vmem:[%s5556_s24 + $0x44] sm:$0x1]  ;;  %v4110_v61 = vunpack.c.l.b16 %v4002_v51 }
 0x197   : > { %v2588_v42 = vrot.slane %v5478_v19, 5  ;;  %v4109_v55 = vunpack.c.l.b16 %v3999_v33  ;;  %v3381_v21 = vor.u32 %v3380_v13, %v3377_v49 }
 0x198   : > { %v1436_v54 = vpop.f32.mrf.mxu2  ;;  %v6475_v26 = vadd.f32 %v2429_v25, %v1798_v57  ;;  %v1059_v53 = vpop.f32.mrf.mxu1  ;;  %v6486_v25 = vld [vmem:[%s5556_s24 + $0x50] sm:$0x1]  ;;  %v3713_v27 = vpack.c.b16 %v3685_v22, %v3684_v4  ;;  %v3392_v22 = vrot.slane %v3391_v35, 4 }
 0x199   : > { %v1485_v44 = vadd.f32 %v1436_v54, %v1057_v9  ;;  %v3394_v11 = vshll.u32 %v6486_v25, 16  ;;  %v1060_v62 = vadd.f32 %v1059_v53, %v6107_v14  ;;  %v2586_v54 = vsel %vm5871_vm5, %v4977_v3, %v2585_v32 }
 0x19a   : > { %v3382_v49 = vrot.slane %v3381_v21, 4  ;;  %v4005_v14 = vrot.slane %v6463_v39, 5  ;;  %v2691_v32 = vunpack.c.l.b16 %v2586_v54  ;;  %v3399_v3 = vshrl.u32 %v5164_v37, 16 }
 0x19b   : > { %v2431_v16 = vpop.f32.mrf.mxu0  ;;  %2818 = vmatmul.bf16.gmra.mxu1 %v2718_v2  ;;  %v2589_v2 = vsel %vm5871_vm5, %v2587_v8, %v2588_v42  ;;  %v3396_v13 = vrot.slane %v3394_v11, 5  ;;  %v3402_v8 = vshll.u32 %v5164_v37, 16  ;;  %v4008_v35 = vrot.slane %v6486_v25, 5 }
 0x19c   : > { %v2692_v51 = vunpack.c.l.b16 %v2589_v2  ;;  %v4007_v21 = vrot.slane %v4005_v14, 4  ;;  %v3401_v11 = vrot.slane %v3399_v3, 4 }
 0x19d   : > { %v1750_v7 = vpop.f32.mrf.mxu3  ;;  %3132 = vmatmul.bf16.gmra.mxu2 %v5378_v0  ;;  %v4138_v0 = vpack.c.b16 %v4110_v61, %v4109_v55  ;;  %v3387_v55 = vsel %vm5571_vm2, %v3382_v49, %v6483_v31  ;;  %v5249_v61 = vrot.slane %v5233_v46, 9 }
 0x19e   : > { %v1799_v57 = vadd.f32 %v1750_v7, %v1485_v44  ;;  %v6498_v44 = vld [vmem:[%s5556_s24 + $0x58] sm:$0xf]  ;;  %v4009_v46 = vsel %vm5871_vm5, %v4007_v21, %v4008_v35 }
 0x19f   : > { %v3408_v19 = vshll.u32 %v6498_v44, 16  ;;  %v3412_v42 = vshrl.u32 %v6498_v44, 16 }
 0x1a0   : > { %v1439_v9 = vpop.f32.mrf.mxu2  ;;  %v1061_v4 = vpop.f32.mrf.mxu1  ;;  %v6501_v53 = vadd.f32 %v2431_v16, %v1799_v57  ;;  %v3397_v16 = vsel %vm5571_vm2, %v3392_v22, %v3396_v13  ;;  %v6520_v22 = vld [vmem:[%s5556_s24 + $0x5c] sm:$0x1] }
 0x1a1   : > { %v1486_v18 = vadd.f32 %v1439_v9, %v1060_v62  ;;  %v1062_v57 = vadd.f32 %v1061_v4, %v6122_v38  ;;  %v3404_v9 = vrot.slane %v3402_v8, 5  ;;  %v6513_v31 = vrot.slane %v3408_v19, 5 }
 0x1a2   : > { %3813 = vmatmul.bf16.gmra.mxu3 %v3713_v27  ;;  %v2719_v27 = vpack.c.b16 %v2692_v51, %v2691_v32  ;;  %v3414_v54 = vrot.slane %v3412_v42, 4  ;;  %v3686_v4 = vunpack.c.l.b16 %v3387_v55  ;;  %v3687_v13 = vunpack.c.l.b16 %v3397_v16  ;;  %v4962_v32 = vld [vmem:[%s5556_s24 + $0x48] sm:$0xe]  ;;  %v5480_v55 = vld [vmem:[%s5556_s24 + $0x50] sm:$0x1] }
 0x1a3   : > { %v2434_v33 = vpop.f32.mrf.mxu0  ;;  %v4006_v51 = vsel %vm5871_vm5, %v5249_v61, %v4005_v14  ;;  %v3418_v8 = vshll.u32 %v6520_v22, 16  ;;  %v4978_v42 = vrot.slane %v4962_v32, 9  ;;  %v4112_v61 = vunpack.c.l.b16 %v4009_v46  ;;  %v5167_v32 = vld [vmem:[%s5556_s24 + $0x60] sm:$0xf] }
 0x1a4   : > { %v3415_v3 = vor.u32 %v3414_v54, %v6513_v31  ;;  %v4111_v14 = vunpack.c.l.b16 %v4006_v51  ;;  %v6541_v51 = vld [vmem:[%s5556_s24 + $0x64] sm:$0xf] }
 0x1a5   : > { %v1753_v7 = vpop.f32.mrf.mxu3 }
 0x1a6   : > { %4238 = vmatmul.bf16.gmra.mxu0 %v4138_v0  ;;  %v1800_v39 = vadd.f32 %v1753_v7, %v1486_v18  ;;  %v5379_v0 = vld [vmem:[%s5556_s24 + $0x48] sm:$0xff] }
 0x1a7   : > { %v5479_v18 = vld [vmem:[%s5556_s24 + $0x4c] sm:$0xf] }
 0x1a8   : > { %v1441_v62 = vpop.f32.mrf.mxu2  ;;  %v6515_v2 = vadd.f32 %v2434_v33, %v1800_v39  ;;  %v2592_v49 = vrot.slane %v5479_v18, 5  ;;  %v1064_v38 = vpop.f32.mrf.mxu1  ;;  %v3405_v33 = vor.u32 %v3404_v9, %v3401_v11  ;;  %v2595_v39 = vrot.slane %v5480_v55, 5  ;;  %v5234_v18 = vld [vmem:[%s5556_s24 + $0x54] sm:$0xe] }
 0x1a9   : > { %v1487_v37 = vadd.f32 %v1441_v62, %v1062_v57  ;;  %v3714_v57 = vpack.c.b16 %v3687_v13, %v3686_v4  ;;  %v1065_v21 = vadd.f32 %v1064_v38, %v5992_v50  ;;  %v3416_v11 = vrot.slane %v3415_v3, 4 }
 0x1aa   : > { %v2594_v7 = vrot.slane %v2592_v49, 4  ;;  %v3406_v35 = vrot.slane %v3405_v33, 4  ;;  %v3420_v62 = vrot.slane %v3418_v8, 5  ;;  %v2593_v54 = vsel %vm5871_vm5, %v4978_v42, %v2592_v49 }
 0x1ab   : > { %v2436_v25 = vpop.f32.mrf.mxu0  ;;  %2823 = vmatmul.bf16.gmra.mxu1 %v2719_v27  ;;  %v4139_v4 = vpack.c.b16 %v4112_v61, %v4111_v14  ;;  %v2693_v46 = vunpack.c.l.b16 %v2593_v54  ;;  %v5250_v3 = vrot.slane %v5234_v18, 9  ;;  %v3423_v42 = vshrl.u32 %v5167_v32, 16  ;;  %v4963_v54 = vld [vmem:[%s5556_s24 + $0x54] sm:$0xe] }
 0x1ac   : > { %v3411_v49 = vsel %vm5571_vm2, %v3406_v35, %v6513_v31  ;;  %v4015_v55 = vrot.slane %v6520_v22, 5 }
 0x1ad   : > { %v1755_v19 = vpop.f32.mrf.mxu3  ;;  %3137 = vmatmul.bf16.gmra.mxu2 %v5379_v0  ;;  %v2596_v0 = vsel %vm5871_vm5, %v2594_v7, %v2595_v39  ;;  %v3432_v39 = vshll.u32 %v6541_v51, 16  ;;  %v3688_v61 = vunpack.c.l.b16 %v3411_v49  ;;  %v3425_v22 = vrot.slane %v3423_v42, 4 }
 0x1ae   : > { %v1801_v16 = vadd.f32 %v1755_v19, %v1487_v37  ;;  %v4012_v37 = vrot.slane %v6498_v44, 5  ;;  %v2694_v33 = vunpack.c.l.b16 %v2596_v0  ;;  %v3421_v44 = vsel %vm5571_vm2, %v3416_v11, %v3420_v62  ;;  %v5380_v62 = vld [vmem:[%s5556_s24 + $0x54] sm:$0xff] }
 0x1b0   : > { %v1444_v27 = vpop.f32.mrf.mxu2  ;;  %v1066_v13 = vpop.f32.mrf.mxu1  ;;  %v6538_v50 = vadd.f32 %v2436_v25, %v1801_v16  ;;  %v4014_v19 = vrot.slane %v4012_v37, 4  ;;  %v3426_v25 = vshll.u32 %v5167_v32, 16  ;;  %v3436_v16 = vshrl.u32 %v6541_v51, 16 }
 0x1b1   : > { %v1488_v9 = vadd.f32 %v1444_v27, %v1065_v21  ;;  %v1067_v31 = vadd.f32 %v1066_v13, %v6015_v40  ;;  %v2720_v14 = vpack.c.b16 %v2694_v33, %v2693_v46  ;;  %v5481_v21 = vld [vmem:[%s5556_s24 + $0x58] sm:$0xf]  ;;  %v6561_v13 = vrot.slane %v3432_v39, 5 }
 0x1b2   : > { %3818 = vmatmul.bf16.gmra.mxu3 %v3714_v57  ;;  %v2599_v27 = vrot.slane %v5481_v21, 5  ;;  %v3428_v0 = vrot.slane %v3426_v25, 5  ;;  %v4016_v40 = vsel %vm5871_vm5, %v4014_v19, %v4015_v55  ;;  %v3438_v32 = vrot.slane %v3436_v16, 4  ;;  %v5170_v21 = vld [vmem:[%s5556_s24 + $0x6c] sm:$0xf] }
 0x1b3   : > { %v2439_v38 = vpop.f32.mrf.mxu0  ;;  %v4979_v33 = vrot.slane %v4963_v54, 9 }
 0x1b4   : > { %v2601_v49 = vrot.slane %v2599_v27, 4  ;;  %v3439_v55 = vor.u32 %v3438_v32, %v6561_v13  ;;  %v5235_v32 = vld [vmem:[%s5556_s24 + $0x60] sm:$0xe] }
 0x1b5   : > { %v1758_v8 = vpop.f32.mrf.mxu3 }
 0x1b6   : > { %4243 = vmatmul.bf16.gmra.mxu0 %v4139_v4  ;;  %v1802_v7 = vadd.f32 %v1758_v8, %v1488_v9  ;;  %v3689_v9 = vunpack.c.l.b16 %v3421_v44  ;;  %v4013_v4 = vsel %vm5871_vm5, %v5250_v3, %v4012_v37  ;;  %v5482_v8 = vld [vmem:[%s5556_s24 + $0x5c] sm:$0x1]  ;;  %v4114_v37 = vunpack.c.l.b16 %v4016_v40 }
 0x1b7   : > { %v2602_v44 = vrot.slane %v5482_v8, 5  ;;  %v4113_v25 = vunpack.c.l.b16 %v4013_v4  ;;  %v3429_v3 = vor.u32 %v3428_v0, %v3425_v22 }
 0x1b8   : > { %v1446_v57 = vpop.f32.mrf.mxu2  ;;  %v6553_v35 = vadd.f32 %v2439_v38, %v1802_v7  ;;  %v1069_v18 = vpop.f32.mrf.mxu1  ;;  %v6564_v38 = vld [vmem:[%s5556_s24 + $0x68] sm:$0x1]  ;;  %v3715_v19 = vpack.c.b16 %v3689_v9, %v3688_v61  ;;  %v3440_v9 = vrot.slane %v3439_v55, 4 }
 0x1b9   : > { %v1489_v11 = vadd.f32 %v1446_v57, %v1067_v31  ;;  %v3442_v39 = vshll.u32 %v6564_v38, 16  ;;  %v1070_v16 = vadd.f32 %v1069_v18, %v6036_v6  ;;  %v2600_v57 = vsel %vm5871_vm5, %v4979_v33, %v2599_v27 }
 0x1ba   : > { %v3430_v22 = vrot.slane %v3429_v3, 4  ;;  %v4019_v6 = vrot.slane %v6541_v51, 5  ;;  %v2695_v27 = vunpack.c.l.b16 %v2600_v57  ;;  %v3447_v33 = vshrl.u32 %v5170_v21, 16 }
 0x1bb   : > { %v2441_v46 = vpop.f32.mrf.mxu0  ;;  %2828 = vmatmul.bf16.gmra.mxu1 %v2720_v14  ;;  %v2603_v14 = vsel %vm5871_vm5, %v2601_v49, %v2602_v44  ;;  %v3444_v0 = vrot.slane %v3442_v39, 5  ;;  %v3450_v49 = vshll.u32 %v5170_v21, 16  ;;  %v4022_v55 = vrot.slane %v6564_v38, 5 }
 0x1bc   : > { %v2696_v40 = vunpack.c.l.b16 %v2603_v14  ;;  %v4021_v3 = vrot.slane %v4019_v6, 4  ;;  %v3449_v39 = vrot.slane %v3447_v33, 4 }
 0x1bd   : > { %v1760_v42 = vpop.f32.mrf.mxu3  ;;  %3142 = vmatmul.bf16.gmra.mxu2 %v5380_v62  ;;  %v4140_v62 = vpack.c.b16 %v4114_v37, %v4113_v25  ;;  %v3435_v25 = vsel %vm5571_vm2, %v3430_v22, %v6561_v13  ;;  %v5251_v37 = vrot.slane %v5235_v32, 9 }
 0x1be   : > { %v1803_v7 = vadd.f32 %v1760_v42, %v1489_v11  ;;  %v6576_v11 = vld [vmem:[%s5556_s24 + $0x70] sm:$0xf]  ;;  %v4023_v32 = vsel %vm5871_vm5, %v4021_v3, %v4022_v55 }
 0x1bf   : > { %v3456_v8 = vshll.u32 %v6576_v11, 16  ;;  %v3460_v44 = vshrl.u32 %v6576_v11, 16 }
 0x1c0   : > { %v1449_v31 = vpop.f32.mrf.mxu2  ;;  %v1071_v61 = vpop.f32.mrf.mxu1  ;;  %v6579_v18 = vadd.f32 %v2441_v46, %v1803_v7  ;;  %v3445_v46 = vsel %vm5571_vm2, %v3440_v9, %v3444_v0  ;;  %v6598_v9 = vld [vmem:[%s5556_s24 + $0x74] sm:$0x1] }
 0x1c1   : > { %v1490_v54 = vadd.f32 %v1449_v31, %v1070_v16  ;;  %v1072_v7 = vadd.f32 %v1071_v61, %v6050_v28  ;;  %v3452_v31 = vrot.slane %v3450_v49, 5  ;;  %v6591_v13 = vrot.slane %v3456_v8, 5 }
 0x1c2   : > { %3823 = vmatmul.bf16.gmra.mxu3 %v3715_v19  ;;  %v2721_v19 = vpack.c.b16 %v2696_v40, %v2695_v27  ;;  %v3462_v57 = vrot.slane %v3460_v44, 4  ;;  %v3690_v61 = vunpack.c.l.b16 %v3435_v25  ;;  %v3691_v0 = vunpack.c.l.b16 %v3445_v46  ;;  %v4964_v27 = vld [vmem:[%s5556_s24 + $0x60] sm:$0xe]  ;;  %v5484_v25 = vld [vmem:[%s5556_s24 + $0x68] sm:$0x1] }
 0x1c3   : > { %v2444_v4 = vpop.f32.mrf.mxu0  ;;  %v4020_v40 = vsel %vm5871_vm5, %v5251_v37, %v4019_v6  ;;  %v3466_v49 = vshll.u32 %v6598_v9, 16  ;;  %v4980_v44 = vrot.slane %v4964_v27, 9  ;;  %v4116_v37 = vunpack.c.l.b16 %v4023_v32  ;;  %v5173_v27 = vld [vmem:[%s5556_s24 + $0x78] sm:$0xf] }
 0x1c4   : > { %v3463_v33 = vor.u32 %v3462_v57, %v6591_v13  ;;  %v4115_v6 = vunpack.c.l.b16 %v4020_v40  ;;  %v6619_v40 = vld [vmem:[%s5556_s24 + $0x7c] sm:$0xf] }
 0x1c5   : > { %v1763_v42 = vpop.f32.mrf.mxu3 }
 0x1c6   : > { %4248 = vmatmul.bf16.gmra.mxu0 %v4140_v62  ;;  %v1804_v51 = vadd.f32 %v1763_v42, %v1490_v54  ;;  %v5381_v62 = vld [vmem:[%s5556_s24 + $0x60] sm:$0xff] }
 0x1c7   : > { %v5483_v54 = vld [vmem:[%s5556_s24 + $0x64] sm:$0xf] }
 0x1c8   : > { %v1451_v16 = vpop.f32.mrf.mxu2  ;;  %v6593_v14 = vadd.f32 %v2444_v4, %v1804_v51  ;;  %v2606_v22 = vrot.slane %v5483_v54, 5  ;;  %v1074_v28 = vpop.f32.mrf.mxu1  ;;  %v3453_v4 = vor.u32 %v3452_v31, %v3449_v39  ;;  %v2609_v51 = vrot.slane %v5484_v25, 5  ;;  %v5236_v54 = vld [vmem:[%s5556_s24 + $0x6c] sm:$0xe] }
 0x1c9   : > { %v1491_v21 = vadd.f32 %v1451_v16, %v1072_v7  ;;  %v3716_v7 = vpack.c.b16 %v3691_v0, %v3690_v61  ;;  %v1075_v3 = vadd.f32 %v1074_v28, %v6068_v63  ;;  %v3464_v39 = vrot.slane %v3463_v33, 4 }
 0x1ca   : > { %v2608_v42 = vrot.slane %v2606_v22, 4  ;;  %v3454_v55 = vrot.slane %v3453_v4, 4  ;;  %v3468_v16 = vrot.slane %v3466_v49, 5  ;;  %v2607_v57 = vsel %vm5871_vm5, %v4980_v44, %v2606_v22 }
 0x1cb   : > { %v2446_v38 = vpop.f32.mrf.mxu0  ;;  %2833 = vmatmul.bf16.gmra.mxu1 %v2721_v19  ;;  %v4141_v61 = vpack.c.b16 %v4116_v37, %v4115_v6  ;;  %v2697_v32 = vunpack.c.l.b16 %v2607_v57  ;;  %v5252_v33 = vrot.slane %v5236_v54, 9  ;;  %v3471_v44 = vshrl.u32 %v5173_v27, 16  ;;  %v4965_v57 = vld [vmem:[%s5556_s24 + $0x6c] sm:$0xe] }
 0x1cc   : > { %v3459_v22 = vsel %vm5571_vm2, %v3454_v55, %v6591_v13  ;;  %v4029_v25 = vrot.slane %v6598_v9, 5 }
 0x1cd   : > { %v1765_v8 = vpop.f32.mrf.mxu3  ;;  %3147 = vmatmul.bf16.gmra.mxu2 %v5381_v62  ;;  %v2610_v62 = vsel %vm5871_vm5, %v2608_v42, %v2609_v51  ;;  %v3480_v51 = vshll.u32 %v6619_v40, 16  ;;  %v3692_v37 = vunpack.c.l.b16 %v3459_v22  ;;  %v3473_v9 = vrot.slane %v3471_v44, 4 }
 0x1ce   : > { %v1805_v46 = vadd.f32 %v1765_v8, %v1491_v21  ;;  %v4026_v21 = vrot.slane %v6576_v11, 5  ;;  %v2698_v4 = vunpack.c.l.b16 %v2610_v62  ;;  %v3469_v11 = vsel %vm5571_vm2, %v3464_v39, %v3468_v16  ;;  %v5382_v16 = vld [vmem:[%s5556_s24 + $0x6c] sm:$0xff] }
 0x1d0   : > { %v1454_v19 = vpop.f32.mrf.mxu2  ;;  %v1076_v0 = vpop.f32.mrf.mxu1  ;;  %v6616_v63 = vadd.f32 %v2446_v38, %v1805_v46  ;;  %v4028_v8 = vrot.slane %v4026_v21, 4  ;;  %v3474_v38 = vshll.u32 %v5173_v27, 16  ;;  %v3484_v46 = vshrl.u32 %v6619_v40, 16 }
 0x1d1   : > { %v1492_v31 = vadd.f32 %v1454_v19, %v1075_v3  ;;  %v1077_v13 = vadd.f32 %v1076_v0, %v6099_v41  ;;  %v2722_v6 = vpack.c.b16 %v2698_v4, %v2697_v32  ;;  %v5485_v3 = vld [vmem:[%s5556_s24 + $0x70] sm:$0xf]  ;;  %v6639_v0 = vrot.slane %v3480_v51, 5 }
 0x1d2   : > { %3828 = vmatmul.bf16.gmra.mxu3 %v3716_v7  ;;  %v2613_v19 = vrot.slane %v5485_v3, 5  ;;  %v3476_v62 = vrot.slane %v3474_v38, 5  ;;  %v4030_v41 = vsel %vm5871_vm5, %v4028_v8, %v4029_v25  ;;  %v3486_v27 = vrot.slane %v3484_v46, 4  ;;  %v5176_v3 = vld [vmem:[%s5556_s24 + $0x84] sm:$0xf] }
 0x1d3   : > { %v2449_v28 = vpop.f32.mrf.mxu0  ;;  %v4981_v4 = vrot.slane %v4965_v57, 9 }
 0x1d4   : > { %v2615_v22 = vrot.slane %v2613_v19, 4  ;;  %v3487_v25 = vor.u32 %v3486_v27, %v6639_v0  ;;  %v5237_v27 = vld [vmem:[%s5556_s24 + $0x78] sm:$0xe] }
 0x1d5   : > { %v1768_v49 = vpop.f32.mrf.mxu3 }
 0x1d6   : > { %4253 = vmatmul.bf16.gmra.mxu0 %v4141_v61  ;;  %v1806_v42 = vadd.f32 %v1768_v49, %v1492_v31  ;;  %v3693_v31 = vunpack.c.l.b16 %v3469_v11  ;;  %v4027_v61 = vsel %vm5871_vm5, %v5252_v33, %v4026_v21  ;;  %v5486_v49 = vld [vmem:[%s5556_s24 + $0x74] sm:$0x1]  ;;  %v4118_v21 = vunpack.c.l.b16 %v4030_v41 }
 0x1d7   : > { %v2616_v11 = vrot.slane %v5486_v49, 5  ;;  %v4117_v38 = vunpack.c.l.b16 %v4027_v61  ;;  %v3477_v33 = vor.u32 %v3476_v62, %v3473_v9 }
 0x1d8   : > { %v1456_v7 = vpop.f32.mrf.mxu2  ;;  %v6631_v55 = vadd.f32 %v2449_v28, %v1806_v42  ;;  %v1079_v54 = vpop.f32.mrf.mxu1  ;;  %v6642_v28 = vld [vmem:[%s5556_s24 + $0x80] sm:$0x1]  ;;  %v3717_v8 = vpack.c.b16 %v3693_v31, %v3692_v37  ;;  %v3488_v31 = vrot.slane %v3487_v25, 4 }
 0x1d9   : > { %v1493_v39 = vadd.f32 %v1456_v7, %v1077_v13  ;;  %v3490_v51 = vshll.u32 %v6642_v28, 16  ;;  %v1080_v46 = vadd.f32 %v1079_v54, %v6119_v15  ;;  %v2614_v7 = vsel %vm5871_vm5, %v4981_v4, %v2613_v19 }
 0x1da   : > { %v3478_v9 = vrot.slane %v3477_v33, 4  ;;  %v4033_v15 = vrot.slane %v6619_v40, 5  ;;  %v2699_v19 = vunpack.c.l.b16 %v2614_v7  ;;  %v3495_v4 = vshrl.u32 %v5176_v3, 16 }
 0x1db   : > { %v2451_v32 = vpop.f32.mrf.mxu0  ;;  %2838 = vmatmul.bf16.gmra.mxu1 %v2722_v6  ;;  %v2617_v6 = vsel %vm5871_vm5, %v2615_v22, %v2616_v11  ;;  %v3492_v62 = vrot.slane %v3490_v51, 5  ;;  %v3498_v22 = vshll.u32 %v5176_v3, 16  ;;  %v4036_v25 = vrot.slane %v6642_v28, 5  ;;  %v6678_v28 = vld [vmem:[%s5556_s24 + $0x8c] sm:$0x1] }
 0x1dc   : > { %v2700_v41 = vunpack.c.l.b16 %v2617_v6  ;;  %v4035_v33 = vrot.slane %v4033_v15, 4  ;;  %v3497_v51 = vrot.slane %v3495_v4, 4 }
 0x1dd   : > { %v1770_v44 = vpop.f32.mrf.mxu3  ;;  %3152 = vmatmul.bf16.gmra.mxu2 %v5382_v16  ;;  %v4142_v16 = vpack.c.b16 %v4118_v21, %v4117_v38  ;;  %v3483_v38 = vsel %vm5571_vm2, %v3478_v9, %v6639_v0  ;;  %v5253_v21 = vrot.slane %v5237_v27, 9  ;;  %v3500_v0 = vrot.slane %v3498_v22, 5 }
 0x1de   : > { %v1807_v42 = vadd.f32 %v1770_v44, %v1493_v39  ;;  %v6654_v39 = vld [vmem:[%s5556_s24 + $0x88] sm:$0xf] }
 0x1df   : > { %v3504_v49 = vshll.u32 %v6654_v39, 16  ;;  %v3508_v11 = vshrl.u32 %v6654_v39, 16  ;;  %v3501_v27 = vor.u32 %v3500_v0, %v3497_v51 }
 0x1e0   : > { %v1459_v13 = vpop.f32.mrf.mxu2  ;;  %v1081_v37 = vpop.f32.mrf.mxu1  ;;  %v6657_v54 = vadd.f32 %v2451_v32, %v1807_v42  ;;  %v3493_v32 = vsel %vm5571_vm2, %v3488_v31, %v3492_v62  ;;  %v4966_v62 = vld [vmem:[%s5556_s24 + $0x78] sm:$0xe] }
 0x1e1   : > { %v1494_v57 = vadd.f32 %v1459_v13, %v1080_v46  ;;  %v1082_v42 = vadd.f32 %v1081_v37, %v6134_v1  ;;  %v6669_v13 = vrot.slane %v3504_v49, 5  ;;  %v3510_v7 = vrot.slane %v3508_v11, 4 }
 0x1e2   : > { %3833 = vmatmul.bf16.gmra.mxu3 %v3717_v8  ;;  %v2723_v8 = vpack.c.b16 %v2700_v41, %v2699_v19  ;;  %v3694_v1 = vunpack.c.l.b16 %v3483_v38  ;;  %v3695_v37 = vunpack.c.l.b16 %v3493_v32  ;;  %v4034_v41 = vsel %vm5871_vm5, %v5253_v21, %v4033_v15 }
 0x1e3   : > { %v2454_v61 = vpop.f32.mrf.mxu0  ;;  %v3511_v4 = vor.u32 %v3510_v7, %v6669_v13  ;;  %v4982_v49 = vrot.slane %v4966_v62, 9  ;;  %v3514_v15 = vshll.u32 %v6678_v28, 16  ;;  %v4119_v21 = vunpack.c.l.b16 %v4034_v41  ;;  %v6706_v41 = vld [vmem:[%s5556_s24 + $0x94] sm:$0xf] }
 0x1e4   : > { %v3718_v32 = vpack.c.b16 %v3695_v37, %v3694_v1  ;;  %v5238_v1 = vld [vmem:[%s5556_s24 + $0x84] sm:$0xe] }
 0x1e5   : > { %v1773_v44 = vpop.f32.mrf.mxu3  ;;  %v3512_v51 = vrot.slane %v3511_v4, 4 }
 0x1e6   : > { %4258 = vmatmul.bf16.gmra.mxu0 %v4142_v16  ;;  %v1808_v40 = vadd.f32 %v1773_v44, %v1494_v57  ;;  %v5383_v16 = vld [vmem:[%s5556_s24 + $0x78] sm:$0xff]  ;;  %v5488_v44 = vld [vmem:[%s5556_s24 + $0x80] sm:$0x1] }
 0x1e7   : > { %v5487_v57 = vld [vmem:[%s5556_s24 + $0x7c] sm:$0xf]  ;;  %v2623_v38 = vrot.slane %v5488_v44, 5 }
 0x1e8   : > { %v1461_v46 = vpop.f32.mrf.mxu2  ;;  %v6671_v6 = vadd.f32 %v2454_v61, %v1808_v40  ;;  %v2620_v9 = vrot.slane %v5487_v57, 5  ;;  %v2804_v31 = vpop.f32.mrf.mxu1  ;;  %v4037_v61 = vsel %vm5871_vm5, %v4035_v33, %v4036_v25  ;;  %v3502_v25 = vrot.slane %v3501_v27, 4 }
 0x1e9   : > { %v1495_v3 = vadd.f32 %v1461_v46, %v1082_v42  ;;  %v4120_v33 = vunpack.c.l.b16 %v4037_v61  ;;  %v2884_v42 = vadd.f32 %v2804_v31, %v6160_v59  ;;  %v5179_v46 = vld [vmem:[%s5556_s24 + $0x90] sm:$0xf] }
 0x1ea   : > { %v2622_v11 = vrot.slane %v2620_v9, 4  ;;  %v2621_v0 = vsel %vm5871_vm5, %v4982_v49, %v2620_v9  ;;  %v3519_v61 = vshrl.u32 %v5179_v46, 16  ;;  %v3522_v27 = vshll.u32 %v5179_v46, 16 }
 0x1eb   : > { %v2456_v19 = vpop.f32.mrf.mxu0  ;;  %2843 = vmatmul.bf16.gmra.mxu1 %v2723_v8  ;;  %v4143_v59 = vpack.c.b16 %v4120_v33, %v4119_v21  ;;  %v2701_v9 = vunpack.c.l.b16 %v2621_v0 }
 0x1ec   : > { %v2624_v7 = vsel %vm5871_vm5, %v2622_v11, %v2623_v38  ;;  %v5254_v11 = vrot.slane %v5238_v1, 9  ;;  %v4043_v38 = vrot.slane %v6678_v28, 5 }
 0x1ed   : > { %v1775_v22 = vpop.f32.mrf.mxu3  ;;  %3157 = vmatmul.bf16.gmra.mxu2 %v5383_v16  ;;  %v4040_v16 = vrot.slane %v6654_v39, 5  ;;  %v2702_v4 = vunpack.c.l.b16 %v2624_v7  ;;  %v3507_v39 = vsel %vm5571_vm2, %v3502_v25, %v6669_v13  ;;  %v3521_v13 = vrot.slane %v3519_v61, 4  ;;  %v5489_v25 = vld [vmem:[%s5556_s24 + $0x88] sm:$0xf] }
 0x1ee   : > { %v1809_v40 = vadd.f32 %v1775_v22, %v1495_v3  ;;  %v3516_v3 = vrot.slane %v3514_v15, 5  ;;  %v3528_v15 = vshll.u32 %v6706_v41, 16  ;;  %v2627_v28 = vrot.slane %v5489_v25, 5  ;;  %v5239_v25 = vld [vmem:[%s5556_s24 + $0x90] sm:$0xe] }
 0x1ef   : > { %v3696_v46 = vunpack.c.l.b16 %v3507_v39  ;;  %v4041_v7 = vsel %vm5871_vm5, %v5254_v11, %v4040_v16  ;;  %v5181_v39 = vld [vmem:[%s5556_s24 + $0x98] sm:$0x1] }
 0x1f0   : > { %v3118_v8 = vpop.f32.mrf.mxu2  ;;  %v2806_v31 = vpop.f32.mrf.mxu1  ;;  %v6703_v37 = vadd.f32 %v2456_v19, %v1809_v40  ;;  %v3517_v49 = vsel %vm5571_vm2, %v3512_v51, %v3516_v3  ;;  %v4042_v19 = vrot.slane %v4040_v16, 4  ;;  %v3532_v40 = vshrl.u32 %v6706_v41, 16  ;;  %v5384_v51 = vld [vmem:[%s5556_s24 + $0x84] sm:$0xff] }
 0x1f1   : > { %v3198_v57 = vadd.f32 %v3118_v8, %v2884_v42  ;;  %v2885_v33 = vadd.f32 %v2806_v31, %v6171_v5  ;;  %v2724_v8 = vpack.c.b16 %v2702_v4, %v2701_v9  ;;  %v3697_v0 = vunpack.c.l.b16 %v3517_v49  ;;  %v4967_v3 = vld [vmem:[%s5556_s24 + $0x84] sm:$0xe]  ;;  %v5490_v4 = vld [vmem:[%s5556_s24 + $0x8c] sm:$0x1] }
 0x1f2   : > { %3838 = vmatmul.bf16.gmra.mxu3 %v3718_v32  ;;  %v3524_v32 = vrot.slane %v3522_v27, 5  ;;  %v4044_v1 = vsel %vm5871_vm5, %v4042_v19, %v4043_v38  ;;  %v3530_v5 = vrot.slane %v3528_v15, 5  ;;  %v3534_v31 = vrot.slane %v3532_v40, 4 }
 0x1f3   : > { %v4224_v62 = vpop.f32.mrf.mxu0  ;;  %v4983_v27 = vrot.slane %v4967_v3, 9  ;;  %v2629_v9 = vrot.slane %v2627_v28, 4  ;;  %v4121_v16 = vunpack.c.l.b16 %v4041_v7  ;;  %v4122_v11 = vunpack.c.l.b16 %v4044_v1 }
 0x1f4   : > { %v3525_v61 = vor.u32 %v3524_v32, %v3521_v13  ;;  %v3535_v19 = vor.u32 %v3534_v31, %v3530_v5  ;;  %v3538_v15 = vshll.u32 %v5181_v39, 16  ;;  %v4047_v3 = vrot.slane %v6706_v41, 5  ;;  %v6743_v31 = vld [vmem:[%s5556_s24 + $0xa0] sm:$0xf] }
 0x1f5   : > { %v3799_v22 = vpop.f32.mrf.mxu3  ;;  %v4144_v7 = vpack.c.b16 %v4122_v11, %v4121_v16  ;;  %v4050_v11 = vrot.slane %v5181_v39, 5 }
 0x1f6   : > { %4263 = vmatmul.bf16.gmra.mxu0 %v4143_v59  ;;  %v3879_v44 = vadd.f32 %v3799_v22, %v3198_v57  ;;  %v2630_v22 = vrot.slane %v5490_v4, 5  ;;  %v3526_v38 = vrot.slane %v3525_v61, 4 }
 0x1f8   : > { %v4304_v21 = vadd.f32 %v4224_v62, %v3879_v44  ;;  %v3120_v42 = vpop.f32.mrf.mxu2  ;;  %v2809_v57 = vpop.f32.mrf.mxu1 }
 0x1f9   : > { %v3199_v59 = vadd.f32 %v3120_v42, %v2885_v33  ;;  %v3719_v33 = vpack.c.b16 %v3697_v0, %v3696_v46  ;;  %v2886_v13 = vadd.f32 %v2809_v57, %v6181_v48  ;;  %v2628_v42 = vsel %vm5871_vm5, %v4983_v27, %v2627_v28  ;;  %v5182_v46 = vld [vmem:[%s5556_s24 + $0x9c] sm:$0xf] }
 0x1fa   : > { %4336 = vst [vmem:[%s6720_s29] sm:$0xff] %v4304_v21  ;;  %v3536_v57 = vrot.slane %v3535_v19, 4  ;;  %v2703_v28 = vunpack.c.l.b16 %v2628_v42  ;;  %v3540_v27 = vrot.slane %v3538_v15, 5  ;;  %v3543_v41 = vshrl.u32 %v5182_v46, 16 }
 0x1fb   : > { %v4226_v62 = vpop.f32.mrf.mxu0  ;;  %2848 = vmatmul.bf16.gmra.mxu1 %v2724_v8  ;;  %v2631_v8 = vsel %vm5871_vm5, %v2629_v9, %v2630_v22  ;;  %v5255_v9 = vrot.slane %v5239_v25, 9  ;;  %v3531_v22 = vsel %vm5571_vm2, %v3526_v38, %v3530_v5  ;;  %v5385_v25 = vld [vmem:[%s5556_s24 + $0x90] sm:$0xff] }
 0x1fc   : > { %v2704_v61 = vunpack.c.l.b16 %v2631_v8  ;;  %v3545_v42 = vrot.slane %v3543_v41, 4 }
 0x1fd   : > { %v3801_v49 = vpop.f32.mrf.mxu3  ;;  %3162 = vmatmul.bf16.gmra.mxu2 %v5384_v51  ;;  %v4405_v51 = vmul.f32 %v4304_v21, %v4304_v21  ;;  %v4048_v5 = vsel %vm5871_vm5, %v5255_v9, %v4047_v3 }
 0x1fe   : > { %v3880_v44 = vadd.f32 %v3801_v49, %v3199_v59  ;;  %v3546_v49 = vshll.u32 %v5182_v46, 16  ;;  %v2725_v15 = vpack.c.b16 %v2704_v61, %v2703_v28 }
 0x200   : > { %v4305_v40 = vadd.f32 %v4226_v62, %v3880_v44  ;;  %v3123_v32 = vpop.f32.mrf.mxu2  ;;  %v2811_v48 = vpop.f32.mrf.mxu1  ;;  %v3552_v44 = vshll.u32 %v6743_v31, 16  ;;  %v3548_v8 = vrot.slane %v3546_v49, 5 }
 0x201   : > { %v3200_v1 = vadd.f32 %v3123_v32, %v2886_v13  ;;  %v3698_v13 = vunpack.c.l.b16 %v3531_v22  ;;  %v2887_v32 = vadd.f32 %v2811_v48, %v6195_v47  ;;  %v4968_v48 = vld [vmem:[%s5556_s24 + $0x90] sm:$0xe]  ;;  %v4123_v22 = vunpack.c.l.b16 %v4048_v5 }
 0x202   : > { %4337 = vst [vmem:[%s6720_s29 + $0x8] sm:$0xff] %v4305_v40  ;;  %v4368_v0 = vadd.f32 %v4305_v40, %v4304_v21  ;;  %v4406_v59 = vmul.f32 %v4305_v40, %v4305_v40  ;;  %3843 = vmatmul.bf16.gmra.mxu3 %v3719_v33  ;;  %v4049_v21 = vrot.slane %v4047_v3, 4  ;;  %v3556_v33 = vshrl.u32 %v6743_v31, 16 }
 0x203   : > { %v4229_v62 = vpop.f32.mrf.mxu0  ;;  %v3541_v40 = vsel %vm5571_vm2, %v3536_v57, %v3540_v27  ;;  %v6761_v27 = vld [vmem:[%s5556_s24 + $0xa4] sm:$0x1]  ;;  %v3549_v49 = vor.u32 %v3548_v8, %v3545_v42  ;;  %v5185_v42 = vld [vmem:[%s5556_s24 + $0xa8] sm:$0xf] }
 0x204   : > { %v4437_v4 = vadd.f32 %v4406_v59, %v4405_v51  ;;  %v4051_v51 = vsel %vm5871_vm5, %v4049_v21, %v4050_v11  ;;  %v3554_v59 = vrot.slane %v3552_v44, 5  ;;  %v3699_v47 = vunpack.c.l.b16 %v3541_v40 }
 0x205   : > { %v3804_v16 = vpop.f32.mrf.mxu3  ;;  %v4124_v41 = vunpack.c.l.b16 %v4051_v51  ;;  %v4984_v21 = vrot.slane %v4968_v48, 9 }
 0x206   : > { %4268 = vmatmul.bf16.gmra.mxu0 %v4144_v7  ;;  %v3881_v19 = vadd.f32 %v3804_v16, %v3200_v1  ;;  %v5491_v7 = vld [vmem:[%s5556_s24 + $0x94] sm:$0xf]  ;;  %v3558_v1 = vrot.slane %v3556_v33, 4  ;;  %v3720_v40 = vpack.c.b16 %v3699_v47, %v3698_v13  ;;  %v4054_v13 = vrot.slane %v6743_v31, 5  ;;  %v6775_v47 = vld [vmem:[%s5556_s24 + $0xac] sm:$0xf] }
 0x207   : > { %v2634_v46 = vrot.slane %v5491_v7, 5 }
 0x208   : > { %v4306_v38 = vadd.f32 %v4229_v62, %v3881_v19  ;;  %v3125_v39 = vpop.f32.mrf.mxu2  ;;  %v2814_v62 = vpop.f32.mrf.mxu1  ;;  %v3559_v33 = vor.u32 %v3558_v1, %v3554_v59 }
 0x209   : > { %v3201_v3 = vadd.f32 %v3125_v39, %v2887_v32  ;;  %v2636_v11 = vrot.slane %v2634_v46, 4  ;;  %v3550_v39 = vrot.slane %v3549_v49, 4  ;;  %v2635_v8 = vsel %vm5871_vm5, %v4984_v21, %v2634_v46 }
 0x20a   : > { %4338 = vst [vmem:[%s6720_s29 + $0x10] sm:$0xff] %v4306_v38  ;;  %v4369_v57 = vadd.f32 %v4368_v0, %v4306_v38  ;;  %v4407_v28 = vmul.f32 %v4306_v38, %v4306_v38  ;;  %v5492_v0 = vld [vmem:[%s5556_s24 + $0x98] sm:$0x1]  ;;  %v3562_v38 = vshll.u32 %v6761_v27, 16  ;;  %v3560_v51 = vrot.slane %v3559_v33, 4 }
 0x20b   : > { %v4231_v61 = vpop.f32.mrf.mxu0  ;;  %2853 = vmatmul.bf16.gmra.mxu1 %v2725_v15  ;;  %v2637_v44 = vrot.slane %v5492_v0, 5  ;;  %v4145_v15 = vpack.c.b16 %v4124_v41, %v4123_v22  ;;  %v3570_v22 = vshll.u32 %v5185_v42, 16  ;;  %v2705_v41 = vunpack.c.l.b16 %v2635_v8 }
 0x20c   : > { %v4438_v9 = vadd.f32 %v4437_v4, %v4407_v28  ;;  %v2888_v4 = vadd.f32 %v2814_v62, %v6215_v52  ;;  %v5240_v62 = vld [vmem:[%s5556_s24 + $0x9c] sm:$0xe]  ;;  %v4056_v21 = vrot.slane %v4054_v13, 4  ;;  %v3576_v0 = vshll.u32 %v6775_v47, 16 }
 0x20d   : > { %v3806_v16 = vpop.f32.mrf.mxu3  ;;  %3167 = vmatmul.bf16.gmra.mxu2 %v5385_v25  ;;  %v2638_v25 = vsel %vm5871_vm5, %v2636_v11, %v2637_v44  ;;  %v4057_v11 = vrot.slane %v6761_v27, 5  ;;  %v3580_v33 = vshrl.u32 %v6775_v47, 16  ;;  %v5493_v27 = vld [vmem:[%s5556_s24 + $0xa0] sm:$0xf] }
 0x20e   : > { %v3882_v19 = vadd.f32 %v3806_v16, %v3201_v3  ;;  %v3564_v3 = vrot.slane %v3562_v38, 5  ;;  %v2706_v49 = vunpack.c.l.b16 %v2638_v25  ;;  %v3555_v16 = vsel %vm5571_vm2, %v3550_v39, %v3554_v59 }
 0x20f   : > { %v2641_v39 = vrot.slane %v5493_v27, 5  ;;  %v4058_v25 = vsel %vm5871_vm5, %v4056_v21, %v4057_v11  ;;  %v4061_v27 = vrot.slane %v6775_v47, 5 }
 0x210   : > { %v4307_v32 = vadd.f32 %v4231_v61, %v3882_v19  ;;  %v3128_v5 = vpop.f32.mrf.mxu2  ;;  %v2816_v28 = vpop.f32.mrf.mxu1  ;;  %v3567_v61 = vshrl.u32 %v5185_v42, 16  ;;  %v3700_v19 = vunpack.c.l.b16 %v3555_v16  ;;  %v5386_v42 = vld [vmem:[%s5556_s24 + $0x9c] sm:$0xff] }
 0x211   : > { %v3202_v52 = vadd.f32 %v3128_v5, %v2888_v4  ;;  %v2726_v5 = vpack.c.b16 %v2706_v49, %v2705_v41  ;;  %v2643_v49 = vrot.slane %v2641_v39, 4 }
 0x212   : > { %4339 = vst [vmem:[%s6720_s29 + $0x18] sm:$0xff] %v4307_v32  ;;  %v4370_v7 = vadd.f32 %v4369_v57, %v4307_v32  ;;  %v4408_v1 = vmul.f32 %v4307_v32, %v4307_v32  ;;  %3848 = vmatmul.bf16.gmra.mxu3 %v3720_v40  ;;  %v5256_v57 = vrot.slane %v5240_v62, 9  ;;  %v3569_v59 = vrot.slane %v3567_v61, 4 }
 0x213   : > { %v4234_v48 = vpop.f32.mrf.mxu0  ;;  %v3572_v40 = vrot.slane %v3570_v22, 5  ;;  %v2889_v32 = vadd.f32 %v2816_v28, %v6235_v34  ;;  %v3582_v62 = vrot.slane %v3580_v33, 4 }
 0x214   : > { %v4439_v46 = vadd.f32 %v4438_v9, %v4408_v1  ;;  %v3565_v9 = vsel %vm5571_vm2, %v3560_v51, %v3564_v3  ;;  %v4055_v8 = vsel %vm5871_vm5, %v5256_v57, %v4054_v13  ;;  %v4969_v51 = vld [vmem:[%s5556_s24 + $0x9c] sm:$0xe]  ;;  %v3578_v1 = vrot.slane %v3576_v0, 5  ;;  %v5494_v13 = vld [vmem:[%s5556_s24 + $0xa4] sm:$0x1] }
 0x215   : > { %v3809_v31 = vpop.f32.mrf.mxu3  ;;  %v3573_v61 = vor.u32 %v3572_v40, %v3569_v59  ;;  %v4985_v41 = vrot.slane %v4969_v51, 9  ;;  %v2644_v16 = vrot.slane %v5494_v13, 5  ;;  %v4125_v21 = vunpack.c.l.b16 %v4055_v8 }
 0x216   : > { %4273 = vmatmul.bf16.gmra.mxu0 %v4145_v15  ;;  %v3883_v44 = vadd.f32 %v3809_v31, %v3202_v52  ;;  %v3701_v15 = vunpack.c.l.b16 %v3565_v9  ;;  %v5187_v31 = vld [vmem:[%s5556_s24 + $0xb0] sm:$0x1] }
 0x217   : > { %v3574_v9 = vrot.slane %v3573_v61, 4  ;;  %v3586_v33 = vshll.u32 %v5187_v31, 16  ;;  %v4064_v13 = vrot.slane %v5187_v31, 5 }
 0x218   : > { %v4308_v38 = vadd.f32 %v4234_v48, %v3883_v44  ;;  %v3130_v4 = vpop.f32.mrf.mxu2  ;;  %v2819_v28 = vpop.f32.mrf.mxu1  ;;  %v3721_v0 = vpack.c.b16 %v3701_v15, %v3700_v19  ;;  %v3583_v44 = vor.u32 %v3582_v62, %v3578_v1 }
 0x219   : > { %v3203_v34 = vadd.f32 %v3130_v4, %v2889_v32  ;;  %v2645_v32 = vsel %vm5871_vm5, %v2643_v49, %v2644_v16  ;;  %v5241_v4 = vld [vmem:[%s5556_s24 + $0xa8] sm:$0xe]  ;;  %v3579_v61 = vsel %vm5571_vm2, %v3574_v9, %v3578_v1 }
 0x21a   : > { %4340 = vst [vmem:[%s6720_s29 + $0x20] sm:$0xff] %v4308_v38  ;;  %v4371_v52 = vadd.f32 %v4370_v7, %v4308_v38  ;;  %v4409_v3 = vmul.f32 %v4308_v38, %v4308_v38  ;;  %v4126_v7 = vunpack.c.l.b16 %v4058_v25  ;;  %v2642_v38 = vsel %vm5871_vm5, %v4985_v41, %v2641_v39 }
 0x21b   : > { %v4236_v48 = vpop.f32.mrf.mxu0  ;;  %2858 = vmatmul.bf16.gmra.mxu1 %v2726_v5  ;;  %v3584_v51 = vrot.slane %v3583_v44, 4  ;;  %v2708_v39 = vunpack.c.l.b16 %v2645_v32  ;;  %v5257_v62 = vrot.slane %v5241_v4, 9 }
 0x21c   : > { %v4440_v22 = vadd.f32 %v4439_v46, %v4409_v3  ;;  %v2890_v46 = vadd.f32 %v2819_v28, %v6245_v10  ;;  %v4146_v5 = vpack.c.b16 %v4126_v7, %v4125_v21  ;;  %v6805_v10 = vld [vmem:[%s5556_s24 + $0xb8] sm:$0xf]  ;;  %v3588_v28 = vrot.slane %v3586_v33, 5 }
 0x21d   : > { %v3811_v57 = vpop.f32.mrf.mxu3  ;;  %3172 = vmatmul.bf16.gmra.mxu2 %v5386_v42  ;;  %v5188_v42 = vld [vmem:[%s5556_s24 + $0xb4] sm:$0xf]  ;;  %v3600_v16 = vshll.u32 %v6805_v10, 16  ;;  %v4062_v1 = vsel %vm5871_vm5, %v5257_v62, %v4061_v27 }
 0x21e   : > { %v3884_v11 = vadd.f32 %v3811_v57, %v3203_v34  ;;  %v2707_v34 = vunpack.c.l.b16 %v2642_v38  ;;  %v3591_v47 = vshrl.u32 %v5188_v42, 16  ;;  %v3594_v41 = vshll.u32 %v5188_v42, 16 }
 0x21f   : > { %v3604_v57 = vshrl.u32 %v6805_v10, 16  ;;  %v3602_v32 = vrot.slane %v3600_v16, 5 }
 0x220   : > { %v4309_v59 = vadd.f32 %v4236_v48, %v3884_v11  ;;  %v3133_v40 = vpop.f32.mrf.mxu2  ;;  %v2821_v25 = vpop.f32.mrf.mxu1  ;;  %v2727_v7 = vpack.c.b16 %v2708_v39, %v2707_v34  ;;  %v3702_v11 = vunpack.c.l.b16 %v3579_v61  ;;  %v3593_v9 = vrot.slane %v3591_v47, 4 }
 0x221   : > { %v3204_v8 = vadd.f32 %v3133_v40, %v2890_v46  ;;  %v2891_v44 = vadd.f32 %v2821_v25, %v6253_v12  ;;  %v3596_v33 = vrot.slane %v3594_v41, 5  ;;  %v5495_v40 = vld [vmem:[%s5556_s24 + $0xac] sm:$0xf]  ;;  %v3606_v4 = vrot.slane %v3604_v57, 4 }
 0x222   : > { %4341 = vst [vmem:[%s6720_s29 + $0x28] sm:$0xff] %v4309_v59  ;;  %v4372_v19 = vadd.f32 %v4371_v52, %v4309_v59  ;;  %v4410_v15 = vmul.f32 %v4309_v59, %v4309_v59  ;;  %3853 = vmatmul.bf16.gmra.mxu3 %v3721_v0  ;;  %v4063_v52 = vrot.slane %v4061_v27, 4  ;;  %v5387_v59 = vld [vmem:[%s5556_s24 + $0xa8] sm:$0xff]  ;;  %v2648_v38 = vrot.slane %v5495_v40, 5  ;;  %v5242_v40 = vld [vmem:[%s5556_s24 + $0xb4] sm:$0xe] }
 0x223   : > { %v4239_v3 = vpop.f32.mrf.mxu0  ;;  %v4127_v34 = vunpack.c.l.b16 %v4062_v1  ;;  %v5191_v1 = vld [vmem:[%s5556_s24 + $0xc0] sm:$0xf] }
 0x224   : > { %v4441_v48 = vadd.f32 %v4440_v22, %v4410_v15  ;;  %v3589_v22 = vsel %vm5571_vm2, %v3584_v51, %v3588_v28  ;;  %v4065_v46 = vsel %vm5871_vm5, %v4063_v52, %v4064_v13  ;;  %v6823_v51 = vld [vmem:[%s5556_s24 + $0xbc] sm:$0x1]  ;;  %v3597_v28 = vor.u32 %v3596_v33, %v3593_v9 }
 0x225   : > { %v3814_v49 = vpop.f32.mrf.mxu3  ;;  %v3703_v12 = vunpack.c.l.b16 %v3589_v22  ;;  %v4128_v39 = vunpack.c.l.b16 %v4065_v46  ;;  %v2650_v47 = vrot.slane %v2648_v38, 4  ;;  %v3610_v16 = vshll.u32 %v6823_v51, 16 }
 0x226   : > { %4278 = vmatmul.bf16.gmra.mxu0 %v4146_v5  ;;  %v3885_v21 = vadd.f32 %v3814_v49, %v3204_v8  ;;  %v4970_v8 = vld [vmem:[%s5556_s24 + $0xa8] sm:$0xe]  ;;  %v3607_v49 = vor.u32 %v3606_v4, %v3602_v32  ;;  %v3598_v22 = vrot.slane %v3597_v28, 4  ;;  %v6837_v4 = vld [vmem:[%s5556_s24 + $0xc4] sm:$0xf] }
 0x227   : > { %v4986_v61 = vrot.slane %v4970_v8, 9  ;;  %v3722_v13 = vpack.c.b16 %v3703_v12, %v3702_v11  ;;  %v4068_v11 = vrot.slane %v6805_v10, 5  ;;  %v3612_v46 = vrot.slane %v3610_v16, 5 }
 0x228   : > { %v4310_v0 = vadd.f32 %v4239_v3, %v3885_v21  ;;  %v3135_v31 = vpop.f32.mrf.mxu2  ;;  %v2824_v15 = vpop.f32.mrf.mxu1  ;;  %v4147_v21 = vpack.c.b16 %v4128_v39, %v4127_v34  ;;  %v4071_v39 = vrot.slane %v6823_v51, 5  ;;  %v3624_v28 = vshll.u32 %v6837_v4, 16  ;;  %v5497_v51 = vld [vmem:[%s5556_s24 + $0xb8] sm:$0xf] }
 0x229   : > { %v3205_v27 = vadd.f32 %v3135_v31, %v2891_v44  ;;  %v3608_v31 = vrot.slane %v3607_v49, 4  ;;  %v4070_v34 = vrot.slane %v4068_v11, 4  ;;  %v6964_v49 = vld [vmem:[#allocation2_spill] sm:$0xff] }
 0x22a   : > { %4342 = vst [vmem:[%s6720_s29 + $0x30] sm:$0xff] %v4310_v0  ;;  %v4373_v5 = vadd.f32 %v4372_v19, %v4310_v0  ;;  %v4411_v42 = vmul.f32 %v4310_v0, %v4310_v0  ;;  %v5496_v19 = vld [vmem:[%s5556_s24 + $0xb0] sm:$0x1]  ;;  %v2649_v0 = vsel %vm5871_vm5, %v4986_v61, %v2648_v38  ;;  %v3628_v61 = vshrl.u32 %v6837_v4, 16 }
 0x22b   : > { %v4241_v25 = vpop.f32.mrf.mxu0  ;;  %2863 = vmatmul.bf16.gmra.mxu1 %v2727_v7  ;;  %v2651_v41 = vrot.slane %v5496_v19, 5  ;;  %v2709_v12 = vunpack.c.l.b16 %v2649_v0  ;;  %v3626_v0 = vrot.slane %v3624_v28, 5 }
 0x22c   : > { %v4442_v3 = vadd.f32 %v4441_v48, %v4411_v42  ;;  %v2892_v48 = vadd.f32 %v2824_v15, %v6272_v60  ;;  %v3618_v15 = vshll.u32 %v5191_v1, 16 }
 0x22d   : > { %v3816_v62 = vpop.f32.mrf.mxu3  ;;  %3177 = vmatmul.bf16.gmra.mxu2 %v5387_v59  ;;  %v2652_v44 = vsel %vm5871_vm5, %v2650_v47, %v2651_v41 }
 0x22e   : > { %v3886_v52 = vadd.f32 %v3816_v62, %v3205_v27  ;;  %v3615_v27 = vshrl.u32 %v5191_v1, 16  ;;  %v2710_v8 = vunpack.c.l.b16 %v2652_v44  ;;  %v3620_v19 = vrot.slane %v3618_v15, 5  ;;  %v4971_v1 = vld [vmem:[%s5556_s24 + $0xb4] sm:$0xe] }
 0x230   : > { %v4311_v57 = vadd.f32 %v4241_v25, %v3886_v52  ;;  %v3138_v7 = vpop.f32.mrf.mxu2  ;;  %v2826_v59 = vpop.f32.mrf.mxu1  ;;  %v3603_v25 = vsel %vm5571_vm2, %v3598_v22, %v3602_v32  ;;  %v3617_v32 = vrot.slane %v3615_v27, 4  ;;  %v2728_v16 = vpack.c.b16 %v2710_v8, %v2709_v12  ;;  %v5193_v8 = vld [vmem:[%s5556_s24 + $0xc8] sm:$0x1] }
 0x231   : > { %v3206_v60 = vadd.f32 %v3138_v7, %v2892_v48  ;;  %v3704_v47 = vunpack.c.l.b16 %v3603_v25  ;;  %v2893_v52 = vadd.f32 %v2826_v59, %v6964_v49  ;;  %v5388_v48 = vld [vmem:[%s5556_s24 + $0xb4] sm:$0xff]  ;;  %v4072_v22 = vsel %vm5871_vm5, %v4070_v34, %v4071_v39  ;;  %v5243_v49 = vld [vmem:[%s5556_s24 + $0xc0] sm:$0xe] }
 0x232   : > { %4343 = vst [vmem:[%s6720_s29 + $0x38] sm:$0xff] %v4311_v57  ;;  %v4374_v9 = vadd.f32 %v4373_v5, %v4311_v57  ;;  %v4412_v33 = vmul.f32 %v4311_v57, %v4311_v57  ;;  %3858 = vmatmul.bf16.gmra.mxu3 %v3722_v13  ;;  %v5258_v5 = vrot.slane %v5242_v40, 9  ;;  %v2655_v57 = vrot.slane %v5497_v51, 5 }
 0x233   : > { %v4244_v42 = vpop.f32.mrf.mxu0  ;;  %v3630_v59 = vrot.slane %v3628_v61, 4  ;;  %v3621_v40 = vor.u32 %v3620_v19, %v3617_v32  ;;  %v4987_v27 = vrot.slane %v4971_v1, 9 }
 0x234   : > { %v4443_v38 = vadd.f32 %v4442_v3, %v4412_v33  ;;  %v3613_v3 = vsel %vm5571_vm2, %v3608_v31, %v3612_v46  ;;  %v4069_v7 = vsel %vm5871_vm5, %v5258_v5, %v4068_v11  ;;  %v2657_v15 = vrot.slane %v2655_v57, 4  ;;  %v5498_v11 = vld [vmem:[%s5556_s24 + $0xbc] sm:$0x1] }
 0x235   : > { %v3819_v10 = vpop.f32.mrf.mxu3  ;;  %v2658_v12 = vrot.slane %v5498_v11, 5  ;;  %v3631_v39 = vor.u32 %v3630_v59, %v3626_v0  ;;  %v3622_v28 = vrot.slane %v3621_v40, 4  ;;  %v2656_v19 = vsel %vm5871_vm5, %v4987_v27, %v2655_v57 }
 0x236   : > { %4283 = vmatmul.bf16.gmra.mxu0 %v4147_v21  ;;  %v3887_v62 = vadd.f32 %v3819_v10, %v3206_v60  ;;  %v3705_v21 = vunpack.c.l.b16 %v3613_v3  ;;  %v4129_v10 = vunpack.c.l.b16 %v4069_v7 }
 0x237   : > { %v3632_v7 = vrot.slane %v3631_v39, 4 }
 0x238   : > { %v4312_v41 = vadd.f32 %v4244_v42, %v3887_v62  ;;  %v3140_v13 = vpop.f32.mrf.mxu2  ;;  %v2829_v60 = vpop.f32.mrf.mxu1  ;;  %v3723_v34 = vpack.c.b16 %v3705_v21, %v3704_v47  ;;  %v3634_v62 = vshll.u32 %v5193_v8, 16 }
 0x239   : > { %v3207_v33 = vadd.f32 %v3140_v13, %v2893_v52  ;;  %v4075_v13 = vrot.slane %v6837_v4, 5 }
 0x23a   : > { %4344 = vst [vmem:[%s6720_s29 + $0x40] sm:$0xff] %v4312_v41  ;;  %v4375_v44 = vadd.f32 %v4374_v9, %v4312_v41  ;;  %v4413_v31 = vmul.f32 %v4312_v41, %v4312_v41  ;;  %v4130_v9 = vunpack.c.l.b16 %v4072_v22  ;;  %v2659_v41 = vsel %vm5871_vm5, %v2657_v15, %v2658_v12  ;;  %v6867_v22 = vld [vmem:[%s5556_s24 + $0xd0] sm:$0xf] }
 0x23b   : > { %v4246_v46 = vpop.f32.mrf.mxu0  ;;  %2868 = vmatmul.bf16.gmra.mxu1 %v2728_v16  ;;  %v5194_v16 = vld [vmem:[%s5556_s24 + $0xcc] sm:$0xf]  ;;  %v2712_v57 = vunpack.c.l.b16 %v2659_v41  ;;  %v4078_v15 = vrot.slane %v5193_v8, 5  ;;  %v3648_v11 = vshll.u32 %v6867_v22, 16  ;;  %v3652_v12 = vshrl.u32 %v6867_v22, 16 }
 0x23c   : > { %v4444_v42 = vadd.f32 %v4443_v38, %v4413_v31  ;;  %v6965_v38 = vld [vmem:[#allocation3_spill] sm:$0xff]  ;;  %v4148_v52 = vpack.c.b16 %v4130_v9, %v4129_v10  ;;  %v2711_v31 = vunpack.c.l.b16 %v2656_v19  ;;  %v3639_v4 = vshrl.u32 %v5194_v16, 16 }
 0x23d   : > { %v3821_v25 = vpop.f32.mrf.mxu3  ;;  %3182 = vmatmul.bf16.gmra.mxu2 %v5388_v48  ;;  %v2894_v61 = vadd.f32 %v2829_v60, %v6965_v38  ;;  %v5259_v60 = vrot.slane %v5243_v49, 9  ;;  %v3642_v40 = vshll.u32 %v5194_v16, 16  ;;  %v5499_v38 = vld [vmem:[%s5556_s24 + $0xc4] sm:$0xf]  ;;  %v3650_v19 = vrot.slane %v3648_v11, 5 }
 0x23e   : > { %v3888_v5 = vadd.f32 %v3821_v25, %v3207_v33  ;;  %v3636_v33 = vrot.slane %v3634_v62, 5  ;;  %v2729_v10 = vpack.c.b16 %v2712_v57, %v2711_v31  ;;  %v3641_v39 = vrot.slane %v3639_v4, 4  ;;  %v5389_v62 = vld [vmem:[%s5556_s24 + $0xc0] sm:$0xff] }
 0x23f   : > { %v4076_v9 = vsel %vm5871_vm5, %v5259_v60, %v4075_v13  ;;  %v3654_v41 = vrot.slane %v3652_v12, 4 }
 0x240   : > { %v4313_v3 = vadd.f32 %v4246_v46, %v3888_v5  ;;  %v3143_v32 = vpop.f32.mrf.mxu2  ;;  %v2831_v21 = vpop.f32.mrf.mxu1  ;;  %v3627_v46 = vsel %vm5571_vm2, %v3622_v28, %v3626_v0  ;;  %v3644_v28 = vrot.slane %v3642_v40, 5 }
 0x241   : > { %v3208_v48 = vadd.f32 %v3143_v32, %v2894_v61  ;;  %v3706_v0 = vunpack.c.l.b16 %v3627_v46  ;;  %v2895_v8 = vadd.f32 %v2831_v21, %v6323_v24  ;;  %v2662_v61 = vrot.slane %v5499_v38, 5  ;;  %v6883_v32 = vld [vmem:[%s5556_s24 + $0xd4] sm:$0x1] }
 0x242   : > { %4345 = vst [vmem:[%s6720_s29 + $0x48] sm:$0xff] %v4313_v3  ;;  %v4376_v47 = vadd.f32 %v4375_v44, %v4313_v3  ;;  %v4414_v51 = vmul.f32 %v4313_v3, %v4313_v3  ;;  %3863 = vmatmul.bf16.gmra.mxu3 %v3723_v34  ;;  %v4077_v44 = vrot.slane %v4075_v13, 4  ;;  %v4131_v21 = vunpack.c.l.b16 %v4076_v9 }
 0x243   : > { %v4249_v1 = vpop.f32.mrf.mxu0  ;;  %v3645_v31 = vor.u32 %v3644_v28, %v3641_v39  ;;  %v3658_v57 = vshll.u32 %v6883_v32, 16  ;;  %v2664_v46 = vrot.slane %v2662_v61, 4  ;;  %v3655_v40 = vor.u32 %v3654_v41, %v3650_v19  ;;  %v5244_v28 = vld [vmem:[%s5556_s24 + $0xcc] sm:$0xe] }
 0x244   : > { %v4445_v59 = vadd.f32 %v4444_v42, %v4414_v51  ;;  %v3637_v42 = vsel %vm5571_vm2, %v3632_v7, %v3636_v33  ;;  %v4079_v3 = vsel %vm5871_vm5, %v4077_v44, %v4078_v15  ;;  %v4972_v51 = vld [vmem:[%s5556_s24 + $0xc0] sm:$0xe] }
 0x245   : > { %v3824_v27 = vpop.f32.mrf.mxu3  ;;  %v3707_v16 = vunpack.c.l.b16 %v3637_v42  ;;  %v4988_v60 = vrot.slane %v4972_v51, 9  ;;  %v3656_v9 = vrot.slane %v3655_v40, 4  ;;  %v4085_v51 = vrot.slane %v6883_v32, 5 }
 0x246   : > { %4288 = vmatmul.bf16.gmra.mxu0 %v4148_v52  ;;  %v3889_v25 = vadd.f32 %v3824_v27, %v3208_v48 }
 0x247   : > { %v3724_v44 = vpack.c.b16 %v3707_v16, %v3706_v0 }
 0x248   : > { %v4314_v5 = vadd.f32 %v4249_v1, %v3889_v25  ;;  %v3145_v34 = vpop.f32.mrf.mxu2  ;;  %v2834_v24 = vpop.f32.mrf.mxu1  ;;  %v4132_v1 = vunpack.c.l.b16 %v4079_v3  ;;  %v3646_v25 = vrot.slane %v3645_v31, 4 }
 0x249   : > { %v3209_v13 = vadd.f32 %v3145_v34, %v2895_v8  ;;  %v2896_v11 = vadd.f32 %v2834_v24, %v6332_v36  ;;  %v4082_v36 = vrot.slane %v6867_v22, 5 }
 0x24a   : > { %4346 = vst [vmem:[%s6720_s29 + $0x50] sm:$0xff] %v4314_v5  ;;  %v4377_v49 = vadd.f32 %v4376_v47, %v4314_v5  ;;  %v4415_v52 = vmul.f32 %v4314_v5, %v4314_v5  ;;  %v5500_v47 = vld [vmem:[%s5556_s24 + $0xc8] sm:$0x1]  ;;  %v3660_v5 = vrot.slane %v3658_v57, 5 }
 0x24b   : > { %v4251_v48 = vpop.f32.mrf.mxu0  ;;  %2873 = vmatmul.bf16.gmra.mxu1 %v2729_v10  ;;  %v2665_v4 = vrot.slane %v5500_v47, 5  ;;  %v2663_v10 = vsel %vm5871_vm5, %v4988_v60, %v2662_v61  ;;  %v4084_v16 = vrot.slane %v4082_v36, 4 }
 0x24c   : > { %v4446_v7 = vadd.f32 %v4445_v59, %v4415_v52  ;;  %v4149_v59 = vpack.c.b16 %v4132_v1, %v4131_v21  ;;  %v2713_v38 = vunpack.c.l.b16 %v2663_v10  ;;  %v3651_v52 = vsel %vm5571_vm2, %v3646_v25, %v3650_v19  ;;  %v5390_v1 = vld [vmem:[%s5556_s24 + $0xcc] sm:$0xff]  ;;  %s4572_s24 = sshll.u32 %s5547_s18, 1 }
 0x24d   : > { %v3826_v33 = vpop.f32.mrf.mxu3  ;;  %3187 = vmatmul.bf16.gmra.mxu2 %v5389_v62  ;;  %v2666_v42 = vsel %vm5871_vm5, %v2664_v46, %v2665_v4  ;;  %v3661_v24 = vsel %vm5571_vm2, %v3656_v9, %v3660_v5  ;;  %v3708_v31 = vunpack.c.l.b16 %v3651_v52  ;;  %v4086_v32 = vsel %vm5871_vm5, %v4084_v16, %v4085_v51  ;;  %s182_s5 = scalar_lea.vmem %s6956_s3, %s4572_s24 }
 0x24e   : > { %v3890_v27 = vadd.f32 %v3826_v33, %v3209_v13  ;;  %v2714_v41 = vunpack.c.l.b16 %v2666_v42  ;;  %v5260_v13 = vrot.slane %v5244_v28, 9  ;;  %v3709_v57 = vunpack.c.l.b16 %v3661_v24 }
 0x250   : > { %v4315_v15 = vadd.f32 %v4251_v48, %v3890_v27  ;;  %v3148_v12 = vpop.f32.mrf.mxu2  ;;  %v2836_v39 = vpop.f32.mrf.mxu1  ;;  %v4083_v19 = vsel %vm5871_vm5, %v5260_v13, %v4082_v36  ;;  %v4134_v27 = vunpack.c.l.b16 %v4086_v32 }
 0x251   : > { %v3210_v0 = vadd.f32 %v3148_v12, %v2896_v11  ;;  %v2897_v48 = vadd.f32 %v2836_v39, %v6345_v45  ;;  %v4133_v40 = vunpack.c.l.b16 %v4083_v19 }
 0x252   : > { %4347 = vst [vmem:[%s6720_s29 + $0x58] sm:$0xff] %v4315_v15  ;;  %v4378_v8 = vadd.f32 %v4377_v49, %v4315_v15  ;;  %v4416_v34 = vmul.f32 %v4315_v15, %v4315_v15  ;;  %3868 = vmatmul.bf16.gmra.mxu3 %v3724_v44  ;;  %v3725_v15 = vpack.c.b16 %v3709_v57, %v3708_v31 }
 0x253   : > { %v4254_v62 = vpop.f32.mrf.mxu0  ;;  %v4150_v25 = vpack.c.b16 %v4134_v27, %v4133_v40 }
 0x254   : > { %v4447_v3 = vadd.f32 %v4446_v7, %v4416_v34  ;;  %v2730_v7 = vpack.c.b16 %v2714_v41, %v2713_v38 }
 0x255   : > { %v3829_v61 = vpop.f32.mrf.mxu3 }
 0x256   : > { %4293 = vmatmul.bf16.gmra.mxu0 %v4149_v59  ;;  %v3891_v49 = vadd.f32 %v3829_v61, %v3210_v0 }
 0x258   : > { %v4316_v22 = vadd.f32 %v4254_v62, %v3891_v49  ;;  %v3150_v21 = vpop.f32.mrf.mxu2  ;;  %v2839_v30 = vpop.f32.mrf.mxu1 }
 0x259   : > { %v3211_v46 = vadd.f32 %v3150_v21, %v2897_v48  ;;  %v2898_v59 = vadd.f32 %v2839_v30, %v6358_v23 }
 0x25a   : > { %4348 = vst [vmem:[%s6720_s29 + $0x60] sm:$0xff] %v4316_v22  ;;  %v4379_v33 = vadd.f32 %v4378_v8, %v4316_v22  ;;  %v4417_v60 = vmul.f32 %v4316_v22, %v4316_v22 }
 0x25b   : > { %v4256_v47 = vpop.f32.mrf.mxu0  ;;  %2878 = vmatmul.bf16.gmra.mxu1 %v2730_v7 }
 0x25c   : > { %v4448_v4 = vadd.f32 %v4447_v3, %v4417_v60 }
 0x25d   : > { %v3831_v45 = vpop.f32.mrf.mxu3  ;;  %3192 = vmatmul.bf16.gmra.mxu2 %v5390_v1 }
 0x25e   : > { %v3892_v44 = vadd.f32 %v3831_v45, %v3211_v46 }
 0x260   : > { %v4317_v11 = vadd.f32 %v4256_v47, %v3892_v44  ;;  %v3153_v12 = vpop.f32.mrf.mxu2  ;;  %v2841_v9 = vpop.f32.mrf.mxu1 }
 0x261   : > { %v3212_v43 = vadd.f32 %v3153_v12, %v2898_v59  ;;  %v2899_v28 = vadd.f32 %v2841_v9, %v6382_v17 }
 0x262   : > { %4349 = vst [vmem:[%s6720_s29 + $0x68] sm:$0xff] %v4317_v11  ;;  %v4380_v10 = vadd.f32 %v4379_v33, %v4317_v11  ;;  %v4418_v42 = vmul.f32 %v4317_v11, %v4317_v11  ;;  %3873 = vmatmul.bf16.gmra.mxu3 %v3725_v15 }
 0x263   : > { %v4259_v5 = vpop.f32.mrf.mxu0 }
 0x264   : > { %v4449_v8 = vadd.f32 %v4448_v4, %v4418_v42 }
 0x265   : > { %v3834_v34 = vpop.f32.mrf.mxu3 }
 0x266   : > { %4298 = vmatmul.bf16.gmra.mxu0 %v4150_v25  ;;  %v3893_v0 = vadd.f32 %v3834_v34, %v3212_v43 }
 0x268   : > { %v4318_v39 = vadd.f32 %v4259_v5, %v3893_v0  ;;  %v3155_v36 = vpop.f32.mrf.mxu2  ;;  %v2844_v38 = vpop.f32.mrf.mxu1 }
 0x269   : > { %v3213_v3 = vadd.f32 %v3155_v36, %v2899_v28  ;;  %v2900_v24 = vadd.f32 %v2844_v38, %v6397_v20 }
 0x26a   : > { %4350 = vst [vmem:[%s6720_s29 + $0x70] sm:$0xff] %v4318_v39  ;;  %v4381_v23 = vadd.f32 %v4380_v10, %v4318_v39  ;;  %v4419_v62 = vmul.f32 %v4318_v39, %v4318_v39 }
 0x26b   : > { %v4261_v41 = vpop.f32.mrf.mxu0 }
 0x26c   : > { %v4450_v61 = vadd.f32 %v4449_v8, %v4419_v62 }
 0x26d   : > { %v3836_v52 = vpop.f32.mrf.mxu3 }
 0x26e   : > { %v3894_v13 = vadd.f32 %v3836_v52, %v3213_v3 }
 0x270   : > { %v4319_v49 = vadd.f32 %v4261_v41, %v3894_v13  ;;  %v3158_v16 = vpop.f32.mrf.mxu2  ;;  %v2846_v17 = vpop.f32.mrf.mxu1 }
 0x271   : > { %v3214_v48 = vadd.f32 %v3158_v16, %v2900_v24  ;;  %v2901_v19 = vadd.f32 %v2846_v17, %v6423_v56 }
 0x272   : > { %4351 = vst [vmem:[%s6720_s29 + $0x78] sm:$0xff] %v4319_v49  ;;  %v4382_v51 = vadd.f32 %v4381_v23, %v4319_v49  ;;  %v4420_v22 = vmul.f32 %v4319_v49, %v4319_v49 }
 0x273   : > { %v4264_v21 = vpop.f32.mrf.mxu0 }
 0x274   : > { %v4451_v7 = vadd.f32 %v4450_v61, %v4420_v22 }
 0x275   : > { %v3839_v1 = vpop.f32.mrf.mxu3 }
 0x276   : > { %v3895_v31 = vadd.f32 %v3839_v1, %v3214_v48 }
 0x278   : > { %v4320_v57 = vadd.f32 %v4264_v21, %v3895_v31  ;;  %v3160_v33 = vpop.f32.mrf.mxu2  ;;  %v2849_v20 = vpop.f32.mrf.mxu1 }
 0x279   : > { %v3215_v30 = vadd.f32 %v3160_v33, %v2901_v19  ;;  %v2902_v27 = vadd.f32 %v2849_v20, %v6437_v29 }
 0x27a   : > { %4352 = vst [vmem:[%s6720_s29 + $0x80] sm:$0xff] %v4320_v57  ;;  %v4383_v60 = vadd.f32 %v4382_v51, %v4320_v57  ;;  %v4421_v46 = vmul.f32 %v4320_v57, %v4320_v57 }
 0x27b   : > { %v4266_v32 = vpop.f32.mrf.mxu0 }
 0x27c   : > { %v4452_v47 = vadd.f32 %v4451_v7, %v4421_v46 }
 0x27d   : > { %v3841_v4 = vpop.f32.mrf.mxu3 }
 0x27e   : > { %v3896_v45 = vadd.f32 %v3841_v4, %v3215_v30 }
 0x280   : > { %v4321_v40 = vadd.f32 %v4266_v32, %v3896_v45  ;;  %v3163_v44 = vpop.f32.mrf.mxu2  ;;  %v2851_v56 = vpop.f32.mrf.mxu1 }
 0x281   : > { %v3216_v59 = vadd.f32 %v3163_v44, %v2902_v27  ;;  %v2903_v9 = vadd.f32 %v2851_v56, %v6460_v58 }
 0x282   : > { %4353 = vst [vmem:[%s6720_s29 + $0x88] sm:$0xff] %v4321_v40  ;;  %v4384_v15 = vadd.f32 %v4383_v60, %v4321_v40  ;;  %v4422_v11 = vmul.f32 %v4321_v40, %v4321_v40 }
 0x283   : > { %v4269_v12 = vpop.f32.mrf.mxu0 }
 0x284   : > { %v4453_v25 = vadd.f32 %v4452_v47, %v4422_v11 }
 0x285   : > { %v3844_v10 = vpop.f32.mrf.mxu3 }
 0x286   : > { %v3897_v42 = vadd.f32 %v3844_v10, %v3216_v59 }
 0x288   : > { %v4322_v43 = vadd.f32 %v4269_v12, %v3897_v42  ;;  %v3165_v5 = vpop.f32.mrf.mxu2  ;;  %v2854_v29 = vpop.f32.mrf.mxu1 }
 0x289   : > { %v3217_v0 = vadd.f32 %v3165_v5, %v2903_v9  ;;  %v2904_v3 = vadd.f32 %v2854_v29, %v6475_v26 }
 0x28a   : > { %4354 = vst [vmem:[%s6720_s29 + $0x90] sm:$0xff] %v4322_v43  ;;  %v4385_v8 = vadd.f32 %v4384_v15, %v4322_v43  ;;  %v4423_v34 = vmul.f32 %v4322_v43, %v4322_v43 }
 0x28b   : > { %v4271_v39 = vpop.f32.mrf.mxu0 }
 0x28c   : > { %v4454_v28 = vadd.f32 %v4453_v25, %v4423_v34 }
 0x28d   : > { %v3846_v36 = vpop.f32.mrf.mxu3 }
 0x28e   : > { %v3898_v23 = vadd.f32 %v3846_v36, %v3217_v0 }
 0x290   : > { %v4323_v62 = vadd.f32 %v4271_v39, %v3898_v23  ;;  %v3168_v38 = vpop.f32.mrf.mxu2  ;;  %v2856_v58 = vpop.f32.mrf.mxu1 }
 0x291   : > { %v3218_v52 = vadd.f32 %v3168_v38, %v2904_v3  ;;  %v2905_v22 = vadd.f32 %v2856_v58, %v6501_v53 }
 0x292   : > { %4355 = vst [vmem:[%s6720_s29 + $0x98] sm:$0xff] %v4323_v62  ;;  %v4386_v41 = vadd.f32 %v4385_v8, %v4323_v62  ;;  %v4424_v61 = vmul.f32 %v4323_v62, %v4323_v62 }
 0x293   : > { %v4274_v13 = vpop.f32.mrf.mxu0 }
 0x294   : > { %v4455_v49 = vadd.f32 %v4454_v28, %v4424_v61 }
 0x295   : > { %v3849_v24 = vpop.f32.mrf.mxu3 }
 0x296   : > { %v3899_v16 = vadd.f32 %v3849_v24, %v3218_v52 }
 0x298   : > { %v4324_v51 = vadd.f32 %v4274_v13, %v3899_v16  ;;  %v3170_v48 = vpop.f32.mrf.mxu2  ;;  %v2859_v26 = vpop.f32.mrf.mxu1 }
 0x299   : > { %v3219_v7 = vadd.f32 %v3170_v48, %v2905_v22  ;;  %v2906_v60 = vadd.f32 %v2859_v26, %v6515_v2 }
 0x29a   : > { %4356 = vst [vmem:[%s6720_s29 + $0xa0] sm:$0xff] %v4324_v51  ;;  %v4387_v17 = vadd.f32 %v4386_v41, %v4324_v51  ;;  %v4425_v21 = vmul.f32 %v4324_v51, %v4324_v51 }
 0x29b   : > { %v4276_v1 = vpop.f32.mrf.mxu0 }
 0x29c   : > { %v4456_v31 = vadd.f32 %v4455_v49, %v4425_v21 }
 0x29d   : > { %v3851_v57 = vpop.f32.mrf.mxu3 }
 0x29e   : > { %v3900_v19 = vadd.f32 %v3851_v57, %v3219_v7 }
 0x2a0   : > { %v4325_v33 = vadd.f32 %v4276_v1, %v3900_v19  ;;  %v3173_v46 = vpop.f32.mrf.mxu2  ;;  %v2861_v53 = vpop.f32.mrf.mxu1 }
 0x2a1   : > { %v3220_v32 = vadd.f32 %v3173_v46, %v2906_v60  ;;  %v2907_v44 = vadd.f32 %v2861_v53, %v6538_v50 }
 0x2a2   : > { %4357 = vst [vmem:[%s6720_s29 + $0xa8] sm:$0xff] %v4325_v33  ;;  %v4388_v30 = vadd.f32 %v4387_v17, %v4325_v33  ;;  %v4426_v20 = vmul.f32 %v4325_v33, %v4325_v33 }
 0x2a3   : > { %v4279_v47 = vpop.f32.mrf.mxu0 }
 0x2a4   : > { %v4457_v4 = vadd.f32 %v4456_v31, %v4426_v20 }
 0x2a5   : > { %v3854_v45 = vpop.f32.mrf.mxu3 }
 0x2a6   : > { %v3901_v40 = vadd.f32 %v3854_v45, %v3220_v32 }
 0x2a8   : > { %v4326_v27 = vadd.f32 %v4279_v47, %v3901_v40  ;;  %v3175_v15 = vpop.f32.mrf.mxu2  ;;  %v2864_v2 = vpop.f32.mrf.mxu1 }
 0x2a9   : > { %v3221_v56 = vadd.f32 %v3175_v15, %v2907_v44  ;;  %v2908_v9 = vadd.f32 %v2864_v2, %v6553_v35 }
 0x2aa   : > { %4358 = vst [vmem:[%s6720_s29 + $0xb0] sm:$0xff] %v4326_v27  ;;  %v4389_v11 = vadd.f32 %v4388_v30, %v4326_v27  ;;  %v4427_v59 = vmul.f32 %v4326_v27, %v4326_v27 }
 0x2ab   : > { %v4281_v12 = vpop.f32.mrf.mxu0 }
 0x2ac   : > { %v4458_v25 = vadd.f32 %v4457_v4, %v4427_v59 }
 0x2ad   : > { %v3856_v10 = vpop.f32.mrf.mxu3 }
 0x2ae   : > { %v3902_v42 = vadd.f32 %v3856_v10, %v3221_v56 }
 0x2b0   : > { %v4327_v43 = vadd.f32 %v4281_v12, %v3902_v42  ;;  %v3178_v5 = vpop.f32.mrf.mxu2  ;;  %v2866_v50 = vpop.f32.mrf.mxu1 }
 0x2b1   : > { %v3222_v0 = vadd.f32 %v3178_v5, %v2908_v9  ;;  %v2909_v62 = vadd.f32 %v2866_v50, %v6579_v18 }
 0x2b2   : > { %4359 = vst [vmem:[%s6720_s29 + $0xb8] sm:$0xff] %v4327_v43  ;;  %v4390_v8 = vadd.f32 %v4389_v11, %v4327_v43  ;;  %v4428_v34 = vmul.f32 %v4327_v43, %v4327_v43 }
 0x2b3   : > { %v4284_v29 = vpop.f32.mrf.mxu0 }
 0x2b4   : > { %v4459_v39 = vadd.f32 %v4458_v25, %v4428_v34 }
 0x2b5   : > { %v3859_v28 = vpop.f32.mrf.mxu3 }
 0x2b6   : > { %v3903_v36 = vadd.f32 %v3859_v28, %v3222_v0 }
 0x2b8   : > { %v4328_v23 = vadd.f32 %v4284_v29, %v3903_v36  ;;  %v3180_v3 = vpop.f32.mrf.mxu2  ;;  %v2869_v35 = vpop.f32.mrf.mxu1 }
 0x2b9   : > { %v3223_v61 = vadd.f32 %v3180_v3, %v2909_v62  ;;  %v2910_v16 = vadd.f32 %v2869_v35, %v6593_v14 }
 0x2ba   : > { %4360 = vst [vmem:[%s6720_s29 + $0xc0] sm:$0xff] %v4328_v23  ;;  %v4391_v38 = vadd.f32 %v4390_v8, %v4328_v23  ;;  %v4429_v41 = vmul.f32 %v4328_v23, %v4328_v23 }
 0x2bb   : > { %v4286_v52 = vpop.f32.mrf.mxu0 }
 0x2bc   : > { %v4460_v58 = vadd.f32 %v4459_v39, %v4429_v41 }
 0x2bd   : > { %v3861_v13 = vpop.f32.mrf.mxu3 }
 0x2be   : > { %v3904_v49 = vadd.f32 %v3861_v13, %v3223_v61 }
 0x2c0   : > { %v4329_v24 = vadd.f32 %v4286_v52, %v3904_v49  ;;  %v3183_v51 = vpop.f32.mrf.mxu2  ;;  %v2871_v18 = vpop.f32.mrf.mxu1 }
 0x2c1   : > { %v3224_v17 = vadd.f32 %v3183_v51, %v2910_v16  ;;  %v2911_v57 = vadd.f32 %v2871_v18, %v6616_v63 }
 0x2c2   : > { %4361 = vst [vmem:[%s6720_s29 + $0xc8] sm:$0xff] %v4329_v24  ;;  %v4392_v22 = vadd.f32 %v4391_v38, %v4329_v24  ;;  %v4430_v48 = vmul.f32 %v4329_v24, %v4329_v24 }
 0x2c3   : > { %v4289_v21 = vpop.f32.mrf.mxu0 }
 0x2c4   : > { %v4461_v7 = vadd.f32 %v4460_v58, %v4430_v48 }
 0x2c5   : > { %v3864_v26 = vpop.f32.mrf.mxu3 }
 0x2c6   : > { %v3905_v1 = vadd.f32 %v3864_v26, %v3224_v17 }
 0x2c8   : > { %v4330_v31 = vadd.f32 %v4289_v21, %v3905_v1  ;;  %v3185_v19 = vpop.f32.mrf.mxu2  ;;  %v2874_v14 = vpop.f32.mrf.mxu1 }
 0x2c9   : > { %v3225_v46 = vadd.f32 %v3185_v19, %v2911_v57  ;;  %v2912_v4 = vadd.f32 %v2874_v14, %v6631_v55 }
 0x2ca   : > { %4362 = vst [vmem:[%s6720_s29 + $0xd0] sm:$0xff] %v4330_v31  ;;  %v4393_v33 = vadd.f32 %v4392_v22, %v4330_v31  ;;  %v4431_v60 = vmul.f32 %v4330_v31, %v4330_v31 }
 0x2cb   : > { %v4291_v30 = vpop.f32.mrf.mxu0 }
 0x2cc   : > { %v4462_v20 = vadd.f32 %v4461_v7, %v4431_v60 }
 0x2cd   : > { %v3866_v32 = vpop.f32.mrf.mxu3 }
 0x2ce   : > { %v3906_v53 = vadd.f32 %v3866_v32, %v3225_v46 }
 0x2d0   : > { %v4331_v47 = vadd.f32 %v4291_v30, %v3906_v53  ;;  %v3188_v45 = vpop.f32.mrf.mxu2  ;;  %v2876_v63 = vpop.f32.mrf.mxu1 }
 0x2d1   : > { %v3226_v44 = vadd.f32 %v3188_v45, %v2912_v4  ;;  %v2913_v12 = vadd.f32 %v2876_v63, %v6657_v54 }
 0x2d2   : > { %4363 = vst [vmem:[%s6720_s29 + $0xd8] sm:$0xff] %v4331_v47  ;;  %v4394_v40 = vadd.f32 %v4393_v33, %v4331_v47  ;;  %v4432_v27 = vmul.f32 %v4331_v47, %v4331_v47 }
 0x2d3   : > { %v4294_v15 = vpop.f32.mrf.mxu0 }
 0x2d4   : > { %v4463_v11 = vadd.f32 %v4462_v20, %v4432_v27 }
 0x2d5   : > { %v3869_v59 = vpop.f32.mrf.mxu3 }
 0x2d6   : > { %v3907_v56 = vadd.f32 %v3869_v59, %v3226_v44 }
 0x2d8   : > { %v4332_v2 = vadd.f32 %v4294_v15, %v3907_v56  ;;  %v3190_v25 = vpop.f32.mrf.mxu2  ;;  %v2879_v55 = vpop.f32.mrf.mxu1 }
 0x2d9   : > { %v3227_v43 = vadd.f32 %v3190_v25, %v2913_v12  ;;  %v2914_v50 = vadd.f32 %v2879_v55, %v6671_v6 }
 0x2da   : > { %4364 = vst [vmem:[%s6720_s29 + $0xe0] sm:$0xff] %v4332_v2  ;;  %v4395_v10 = vadd.f32 %v4394_v40, %v4332_v2  ;;  %v4433_v42 = vmul.f32 %v4332_v2, %v4332_v2 }
 0x2db   : > { %v4296_v9 = vpop.f32.mrf.mxu0 }
 0x2dc   : > { %v4464_v5 = vadd.f32 %v4463_v11, %v4433_v42 }
 0x2dd   : > { %v3871_v8 = vpop.f32.mrf.mxu3 }
 0x2de   : > { %v3908_v34 = vadd.f32 %v3871_v8, %v3227_v43 }
 0x2e0   : > { %v4333_v0 = vadd.f32 %v4296_v9, %v3908_v34  ;;  %v3193_v29 = vpop.f32.mrf.mxu2  ;;  %v2881_v23 = vpop.f32.mrf.mxu1 }
 0x2e1   : > { %v3228_v36 = vadd.f32 %v3193_v29, %v2914_v50  ;;  %v2915_v61 = vadd.f32 %v2881_v23, %v6703_v37 }
 0x2e2   : > { %4365 = vst [vmem:[%s6720_s29 + $0xe8] sm:$0xff] %v4333_v0  ;;  %v4396_v39 = vadd.f32 %v4395_v10, %v4333_v0  ;;  %v4434_v28 = vmul.f32 %v4333_v0, %v4333_v0 }
 0x2e3   : > { %v4299_v62 = vpop.f32.mrf.mxu0 }
 0x2e4   : > { %v4465_v54 = vadd.f32 %v4464_v5, %v4434_v28 }
 0x2e5   : > { %v3874_v3 = vpop.f32.mrf.mxu3 }
 0x2e6   : > { %v3909_v38 = vadd.f32 %v3874_v3, %v3228_v36 }
 0x2e8   : > { %v4334_v41 = vadd.f32 %v4299_v62, %v3909_v38  ;;  %v3195_v35 = vpop.f32.mrf.mxu2 }
 0x2e9   : > { %v3229_v13 = vadd.f32 %v3195_v35, %v2915_v61 }
 0x2ea   : > { %4366 = vst [vmem:[%s6720_s29 + $0xf0] sm:$0xff] %v4334_v41  ;;  %v4397_v52 = vadd.f32 %v4396_v39, %v4334_v41  ;;  %v4435_v58 = vmul.f32 %v4334_v41, %v4334_v41 }
 0x2eb   : > { %v4301_v16 = vpop.f32.mrf.mxu0 }
 0x2ec   : > { %v4466_v6 = vadd.f32 %v4465_v54, %v4435_v58 }
 0x2ed   : > { %v3876_v49 = vpop.f32.mrf.mxu3 }
 0x2ee   : > { %v3910_v24 = vadd.f32 %v3876_v49, %v3229_v13 }
 0x2f0   : > { %v4335_v51 = vadd.f32 %v4301_v16, %v3910_v24 }
 0x2f2   : > { %4367 = vst [vmem:[%s6720_s29 + $0xf8] sm:$0xff] %v4335_v51  ;;  %v4398_v22 = vadd.f32 %v4397_v52, %v4335_v51  ;;  %v4436_v48 = vmul.f32 %v4335_v51, %v4335_v51 }
 0x2f4   : > { %v4399_v17 = vrot.slane %v4398_v22, 4  ;;  %v4467_v18 = vadd.f32 %v4466_v6, %v4436_v48 }
 0x2f6   : > { %v4400_v21 = vadd.f32 %v4399_v17, %v4398_v22  ;;  %v4468_v7 = vrot.slane %v4467_v18, 4 }
 0x2f8   : > { %v4401_v26 = vrot.slane %v4400_v21, 2  ;;  %v4469_v37 = vadd.f32 %v4468_v7, %v4467_v18 }
 0x2fa   : > { %v4402_v1 = vadd.f32 %v4401_v26, %v4400_v21  ;;  %v4470_v31 = vrot.slane %v4469_v37, 2 }
 0x2fc   : > { %v4403_v57 = vrot.slane %v4402_v1, 1  ;;  %v4471_v19 = vadd.f32 %v4470_v31, %v4469_v37 }
 0x2fe   : > { %v4472_v33 = vrot.slane %v4471_v19, 1  ;;  %v4404_v60 = vadd.f32 %v4403_v57, %v4402_v1 }
 0x300   : > { %v4473_v46 = vadd.f32 %v4472_v33, %v4471_v19 }
 0x302   : > { %v4475_v14 = vsel %vm4474_vm6, %v4404_v60, %v4473_v46 }
 0x303   : > { %4476 = vst [vmem:[%s182_s5] sm:$0x3] %v4475_v14 }
 0x304 PF: > { %s14_s12 = sadd.s32 1, %s5507_s12  }
 0x305   : > { %p11_p5 = scmp.ge.s32.totalorder %s14_s12, 4  }
 0x307   :  { %13 = sbr.rel (!%p11_p5) target bundleno = 1 (0x1), region = 72 }

</bundles_post_ra>
